<compile_context>
chip_gen: v7x
topology: tpu7x:2x2x1
jax: 0.10.0
libtpu: 0.0.40
codegen_flags: <defaults>
</compile_context>

<pallas_src>
import functools

import jax
import jax.numpy as jnp
from jax.experimental import pallas as pl
from jax.experimental.pallas import tpu as pltpu

HIDDEN = 64
NUM_LAYERS = 3
SEQ = 8          # forced by the module: self.weights has 8 entries broadcast over dim=1
OUTPUT = 1


def _lstm_cell(g, c, H):
    """One LSTM cell update from pre-activation gates g (B, 4H) in (i, f, o, g) order."""
    sig = jax.nn.sigmoid(g[:, :3 * H])        # one EUP launch for i, f, o
    i_g = sig[:, 0 * H:1 * H]
    f_g = sig[:, 1 * H:2 * H]
    o_g = sig[:, 2 * H:3 * H]
    g_g = jnp.tanh(g[:, 3 * H:4 * H])         # one EUP launch for g
    c_new = f_g * c + i_g * g_g
    h_new = o_g * jnp.tanh(c_new)
    return h_new, c_new


def weight_lstm_kernel(x_ref,
                       wih0_ref, whh0_ref, b0_ref,
                       wih1_ref, whh1_ref, b1_ref,
                       wih2_ref, whh2_ref, b2_ref,
                       wfc_ref,
                       tw_ref, bfc_ref,
                       out_ref,
                       *, T, B, H):
    f32 = jnp.float32

    # ---- hoisted layer-0 input projection: one (T*B, I) @ (I, 4H) matmul + bias ----
    gates0 = jnp.dot(x_ref[...], wih0_ref[...],
                     preferred_element_type=f32) + b0_ref[...]          # (T*B, 4H)

    whh0 = whh0_ref[...]
    wih1 = wih1_ref[...]
    whh1 = whh1_ref[...]
    wih2 = wih2_ref[...]
    whh2 = whh2_ref[...]
    b1 = b1_ref[...]
    b2 = b2_ref[...]

    zero = jnp.zeros((B, H), f32)
    h0, c0 = zero, zero
    h1, c1 = zero, zero
    h2, c2 = zero, zero
    acc = zero                                 # weighted temporal sum of layer-2 outputs

    # ---- wavefront over supersteps: layer2 @ t=s-2, layer1 @ t=s-1, layer0 @ t=s ----
    # Processed top-down so layer l reads layer (l-1)'s output from the PREVIOUS
    # superstep before it is overwritten this superstep.  Fully static / unrolled.
    for s in range(T + 2):
        # ---------------- layer 2, time step t2 = s - 2 ----------------
        if s >= 2:
            t2 = s - 2
            g2 = jnp.dot(h1, wih2, preferred_element_type=f32) + b2
            if t2 > 0:                         # skip h_{-1} @ W_hh (it is zero)
                g2 = g2 + jnp.dot(h2, whh2, preferred_element_type=f32)
            h2, c2 = _lstm_cell(g2, c2, H)
            acc = acc + tw_ref[t2] * h2        # tw[t2] is a scalar read from SMEM

        # ---------------- layer 1, time step t1 = s - 1 ----------------
        if 1 <= s <= T:
            t1 = s - 1
            g1 = jnp.dot(h0, wih1, preferred_element_type=f32) + b1
            if t1 > 0:
                g1 = g1 + jnp.dot(h1, whh1, preferred_element_type=f32)
            h1, c1 = _lstm_cell(g1, c1, H)

        # ---------------- layer 0, time step t0 = s --------------------
        if s < T:
            g0 = gates0[s * B:(s + 1) * B, :]
            if s > 0:
                g0 = g0 + jnp.dot(h0, whh0, preferred_element_type=f32)
            h0, c0 = _lstm_cell(g0, c0, H)

    # ---- head: VPU multiply + lane reduction (no N=1 MXU pass), sigmoid, store ----
    logits = jnp.sum(acc * wfc_ref[...], axis=-1, keepdims=True) + bfc_ref[0]
    out_ref[...] = jax.nn.sigmoid(logits)


def weight_lstm_forward(x, params):
    """x: (B, T, I) float32 -> (B,) float32."""
    B, T, I = x.shape
    assert T == SEQ, f"Weight_LSTMModel requires seq_len == {SEQ} (self.weights has {SEQ} entries)"
    H = HIDDEN

    # Pad batch to a multiple of 8 so sublanes / MXU rows aren't mostly padding.
    B_pad = max(8, ((B + 7) // 8) * 8)
    if B_pad != B:
        x = jnp.concatenate([x, jnp.zeros((B_pad - B, T, I), x.dtype)], axis=0)

    # time-major, flattened to (T*B_pad, I): row index = t*B_pad + b
    x_tm = jnp.swapaxes(x, 0, 1).reshape(T * B_pad, I)

    kernel = functools.partial(weight_lstm_kernel, T=T, B=B_pad, H=H)
    vmem = pl.BlockSpec(memory_space=pltpu.MemorySpace.VMEM)
    smem = pl.BlockSpec(memory_space=pltpu.MemorySpace.SMEM)

    out = pl.pallas_call(
        kernel,
        out_shape=jax.ShapeDtypeStruct((B_pad, OUTPUT), jnp.float32),
        in_specs=[vmem] * 11 + [smem, smem],
        out_specs=vmem,
    )(x_tm,
      params["wih0"], params["whh0"], params["b0"],
      params["wih1"], params["whh1"], params["b1"],
      params["wih2"], params["whh2"], params["b2"],
      params["wfc"],
      params["tw"], params["bfc"])
    return out[:B, 0]


weight_lstm_forward = jax.jit(weight_lstm_forward)


def _reorder_gates(w, hidden):
    """PyTorch LSTM gate order (i, f, g, o) -> kernel order (i, f, o, g), along axis 0."""
    i, f, g, o = jnp.split(w, 4, axis=0)
    return jnp.concatenate([i, f, o, g], axis=0)


def init_params(key, input_size, hidden=HIDDEN, num_layers=NUM_LAYERS):
    """Deterministic synthetic parameters (PyTorch-style U(-1/sqrt(H), 1/sqrt(H)))."""
    keys = jax.random.split(key, 4 * num_layers + 3)
    k = 1.0 / float(hidden) ** 0.5
    params = {}
    in_dims = [input_size] + [hidden] * (num_layers - 1)
    ki = 0
    for l, d in enumerate(in_dims):
        w_ih = jax.random.uniform(keys[ki], (4 * hidden, d), minval=-k, maxval=k); ki += 1
        w_hh = jax.random.uniform(keys[ki], (4 * hidden, hidden), minval=-k, maxval=k); ki += 1
        b_ih = jax.random.uniform(keys[ki], (4 * hidden,), minval=-k, maxval=k); ki += 1
        b_hh = jax.random.uniform(keys[ki], (4 * hidden,), minval=-k, maxval=k); ki += 1
        # reorder gates (i,f,g,o)->(i,f,o,g), pre-transpose so the kernel computes x @ W,
        # and fold the two PyTorch biases together.
        params[f"wih{l}"] = _reorder_gates(w_ih, hidden).T.astype(jnp.float32)   # (d, 4H)
        params[f"whh{l}"] = _reorder_gates(w_hh, hidden).T.astype(jnp.float32)   # (H, 4H)
        params[f"b{l}"] = _reorder_gates(b_ih + b_hh, hidden).reshape(
            1, 4 * hidden).astype(jnp.float32)                                   # (1, 4H)
    # self.weights = nn.Parameter(torch.randn(8))
    params["tw"] = jax.random.normal(keys[ki], (SEQ,), jnp.float32); ki += 1     # (T,) -> SMEM
    w_fc = jax.random.uniform(keys[ki], (OUTPUT, hidden), minval=-k, maxval=k); ki += 1
    b_fc = jax.random.uniform(keys[ki], (OUTPUT,), minval=-k, maxval=k); ki += 1
    params["wfc"] = w_fc.astype(jnp.float32)                                     # (1, H)
    params["bfc"] = b_fc.astype(jnp.float32)                                     # (1,) -> SMEM
    return params


def reference_forward(x, params):
    """Pure-JAX reference mirroring the PyTorch forward (kernel gate ordering i,f,o,g)."""
    B, T, I = x.shape
    H = HIDDEN

    def layer(seq, wih, whh, b):
        def step(carry, x_t):
            h, c = carry
            g = x_t @ wih + h @ whh + b[0]
            i = jax.nn.sigmoid(g[:, :H])
            f = jax.nn.sigmoid(g[:, H:2 * H])
            o = jax.nn.sigmoid(g[:, 2 * H:3 * H])
            gg = jnp.tanh(g[:, 3 * H:])
            c = f * c + i * gg
            h = o * jnp.tanh(c)
            return (h, c), h
        init = (jnp.zeros((B, H), jnp.float32), jnp.zeros((B, H), jnp.float32))
        _, hs = jax.lax.scan(step, init, jnp.swapaxes(seq, 0, 1))
        return jnp.swapaxes(hs, 0, 1)

    seq = x
    for l in range(NUM_LAYERS):
        seq = layer(seq, params[f"wih{l}"], params[f"whh{l}"], params[f"b{l}"])
    ws = jnp.sum(seq * params["tw"].reshape(1, T, 1), axis=1)       # (B, H)
    logits = ws @ params["wfc"].T + params["bfc"]                   # (B, 1)
    return jax.nn.sigmoid(logits).reshape(-1)


if __name__ == "__main__":
    key = jax.random.PRNGKey(0)
    k_x, k_p = jax.random.split(key)

    B, T, I = 2, SEQ, 16          # batch=2, seq=8 (forced by weights(8)), input_size=16
    x = jax.random.normal(k_x, (B, T, I), dtype=jnp.float32)
    params = init_params(k_p, input_size=I)

    y = weight_lstm_forward(x, params)
    jax.block_until_ready(y)

    y_ref = reference_forward(x, params)
    assert y.shape == (B,)
    assert jnp.allclose(y, y_ref, atol=1e-3, rtol=1e-3), (y, y_ref)

    print("KERNEL_OK")
</pallas_src>

<mosaic_0001>
module attributes {stable_mosaic.version = 11 : i64} {
  func.func @weight_lstm_kernel(%arg0: memref<64x16xf32, #tpu.memory_space<vmem>>, %arg1: memref<16x256xf32, #tpu.memory_space<vmem>>, %arg2: memref<64x256xf32, #tpu.memory_space<vmem>>, %arg3: memref<1x256xf32, #tpu.memory_space<vmem>>, %arg4: memref<64x256xf32, #tpu.memory_space<vmem>>, %arg5: memref<64x256xf32, #tpu.memory_space<vmem>>, %arg6: memref<1x256xf32, #tpu.memory_space<vmem>>, %arg7: memref<64x256xf32, #tpu.memory_space<vmem>>, %arg8: memref<64x256xf32, #tpu.memory_space<vmem>>, %arg9: memref<1x256xf32, #tpu.memory_space<vmem>>, %arg10: memref<1x64xf32, #tpu.memory_space<vmem>>, %arg11: memref<8xf32, #tpu.memory_space<smem>>, %arg12: memref<1xf32, #tpu.memory_space<smem>>, %arg13: memref<8x1xf32, #tpu.memory_space<vmem>>) attributes {dimension_semantics = [], scalar_prefetch = 0 : i64, scratch_operands = 0 : i64, tpu.core_type = #tpu.core_type<tc>} {
    %c0 = arith.constant 0 : index
    %c0_0 = arith.constant 0 : index
    %0 = vector.load %arg0[%c0, %c0_0] : memref<64x16xf32, #tpu.memory_space<vmem>>, vector<64x16xf32>
    %c0_1 = arith.constant 0 : index
    %c0_2 = arith.constant 0 : index
    %1 = vector.load %arg1[%c0_1, %c0_2] : memref<16x256xf32, #tpu.memory_space<vmem>>, vector<16x256xf32>
    %cst = arith.constant dense<0.000000e+00> : vector<64x256xf32>
    %2 = tpu.matmul %0, %1, %cst {dimension_numbers = #tpu.dot_dimension_numbers<[1], [0], [0], [1], [0, 0, 1, 1], [], []>} : vector<64x16xf32>, vector<16x256xf32>, vector<64x256xf32> -> vector<64x256xf32>
    %c0_3 = arith.constant 0 : index
    %c0_4 = arith.constant 0 : index
    %3 = vector.load %arg3[%c0_3, %c0_4] : memref<1x256xf32, #tpu.memory_space<vmem>>, vector<1x256xf32>
    %4 = vector.broadcast %3 : vector<1x256xf32> to vector<64x256xf32>
    %5 = arith.addf %2, %4 : vector<64x256xf32>
    %c0_5 = arith.constant 0 : index
    %c0_6 = arith.constant 0 : index
    %6 = vector.load %arg2[%c0_5, %c0_6] : memref<64x256xf32, #tpu.memory_space<vmem>>, vector<64x256xf32>
    %c0_7 = arith.constant 0 : index
    %c0_8 = arith.constant 0 : index
    %7 = vector.load %arg4[%c0_7, %c0_8] : memref<64x256xf32, #tpu.memory_space<vmem>>, vector<64x256xf32>
    %c0_9 = arith.constant 0 : index
    %c0_10 = arith.constant 0 : index
    %8 = vector.load %arg5[%c0_9, %c0_10] : memref<64x256xf32, #tpu.memory_space<vmem>>, vector<64x256xf32>
    %c0_11 = arith.constant 0 : index
    %c0_12 = arith.constant 0 : index
    %9 = vector.load %arg7[%c0_11, %c0_12] : memref<64x256xf32, #tpu.memory_space<vmem>>, vector<64x256xf32>
    %c0_13 = arith.constant 0 : index
    %c0_14 = arith.constant 0 : index
    %10 = vector.load %arg8[%c0_13, %c0_14] : memref<64x256xf32, #tpu.memory_space<vmem>>, vector<64x256xf32>
    %c0_15 = arith.constant 0 : index
    %c0_16 = arith.constant 0 : index
    %11 = vector.load %arg6[%c0_15, %c0_16] : memref<1x256xf32, #tpu.memory_space<vmem>>, vector<1x256xf32>
    %c0_17 = arith.constant 0 : index
    %c0_18 = arith.constant 0 : index
    %12 = vector.load %arg9[%c0_17, %c0_18] : memref<1x256xf32, #tpu.memory_space<vmem>>, vector<1x256xf32>
    %cst_19 = arith.constant 0.000000e+00 : f32
    %13 = vector.broadcast %cst_19 : f32 to vector<8x64xf32>
    %14 = vector.extract_strided_slice %5 {offsets = [0, 0], sizes = [8, 256], strides = [1, 1]} : vector<64x256xf32> to vector<8x256xf32>
    %15 = vector.extract_strided_slice %14 {offsets = [0, 0], sizes = [8, 192], strides = [1, 1]} : vector<8x256xf32> to vector<8x192xf32>
    %16 = arith.negf %15 : vector<8x192xf32>
    %17 = math.exp %16 : vector<8x192xf32>
    %cst_20 = arith.constant 1.000000e+00 : f32
    %18 = vector.broadcast %cst_20 : f32 to vector<8x192xf32>
    %19 = arith.addf %18, %17 : vector<8x192xf32>
    %20 = arith.divf %18, %19 : vector<8x192xf32>
    %21 = vector.extract_strided_slice %20 {offsets = [0, 0], sizes = [8, 64], strides = [1, 1]} : vector<8x192xf32> to vector<8x64xf32>
    %22 = vector.extract_strided_slice %20 {offsets = [0, 64], sizes = [8, 64], strides = [1, 1]} : vector<8x192xf32> to vector<8x64xf32>
    %23 = vector.extract_strided_slice %20 {offsets = [0, 128], sizes = [8, 64], strides = [1, 1]} : vector<8x192xf32> to vector<8x64xf32>
    %24 = vector.extract_strided_slice %14 {offsets = [0, 192], sizes = [8, 64], strides = [1, 1]} : vector<8x256xf32> to vector<8x64xf32>
    %25 = math.tanh %24 : vector<8x64xf32>
    %26 = arith.mulf %22, %13 : vector<8x64xf32>
    %27 = arith.mulf %21, %25 : vector<8x64xf32>
    %28 = arith.addf %26, %27 : vector<8x64xf32>
    %29 = math.tanh %28 : vector<8x64xf32>
    %30 = arith.mulf %23, %29 : vector<8x64xf32>
    %cst_21 = arith.constant dense<0.000000e+00> : vector<8x256xf32>
    %31 = tpu.matmul %30, %7, %cst_21 {dimension_numbers = #tpu.dot_dimension_numbers<[1], [0], [0], [1], [0, 0, 1, 1], [], []>} : vector<8x64xf32>, vector<64x256xf32>, vector<8x256xf32> -> vector<8x256xf32>
    %32 = vector.broadcast %11 : vector<1x256xf32> to vector<8x256xf32>
    %33 = arith.addf %31, %32 : vector<8x256xf32>
    %34 = vector.extract_strided_slice %33 {offsets = [0, 0], sizes = [8, 192], strides = [1, 1]} : vector<8x256xf32> to vector<8x192xf32>
    %35 = arith.negf %34 : vector<8x192xf32>
    %36 = math.exp %35 : vector<8x192xf32>
    %cst_22 = arith.constant 1.000000e+00 : f32
    %37 = vector.broadcast %cst_22 : f32 to vector<8x192xf32>
    %38 = arith.addf %37, %36 : vector<8x192xf32>
    %39 = arith.divf %37, %38 : vector<8x192xf32>
    %40 = vector.extract_strided_slice %39 {offsets = [0, 0], sizes = [8, 64], strides = [1, 1]} : vector<8x192xf32> to vector<8x64xf32>
    %41 = vector.extract_strided_slice %39 {offsets = [0, 64], sizes = [8, 64], strides = [1, 1]} : vector<8x192xf32> to vector<8x64xf32>
    %42 = vector.extract_strided_slice %39 {offsets = [0, 128], sizes = [8, 64], strides = [1, 1]} : vector<8x192xf32> to vector<8x64xf32>
    %43 = vector.extract_strided_slice %33 {offsets = [0, 192], sizes = [8, 64], strides = [1, 1]} : vector<8x256xf32> to vector<8x64xf32>
    %44 = math.tanh %43 : vector<8x64xf32>
    %45 = arith.mulf %41, %13 : vector<8x64xf32>
    %46 = arith.mulf %40, %44 : vector<8x64xf32>
    %47 = arith.addf %45, %46 : vector<8x64xf32>
    %48 = math.tanh %47 : vector<8x64xf32>
    %49 = arith.mulf %42, %48 : vector<8x64xf32>
    %50 = vector.extract_strided_slice %5 {offsets = [8, 0], sizes = [8, 256], strides = [1, 1]} : vector<64x256xf32> to vector<8x256xf32>
    %cst_23 = arith.constant dense<0.000000e+00> : vector<8x256xf32>
    %51 = tpu.matmul %30, %6, %cst_23 {dimension_numbers = #tpu.dot_dimension_numbers<[1], [0], [0], [1], [0, 0, 1, 1], [], []>} : vector<8x64xf32>, vector<64x256xf32>, vector<8x256xf32> -> vector<8x256xf32>
    %52 = arith.addf %50, %51 : vector<8x256xf32>
    %53 = vector.extract_strided_slice %52 {offsets = [0, 0], sizes = [8, 192], strides = [1, 1]} : vector<8x256xf32> to vector<8x192xf32>
    %54 = arith.negf %53 : vector<8x192xf32>
    %55 = math.exp %54 : vector<8x192xf32>
    %cst_24 = arith.constant 1.000000e+00 : f32
    %56 = vector.broadcast %cst_24 : f32 to vector<8x192xf32>
    %57 = arith.addf %56, %55 : vector<8x192xf32>
    %58 = arith.divf %56, %57 : vector<8x192xf32>
    %59 = vector.extract_strided_slice %58 {offsets = [0, 0], sizes = [8, 64], strides = [1, 1]} : vector<8x192xf32> to vector<8x64xf32>
    %60 = vector.extract_strided_slice %58 {offsets = [0, 64], sizes = [8, 64], strides = [1, 1]} : vector<8x192xf32> to vector<8x64xf32>
    %61 = vector.extract_strided_slice %58 {offsets = [0, 128], sizes = [8, 64], strides = [1, 1]} : vector<8x192xf32> to vector<8x64xf32>
    %62 = vector.extract_strided_slice %52 {offsets = [0, 192], sizes = [8, 64], strides = [1, 1]} : vector<8x256xf32> to vector<8x64xf32>
    %63 = math.tanh %62 : vector<8x64xf32>
    %64 = arith.mulf %60, %28 : vector<8x64xf32>
    %65 = arith.mulf %59, %63 : vector<8x64xf32>
    %66 = arith.addf %64, %65 : vector<8x64xf32>
    %67 = math.tanh %66 : vector<8x64xf32>
    %68 = arith.mulf %61, %67 : vector<8x64xf32>
    %cst_25 = arith.constant dense<0.000000e+00> : vector<8x256xf32>
    %69 = tpu.matmul %49, %9, %cst_25 {dimension_numbers = #tpu.dot_dimension_numbers<[1], [0], [0], [1], [0, 0, 1, 1], [], []>} : vector<8x64xf32>, vector<64x256xf32>, vector<8x256xf32> -> vector<8x256xf32>
    %70 = vector.broadcast %12 : vector<1x256xf32> to vector<8x256xf32>
    %71 = arith.addf %69, %70 : vector<8x256xf32>
    %72 = vector.extract_strided_slice %71 {offsets = [0, 0], sizes = [8, 192], strides = [1, 1]} : vector<8x256xf32> to vector<8x192xf32>
    %73 = arith.negf %72 : vector<8x192xf32>
    %74 = math.exp %73 : vector<8x192xf32>
    %cst_26 = arith.constant 1.000000e+00 : f32
    %75 = vector.broadcast %cst_26 : f32 to vector<8x192xf32>
    %76 = arith.addf %75, %74 : vector<8x192xf32>
    %77 = arith.divf %75, %76 : vector<8x192xf32>
    %78 = vector.extract_strided_slice %77 {offsets = [0, 0], sizes = [8, 64], strides = [1, 1]} : vector<8x192xf32> to vector<8x64xf32>
    %79 = vector.extract_strided_slice %77 {offsets = [0, 64], sizes = [8, 64], strides = [1, 1]} : vector<8x192xf32> to vector<8x64xf32>
    %80 = vector.extract_strided_slice %77 {offsets = [0, 128], sizes = [8, 64], strides = [1, 1]} : vector<8x192xf32> to vector<8x64xf32>
    %81 = vector.extract_strided_slice %71 {offsets = [0, 192], sizes = [8, 64], strides = [1, 1]} : vector<8x256xf32> to vector<8x64xf32>
    %82 = math.tanh %81 : vector<8x64xf32>
    %83 = arith.mulf %79, %13 : vector<8x64xf32>
    %84 = arith.mulf %78, %82 : vector<8x64xf32>
    %85 = arith.addf %83, %84 : vector<8x64xf32>
    %86 = math.tanh %85 : vector<8x64xf32>
    %87 = arith.mulf %80, %86 : vector<8x64xf32>
    %c0_27 = arith.constant 0 : index
    %88 = memref.load %arg11[%c0_27] : memref<8xf32, #tpu.memory_space<smem>>
    %89 = vector.broadcast %88 : f32 to vector<8x64xf32>
    %90 = arith.mulf %89, %87 : vector<8x64xf32>
    %91 = arith.addf %13, %90 : vector<8x64xf32>
    %cst_28 = arith.constant dense<0.000000e+00> : vector<8x256xf32>
    %92 = tpu.matmul %68, %7, %cst_28 {dimension_numbers = #tpu.dot_dimension_numbers<[1], [0], [0], [1], [0, 0, 1, 1], [], []>} : vector<8x64xf32>, vector<64x256xf32>, vector<8x256xf32> -> vector<8x256xf32>
    %93 = vector.broadcast %11 : vector<1x256xf32> to vector<8x256xf32>
    %94 = arith.addf %92, %93 : vector<8x256xf32>
    %cst_29 = arith.constant dense<0.000000e+00> : vector<8x256xf32>
    %95 = tpu.matmul %49, %8, %cst_29 {dimension_numbers = #tpu.dot_dimension_numbers<[1], [0], [0], [1], [0, 0, 1, 1], [], []>} : vector<8x64xf32>, vector<64x256xf32>, vector<8x256xf32> -> vector<8x256xf32>
    %96 = arith.addf %94, %95 : vector<8x256xf32>
    %97 = vector.extract_strided_slice %96 {offsets = [0, 0], sizes = [8, 192], strides = [1, 1]} : vector<8x256xf32> to vector<8x192xf32>
    %98 = arith.negf %97 : vector<8x192xf32>
    %99 = math.exp %98 : vector<8x192xf32>
    %cst_30 = arith.constant 1.000000e+00 : f32
    %100 = vector.broadcast %cst_30 : f32 to vector<8x192xf32>
    %101 = arith.addf %100, %99 : vector<8x192xf32>
    %102 = arith.divf %100, %101 : vector<8x192xf32>
    %103 = vector.extract_strided_slice %102 {offsets = [0, 0], sizes = [8, 64], strides = [1, 1]} : vector<8x192xf32> to vector<8x64xf32>
    %104 = vector.extract_strided_slice %102 {offsets = [0, 64], sizes = [8, 64], strides = [1, 1]} : vector<8x192xf32> to vector<8x64xf32>
    %105 = vector.extract_strided_slice %102 {offsets = [0, 128], sizes = [8, 64], strides = [1, 1]} : vector<8x192xf32> to vector<8x64xf32>
    %106 = vector.extract_strided_slice %96 {offsets = [0, 192], sizes = [8, 64], strides = [1, 1]} : vector<8x256xf32> to vector<8x64xf32>
    %107 = math.tanh %106 : vector<8x64xf32>
    %108 = arith.mulf %104, %47 : vector<8x64xf32>
    %109 = arith.mulf %103, %107 : vector<8x64xf32>
    %110 = arith.addf %108, %109 : vector<8x64xf32>
    %111 = math.tanh %110 : vector<8x64xf32>
    %112 = arith.mulf %105, %111 : vector<8x64xf32>
    %113 = vector.extract_strided_slice %5 {offsets = [16, 0], sizes = [8, 256], strides = [1, 1]} : vector<64x256xf32> to vector<8x256xf32>
    %cst_31 = arith.constant dense<0.000000e+00> : vector<8x256xf32>
    %114 = tpu.matmul %68, %6, %cst_31 {dimension_numbers = #tpu.dot_dimension_numbers<[1], [0], [0], [1], [0, 0, 1, 1], [], []>} : vector<8x64xf32>, vector<64x256xf32>, vector<8x256xf32> -> vector<8x256xf32>
    %115 = arith.addf %113, %114 : vector<8x256xf32>
    %116 = vector.extract_strided_slice %115 {offsets = [0, 0], sizes = [8, 192], strides = [1, 1]} : vector<8x256xf32> to vector<8x192xf32>
    %117 = arith.negf %116 : vector<8x192xf32>
    %118 = math.exp %117 : vector<8x192xf32>
    %cst_32 = arith.constant 1.000000e+00 : f32
    %119 = vector.broadcast %cst_32 : f32 to vector<8x192xf32>
    %120 = arith.addf %119, %118 : vector<8x192xf32>
    %121 = arith.divf %119, %120 : vector<8x192xf32>
    %122 = vector.extract_strided_slice %121 {offsets = [0, 0], sizes = [8, 64], strides = [1, 1]} : vector<8x192xf32> to vector<8x64xf32>
    %123 = vector.extract_strided_slice %121 {offsets = [0, 64], sizes = [8, 64], strides = [1, 1]} : vector<8x192xf32> to vector<8x64xf32>
    %124 = vector.extract_strided_slice %121 {offsets = [0, 128], sizes = [8, 64], strides = [1, 1]} : vector<8x192xf32> to vector<8x64xf32>
    %125 = vector.extract_strided_slice %115 {offsets = [0, 192], sizes = [8, 64], strides = [1, 1]} : vector<8x256xf32> to vector<8x64xf32>
    %126 = math.tanh %125 : vector<8x64xf32>
    %127 = arith.mulf %123, %66 : vector<8x64xf32>
    %128 = arith.mulf %122, %126 : vector<8x64xf32>
    %129 = arith.addf %127, %128 : vector<8x64xf32>
    %130 = math.tanh %129 : vector<8x64xf32>
    %131 = arith.mulf %124, %130 : vector<8x64xf32>
    %cst_33 = arith.constant dense<0.000000e+00> : vector<8x256xf32>
    %132 = tpu.matmul %112, %9, %cst_33 {dimension_numbers = #tpu.dot_dimension_numbers<[1], [0], [0], [1], [0, 0, 1, 1], [], []>} : vector<8x64xf32>, vector<64x256xf32>, vector<8x256xf32> -> vector<8x256xf32>
    %133 = vector.broadcast %12 : vector<1x256xf32> to vector<8x256xf32>
    %134 = arith.addf %132, %133 : vector<8x256xf32>
    %cst_34 = arith.constant dense<0.000000e+00> : vector<8x256xf32>
    %135 = tpu.matmul %87, %10, %cst_34 {dimension_numbers = #tpu.dot_dimension_numbers<[1], [0], [0], [1], [0, 0, 1, 1], [], []>} : vector<8x64xf32>, vector<64x256xf32>, vector<8x256xf32> -> vector<8x256xf32>
    %136 = arith.addf %134, %135 : vector<8x256xf32>
    %137 = vector.extract_strided_slice %136 {offsets = [0, 0], sizes = [8, 192], strides = [1, 1]} : vector<8x256xf32> to vector<8x192xf32>
    %138 = arith.negf %137 : vector<8x192xf32>
    %139 = math.exp %138 : vector<8x192xf32>
    %cst_35 = arith.constant 1.000000e+00 : f32
    %140 = vector.broadcast %cst_35 : f32 to vector<8x192xf32>
    %141 = arith.addf %140, %139 : vector<8x192xf32>
    %142 = arith.divf %140, %141 : vector<8x192xf32>
    %143 = vector.extract_strided_slice %142 {offsets = [0, 0], sizes = [8, 64], strides = [1, 1]} : vector<8x192xf32> to vector<8x64xf32>
    %144 = vector.extract_strided_slice %142 {offsets = [0, 64], sizes = [8, 64], strides = [1, 1]} : vector<8x192xf32> to vector<8x64xf32>
    %145 = vector.extract_strided_slice %142 {offsets = [0, 128], sizes = [8, 64], strides = [1, 1]} : vector<8x192xf32> to vector<8x64xf32>
    %146 = vector.extract_strided_slice %136 {offsets = [0, 192], sizes = [8, 64], strides = [1, 1]} : vector<8x256xf32> to vector<8x64xf32>
    %147 = math.tanh %146 : vector<8x64xf32>
    %148 = arith.mulf %144, %85 : vector<8x64xf32>
    %149 = arith.mulf %143, %147 : vector<8x64xf32>
    %150 = arith.addf %148, %149 : vector<8x64xf32>
    %151 = math.tanh %150 : vector<8x64xf32>
    %152 = arith.mulf %145, %151 : vector<8x64xf32>
    %c1 = arith.constant 1 : index
    %153 = memref.load %arg11[%c1] : memref<8xf32, #tpu.memory_space<smem>>
    %154 = vector.broadcast %153 : f32 to vector<8x64xf32>
    %155 = arith.mulf %154, %152 : vector<8x64xf32>
    %156 = arith.addf %91, %155 : vector<8x64xf32>
    %cst_36 = arith.constant dense<0.000000e+00> : vector<8x256xf32>
    %157 = tpu.matmul %131, %7, %cst_36 {dimension_numbers = #tpu.dot_dimension_numbers<[1], [0], [0], [1], [0, 0, 1, 1], [], []>} : vector<8x64xf32>, vector<64x256xf32>, vector<8x256xf32> -> vector<8x256xf32>
    %158 = vector.broadcast %11 : vector<1x256xf32> to vector<8x256xf32>
    %159 = arith.addf %157, %158 : vector<8x256xf32>
    %cst_37 = arith.constant dense<0.000000e+00> : vector<8x256xf32>
    %160 = tpu.matmul %112, %8, %cst_37 {dimension_numbers = #tpu.dot_dimension_numbers<[1], [0], [0], [1], [0, 0, 1, 1], [], []>} : vector<8x64xf32>, vector<64x256xf32>, vector<8x256xf32> -> vector<8x256xf32>
    %161 = arith.addf %159, %160 : vector<8x256xf32>
    %162 = vector.extract_strided_slice %161 {offsets = [0, 0], sizes = [8, 192], strides = [1, 1]} : vector<8x256xf32> to vector<8x192xf32>
    %163 = arith.negf %162 : vector<8x192xf32>
    %164 = math.exp %163 : vector<8x192xf32>
    %cst_38 = arith.constant 1.000000e+00 : f32
    %165 = vector.broadcast %cst_38 : f32 to vector<8x192xf32>
    %166 = arith.addf %165, %164 : vector<8x192xf32>
    %167 = arith.divf %165, %166 : vector<8x192xf32>
    %168 = vector.extract_strided_slice %167 {offsets = [0, 0], sizes = [8, 64], strides = [1, 1]} : vector<8x192xf32> to vector<8x64xf32>
    %169 = vector.extract_strided_slice %167 {offsets = [0, 64], sizes = [8, 64], strides = [1, 1]} : vector<8x192xf32> to vector<8x64xf32>
    %170 = vector.extract_strided_slice %167 {offsets = [0, 128], sizes = [8, 64], strides = [1, 1]} : vector<8x192xf32> to vector<8x64xf32>
    %171 = vector.extract_strided_slice %161 {offsets = [0, 192], sizes = [8, 64], strides = [1, 1]} : vector<8x256xf32> to vector<8x64xf32>
    %172 = math.tanh %171 : vector<8x64xf32>
    %173 = arith.mulf %169, %110 : vector<8x64xf32>
    %174 = arith.mulf %168, %172 : vector<8x64xf32>
    %175 = arith.addf %173, %174 : vector<8x64xf32>
    %176 = math.tanh %175 : vector<8x64xf32>
    %177 = arith.mulf %170, %176 : vector<8x64xf32>
    %178 = vector.extract_strided_slice %5 {offsets = [24, 0], sizes = [8, 256], strides = [1, 1]} : vector<64x256xf32> to vector<8x256xf32>
    %cst_39 = arith.constant dense<0.000000e+00> : vector<8x256xf32>
    %179 = tpu.matmul %131, %6, %cst_39 {dimension_numbers = #tpu.dot_dimension_numbers<[1], [0], [0], [1], [0, 0, 1, 1], [], []>} : vector<8x64xf32>, vector<64x256xf32>, vector<8x256xf32> -> vector<8x256xf32>
    %180 = arith.addf %178, %179 : vector<8x256xf32>
    %181 = vector.extract_strided_slice %180 {offsets = [0, 0], sizes = [8, 192], strides = [1, 1]} : vector<8x256xf32> to vector<8x192xf32>
    %182 = arith.negf %181 : vector<8x192xf32>
    %183 = math.exp %182 : vector<8x192xf32>
    %cst_40 = arith.constant 1.000000e+00 : f32
    %184 = vector.broadcast %cst_40 : f32 to vector<8x192xf32>
    %185 = arith.addf %184, %183 : vector<8x192xf32>
    %186 = arith.divf %184, %185 : vector<8x192xf32>
    %187 = vector.extract_strided_slice %186 {offsets = [0, 0], sizes = [8, 64], strides = [1, 1]} : vector<8x192xf32> to vector<8x64xf32>
    %188 = vector.extract_strided_slice %186 {offsets = [0, 64], sizes = [8, 64], strides = [1, 1]} : vector<8x192xf32> to vector<8x64xf32>
    %189 = vector.extract_strided_slice %186 {offsets = [0, 128], sizes = [8, 64], strides = [1, 1]} : vector<8x192xf32> to vector<8x64xf32>
    %190 = vector.extract_strided_slice %180 {offsets = [0, 192], sizes = [8, 64], strides = [1, 1]} : vector<8x256xf32> to vector<8x64xf32>
    %191 = math.tanh %190 : vector<8x64xf32>
    %192 = arith.mulf %188, %129 : vector<8x64xf32>
    %193 = arith.mulf %187, %191 : vector<8x64xf32>
    %194 = arith.addf %192, %193 : vector<8x64xf32>
    %195 = math.tanh %194 : vector<8x64xf32>
    %196 = arith.mulf %189, %195 : vector<8x64xf32>
    %cst_41 = arith.constant dense<0.000000e+00> : vector<8x256xf32>
    %197 = tpu.matmul %177, %9, %cst_41 {dimension_numbers = #tpu.dot_dimension_numbers<[1], [0], [0], [1], [0, 0, 1, 1], [], []>} : vector<8x64xf32>, vector<64x256xf32>, vector<8x256xf32> -> vector<8x256xf32>
    %198 = vector.broadcast %12 : vector<1x256xf32> to vector<8x256xf32>
    %199 = arith.addf %197, %198 : vector<8x256xf32>
    %cst_42 = arith.constant dense<0.000000e+00> : vector<8x256xf32>
    %200 = tpu.matmul %152, %10, %cst_42 {dimension_numbers = #tpu.dot_dimension_numbers<[1], [0], [0], [1], [0, 0, 1, 1], [], []>} : vector<8x64xf32>, vector<64x256xf32>, vector<8x256xf32> -> vector<8x256xf32>
    %201 = arith.addf %199, %200 : vector<8x256xf32>
    %202 = vector.extract_strided_slice %201 {offsets = [0, 0], sizes = [8, 192], strides = [1, 1]} : vector<8x256xf32> to vector<8x192xf32>
    %203 = arith.negf %202 : vector<8x192xf32>
    %204 = math.exp %203 : vector<8x192xf32>
    %cst_43 = arith.constant 1.000000e+00 : f32
    %205 = vector.broadcast %cst_43 : f32 to vector<8x192xf32>
    %206 = arith.addf %205, %204 : vector<8x192xf32>
    %207 = arith.divf %205, %206 : vector<8x192xf32>
    %208 = vector.extract_strided_slice %207 {offsets = [0, 0], sizes = [8, 64], strides = [1, 1]} : vector<8x192xf32> to vector<8x64xf32>
    %209 = vector.extract_strided_slice %207 {offsets = [0, 64], sizes = [8, 64], strides = [1, 1]} : vector<8x192xf32> to vector<8x64xf32>
    %210 = vector.extract_strided_slice %207 {offsets = [0, 128], sizes = [8, 64], strides = [1, 1]} : vector<8x192xf32> to vector<8x64xf32>
    %211 = vector.extract_strided_slice %201 {offsets = [0, 192], sizes = [8, 64], strides = [1, 1]} : vector<8x256xf32> to vector<8x64xf32>
    %212 = math.tanh %211 : vector<8x64xf32>
    %213 = arith.mulf %209, %150 : vector<8x64xf32>
    %214 = arith.mulf %208, %212 : vector<8x64xf32>
    %215 = arith.addf %213, %214 : vector<8x64xf32>
    %216 = math.tanh %215 : vector<8x64xf32>
    %217 = arith.mulf %210, %216 : vector<8x64xf32>
    %c2 = arith.constant 2 : index
    %218 = memref.load %arg11[%c2] : memref<8xf32, #tpu.memory_space<smem>>
    %219 = vector.broadcast %218 : f32 to vector<8x64xf32>
    %220 = arith.mulf %219, %217 : vector<8x64xf32>
    %221 = arith.addf %156, %220 : vector<8x64xf32>
    %cst_44 = arith.constant dense<0.000000e+00> : vector<8x256xf32>
    %222 = tpu.matmul %196, %7, %cst_44 {dimension_numbers = #tpu.dot_dimension_numbers<[1], [0], [0], [1], [0, 0, 1, 1], [], []>} : vector<8x64xf32>, vector<64x256xf32>, vector<8x256xf32> -> vector<8x256xf32>
    %223 = vector.broadcast %11 : vector<1x256xf32> to vector<8x256xf32>
    %224 = arith.addf %222, %223 : vector<8x256xf32>
    %cst_45 = arith.constant dense<0.000000e+00> : vector<8x256xf32>
    %225 = tpu.matmul %177, %8, %cst_45 {dimension_numbers = #tpu.dot_dimension_numbers<[1], [0], [0], [1], [0, 0, 1, 1], [], []>} : vector<8x64xf32>, vector<64x256xf32>, vector<8x256xf32> -> vector<8x256xf32>
    %226 = arith.addf %224, %225 : vector<8x256xf32>
    %227 = vector.extract_strided_slice %226 {offsets = [0, 0], sizes = [8, 192], strides = [1, 1]} : vector<8x256xf32> to vector<8x192xf32>
    %228 = arith.negf %227 : vector<8x192xf32>
    %229 = math.exp %228 : vector<8x192xf32>
    %cst_46 = arith.constant 1.000000e+00 : f32
    %230 = vector.broadcast %cst_46 : f32 to vector<8x192xf32>
    %231 = arith.addf %230, %229 : vector<8x192xf32>
    %232 = arith.divf %230, %231 : vector<8x192xf32>
    %233 = vector.extract_strided_slice %232 {offsets = [0, 0], sizes = [8, 64], strides = [1, 1]} : vector<8x192xf32> to vector<8x64xf32>
    %234 = vector.extract_strided_slice %232 {offsets = [0, 64], sizes = [8, 64], strides = [1, 1]} : vector<8x192xf32> to vector<8x64xf32>
    %235 = vector.extract_strided_slice %232 {offsets = [0, 128], sizes = [8, 64], strides = [1, 1]} : vector<8x192xf32> to vector<8x64xf32>
    %236 = vector.extract_strided_slice %226 {offsets = [0, 192], sizes = [8, 64], strides = [1, 1]} : vector<8x256xf32> to vector<8x64xf32>
    %237 = math.tanh %236 : vector<8x64xf32>
    %238 = arith.mulf %234, %175 : vector<8x64xf32>
    %239 = arith.mulf %233, %237 : vector<8x64xf32>
    %240 = arith.addf %238, %239 : vector<8x64xf32>
    %241 = math.tanh %240 : vector<8x64xf32>
    %242 = arith.mulf %235, %241 : vector<8x64xf32>
    %243 = vector.extract_strided_slice %5 {offsets = [32, 0], sizes = [8, 256], strides = [1, 1]} : vector<64x256xf32> to vector<8x256xf32>
    %cst_47 = arith.constant dense<0.000000e+00> : vector<8x256xf32>
    %244 = tpu.matmul %196, %6, %cst_47 {dimension_numbers = #tpu.dot_dimension_numbers<[1], [0], [0], [1], [0, 0, 1, 1], [], []>} : vector<8x64xf32>, vector<64x256xf32>, vector<8x256xf32> -> vector<8x256xf32>
    %245 = arith.addf %243, %244 : vector<8x256xf32>
    %246 = vector.extract_strided_slice %245 {offsets = [0, 0], sizes = [8, 192], strides = [1, 1]} : vector<8x256xf32> to vector<8x192xf32>
    %247 = arith.negf %246 : vector<8x192xf32>
    %248 = math.exp %247 : vector<8x192xf32>
    %cst_48 = arith.constant 1.000000e+00 : f32
    %249 = vector.broadcast %cst_48 : f32 to vector<8x192xf32>
    %250 = arith.addf %249, %248 : vector<8x192xf32>
    %251 = arith.divf %249, %250 : vector<8x192xf32>
    %252 = vector.extract_strided_slice %251 {offsets = [0, 0], sizes = [8, 64], strides = [1, 1]} : vector<8x192xf32> to vector<8x64xf32>
    %253 = vector.extract_strided_slice %251 {offsets = [0, 64], sizes = [8, 64], strides = [1, 1]} : vector<8x192xf32> to vector<8x64xf32>
    %254 = vector.extract_strided_slice %251 {offsets = [0, 128], sizes = [8, 64], strides = [1, 1]} : vector<8x192xf32> to vector<8x64xf32>
    %255 = vector.extract_strided_slice %245 {offsets = [0, 192], sizes = [8, 64], strides = [1, 1]} : vector<8x256xf32> to vector<8x64xf32>
    %256 = math.tanh %255 : vector<8x64xf32>
    %257 = arith.mulf %253, %194 : vector<8x64xf32>
    %258 = arith.mulf %252, %256 : vector<8x64xf32>
    %259 = arith.addf %257, %258 : vector<8x64xf32>
    %260 = math.tanh %259 : vector<8x64xf32>
    %261 = arith.mulf %254, %260 : vector<8x64xf32>
    %cst_49 = arith.constant dense<0.000000e+00> : vector<8x256xf32>
    %262 = tpu.matmul %242, %9, %cst_49 {dimension_numbers = #tpu.dot_dimension_numbers<[1], [0], [0], [1], [0, 0, 1, 1], [], []>} : vector<8x64xf32>, vector<64x256xf32>, vector<8x256xf32> -> vector<8x256xf32>
    %263 = vector.broadcast %12 : vector<1x256xf32> to vector<8x256xf32>
    %264 = arith.addf %262, %263 : vector<8x256xf32>
    %cst_50 = arith.constant dense<0.000000e+00> : vector<8x256xf32>
    %265 = tpu.matmul %217, %10, %cst_50 {dimension_numbers = #tpu.dot_dimension_numbers<[1], [0], [0], [1], [0, 0, 1, 1], [], []>} : vector<8x64xf32>, vector<64x256xf32>, vector<8x256xf32> -> vector<8x256xf32>
    %266 = arith.addf %264, %265 : vector<8x256xf32>
    %267 = vector.extract_strided_slice %266 {offsets = [0, 0], sizes = [8, 192], strides = [1, 1]} : vector<8x256xf32> to vector<8x192xf32>
    %268 = arith.negf %267 : vector<8x192xf32>
    %269 = math.exp %268 : vector<8x192xf32>
    %cst_51 = arith.constant 1.000000e+00 : f32
    %270 = vector.broadcast %cst_51 : f32 to vector<8x192xf32>
    %271 = arith.addf %270, %269 : vector<8x192xf32>
    %272 = arith.divf %270, %271 : vector<8x192xf32>
    %273 = vector.extract_strided_slice %272 {offsets = [0, 0], sizes = [8, 64], strides = [1, 1]} : vector<8x192xf32> to vector<8x64xf32>
    %274 = vector.extract_strided_slice %272 {offsets = [0, 64], sizes = [8, 64], strides = [1, 1]} : vector<8x192xf32> to vector<8x64xf32>
    %275 = vector.extract_strided_slice %272 {offsets = [0, 128], sizes = [8, 64], strides = [1, 1]} : vector<8x192xf32> to vector<8x64xf32>
    %276 = vector.extract_strided_slice %266 {offsets = [0, 192], sizes = [8, 64], strides = [1, 1]} : vector<8x256xf32> to vector<8x64xf32>
    %277 = math.tanh %276 : vector<8x64xf32>
    %278 = arith.mulf %274, %215 : vector<8x64xf32>
    %279 = arith.mulf %273, %277 : vector<8x64xf32>
    %280 = arith.addf %278, %279 : vector<8x64xf32>
    %281 = math.tanh %280 : vector<8x64xf32>
    %282 = arith.mulf %275, %281 : vector<8x64xf32>
    %c3 = arith.constant 3 : index
    %283 = memref.load %arg11[%c3] : memref<8xf32, #tpu.memory_space<smem>>
    %284 = vector.broadcast %283 : f32 to vector<8x64xf32>
    %285 = arith.mulf %284, %282 : vector<8x64xf32>
    %286 = arith.addf %221, %285 : vector<8x64xf32>
    %cst_52 = arith.constant dense<0.000000e+00> : vector<8x256xf32>
    %287 = tpu.matmul %261, %7, %cst_52 {dimension_numbers = #tpu.dot_dimension_numbers<[1], [0], [0], [1], [0, 0, 1, 1], [], []>} : vector<8x64xf32>, vector<64x256xf32>, vector<8x256xf32> -> vector<8x256xf32>
    %288 = vector.broadcast %11 : vector<1x256xf32> to vector<8x256xf32>
    %289 = arith.addf %287, %288 : vector<8x256xf32>
    %cst_53 = arith.constant dense<0.000000e+00> : vector<8x256xf32>
    %290 = tpu.matmul %242, %8, %cst_53 {dimension_numbers = #tpu.dot_dimension_numbers<[1], [0], [0], [1], [0, 0, 1, 1], [], []>} : vector<8x64xf32>, vector<64x256xf32>, vector<8x256xf32> -> vector<8x256xf32>
    %291 = arith.addf %289, %290 : vector<8x256xf32>
    %292 = vector.extract_strided_slice %291 {offsets = [0, 0], sizes = [8, 192], strides = [1, 1]} : vector<8x256xf32> to vector<8x192xf32>
    %293 = arith.negf %292 : vector<8x192xf32>
    %294 = math.exp %293 : vector<8x192xf32>
    %cst_54 = arith.constant 1.000000e+00 : f32
    %295 = vector.broadcast %cst_54 : f32 to vector<8x192xf32>
    %296 = arith.addf %295, %294 : vector<8x192xf32>
    %297 = arith.divf %295, %296 : vector<8x192xf32>
    %298 = vector.extract_strided_slice %297 {offsets = [0, 0], sizes = [8, 64], strides = [1, 1]} : vector<8x192xf32> to vector<8x64xf32>
    %299 = vector.extract_strided_slice %297 {offsets = [0, 64], sizes = [8, 64], strides = [1, 1]} : vector<8x192xf32> to vector<8x64xf32>
    %300 = vector.extract_strided_slice %297 {offsets = [0, 128], sizes = [8, 64], strides = [1, 1]} : vector<8x192xf32> to vector<8x64xf32>
    %301 = vector.extract_strided_slice %291 {offsets = [0, 192], sizes = [8, 64], strides = [1, 1]} : vector<8x256xf32> to vector<8x64xf32>
    %302 = math.tanh %301 : vector<8x64xf32>
    %303 = arith.mulf %299, %240 : vector<8x64xf32>
    %304 = arith.mulf %298, %302 : vector<8x64xf32>
    %305 = arith.addf %303, %304 : vector<8x64xf32>
    %306 = math.tanh %305 : vector<8x64xf32>
    %307 = arith.mulf %300, %306 : vector<8x64xf32>
    %308 = vector.extract_strided_slice %5 {offsets = [40, 0], sizes = [8, 256], strides = [1, 1]} : vector<64x256xf32> to vector<8x256xf32>
    %cst_55 = arith.constant dense<0.000000e+00> : vector<8x256xf32>
    %309 = tpu.matmul %261, %6, %cst_55 {dimension_numbers = #tpu.dot_dimension_numbers<[1], [0], [0], [1], [0, 0, 1, 1], [], []>} : vector<8x64xf32>, vector<64x256xf32>, vector<8x256xf32> -> vector<8x256xf32>
    %310 = arith.addf %308, %309 : vector<8x256xf32>
    %311 = vector.extract_strided_slice %310 {offsets = [0, 0], sizes = [8, 192], strides = [1, 1]} : vector<8x256xf32> to vector<8x192xf32>
    %312 = arith.negf %311 : vector<8x192xf32>
    %313 = math.exp %312 : vector<8x192xf32>
    %cst_56 = arith.constant 1.000000e+00 : f32
    %314 = vector.broadcast %cst_56 : f32 to vector<8x192xf32>
    %315 = arith.addf %314, %313 : vector<8x192xf32>
    %316 = arith.divf %314, %315 : vector<8x192xf32>
    %317 = vector.extract_strided_slice %316 {offsets = [0, 0], sizes = [8, 64], strides = [1, 1]} : vector<8x192xf32> to vector<8x64xf32>
    %318 = vector.extract_strided_slice %316 {offsets = [0, 64], sizes = [8, 64], strides = [1, 1]} : vector<8x192xf32> to vector<8x64xf32>
    %319 = vector.extract_strided_slice %316 {offsets = [0, 128], sizes = [8, 64], strides = [1, 1]} : vector<8x192xf32> to vector<8x64xf32>
    %320 = vector.extract_strided_slice %310 {offsets = [0, 192], sizes = [8, 64], strides = [1, 1]} : vector<8x256xf32> to vector<8x64xf32>
    %321 = math.tanh %320 : vector<8x64xf32>
    %322 = arith.mulf %318, %259 : vector<8x64xf32>
    %323 = arith.mulf %317, %321 : vector<8x64xf32>
    %324 = arith.addf %322, %323 : vector<8x64xf32>
    %325 = math.tanh %324 : vector<8x64xf32>
    %326 = arith.mulf %319, %325 : vector<8x64xf32>
    %cst_57 = arith.constant dense<0.000000e+00> : vector<8x256xf32>
    %327 = tpu.matmul %307, %9, %cst_57 {dimension_numbers = #tpu.dot_dimension_numbers<[1], [0], [0], [1], [0, 0, 1, 1], [], []>} : vector<8x64xf32>, vector<64x256xf32>, vector<8x256xf32> -> vector<8x256xf32>
    %328 = vector.broadcast %12 : vector<1x256xf32> to vector<8x256xf32>
    %329 = arith.addf %327, %328 : vector<8x256xf32>
    %cst_58 = arith.constant dense<0.000000e+00> : vector<8x256xf32>
    %330 = tpu.matmul %282, %10, %cst_58 {dimension_numbers = #tpu.dot_dimension_numbers<[1], [0], [0], [1], [0, 0, 1, 1], [], []>} : vector<8x64xf32>, vector<64x256xf32>, vector<8x256xf32> -> vector<8x256xf32>
    %331 = arith.addf %329, %330 : vector<8x256xf32>
    %332 = vector.extract_strided_slice %331 {offsets = [0, 0], sizes = [8, 192], strides = [1, 1]} : vector<8x256xf32> to vector<8x192xf32>
    %333 = arith.negf %332 : vector<8x192xf32>
    %334 = math.exp %333 : vector<8x192xf32>
    %cst_59 = arith.constant 1.000000e+00 : f32
    %335 = vector.broadcast %cst_59 : f32 to vector<8x192xf32>
    %336 = arith.addf %335, %334 : vector<8x192xf32>
    %337 = arith.divf %335, %336 : vector<8x192xf32>
    %338 = vector.extract_strided_slice %337 {offsets = [0, 0], sizes = [8, 64], strides = [1, 1]} : vector<8x192xf32> to vector<8x64xf32>
    %339 = vector.extract_strided_slice %337 {offsets = [0, 64], sizes = [8, 64], strides = [1, 1]} : vector<8x192xf32> to vector<8x64xf32>
    %340 = vector.extract_strided_slice %337 {offsets = [0, 128], sizes = [8, 64], strides = [1, 1]} : vector<8x192xf32> to vector<8x64xf32>
    %341 = vector.extract_strided_slice %331 {offsets = [0, 192], sizes = [8, 64], strides = [1, 1]} : vector<8x256xf32> to vector<8x64xf32>
    %342 = math.tanh %341 : vector<8x64xf32>
    %343 = arith.mulf %339, %280 : vector<8x64xf32>
    %344 = arith.mulf %338, %342 : vector<8x64xf32>
    %345 = arith.addf %343, %344 : vector<8x64xf32>
    %346 = math.tanh %345 : vector<8x64xf32>
    %347 = arith.mulf %340, %346 : vector<8x64xf32>
    %c4 = arith.constant 4 : index
    %348 = memref.load %arg11[%c4] : memref<8xf32, #tpu.memory_space<smem>>
    %349 = vector.broadcast %348 : f32 to vector<8x64xf32>
    %350 = arith.mulf %349, %347 : vector<8x64xf32>
    %351 = arith.addf %286, %350 : vector<8x64xf32>
    %cst_60 = arith.constant dense<0.000000e+00> : vector<8x256xf32>
    %352 = tpu.matmul %326, %7, %cst_60 {dimension_numbers = #tpu.dot_dimension_numbers<[1], [0], [0], [1], [0, 0, 1, 1], [], []>} : vector<8x64xf32>, vector<64x256xf32>, vector<8x256xf32> -> vector<8x256xf32>
    %353 = vector.broadcast %11 : vector<1x256xf32> to vector<8x256xf32>
    %354 = arith.addf %352, %353 : vector<8x256xf32>
    %cst_61 = arith.constant dense<0.000000e+00> : vector<8x256xf32>
    %355 = tpu.matmul %307, %8, %cst_61 {dimension_numbers = #tpu.dot_dimension_numbers<[1], [0], [0], [1], [0, 0, 1, 1], [], []>} : vector<8x64xf32>, vector<64x256xf32>, vector<8x256xf32> -> vector<8x256xf32>
    %356 = arith.addf %354, %355 : vector<8x256xf32>
    %357 = vector.extract_strided_slice %356 {offsets = [0, 0], sizes = [8, 192], strides = [1, 1]} : vector<8x256xf32> to vector<8x192xf32>
    %358 = arith.negf %357 : vector<8x192xf32>
    %359 = math.exp %358 : vector<8x192xf32>
    %cst_62 = arith.constant 1.000000e+00 : f32
    %360 = vector.broadcast %cst_62 : f32 to vector<8x192xf32>
    %361 = arith.addf %360, %359 : vector<8x192xf32>
    %362 = arith.divf %360, %361 : vector<8x192xf32>
    %363 = vector.extract_strided_slice %362 {offsets = [0, 0], sizes = [8, 64], strides = [1, 1]} : vector<8x192xf32> to vector<8x64xf32>
    %364 = vector.extract_strided_slice %362 {offsets = [0, 64], sizes = [8, 64], strides = [1, 1]} : vector<8x192xf32> to vector<8x64xf32>
    %365 = vector.extract_strided_slice %362 {offsets = [0, 128], sizes = [8, 64], strides = [1, 1]} : vector<8x192xf32> to vector<8x64xf32>
    %366 = vector.extract_strided_slice %356 {offsets = [0, 192], sizes = [8, 64], strides = [1, 1]} : vector<8x256xf32> to vector<8x64xf32>
    %367 = math.tanh %366 : vector<8x64xf32>
    %368 = arith.mulf %364, %305 : vector<8x64xf32>
    %369 = arith.mulf %363, %367 : vector<8x64xf32>
    %370 = arith.addf %368, %369 : vector<8x64xf32>
    %371 = math.tanh %370 : vector<8x64xf32>
    %372 = arith.mulf %365, %371 : vector<8x64xf32>
    %373 = vector.extract_strided_slice %5 {offsets = [48, 0], sizes = [8, 256], strides = [1, 1]} : vector<64x256xf32> to vector<8x256xf32>
    %cst_63 = arith.constant dense<0.000000e+00> : vector<8x256xf32>
    %374 = tpu.matmul %326, %6, %cst_63 {dimension_numbers = #tpu.dot_dimension_numbers<[1], [0], [0], [1], [0, 0, 1, 1], [], []>} : vector<8x64xf32>, vector<64x256xf32>, vector<8x256xf32> -> vector<8x256xf32>
    %375 = arith.addf %373, %374 : vector<8x256xf32>
    %376 = vector.extract_strided_slice %375 {offsets = [0, 0], sizes = [8, 192], strides = [1, 1]} : vector<8x256xf32> to vector<8x192xf32>
    %377 = arith.negf %376 : vector<8x192xf32>
    %378 = math.exp %377 : vector<8x192xf32>
    %cst_64 = arith.constant 1.000000e+00 : f32
    %379 = vector.broadcast %cst_64 : f32 to vector<8x192xf32>
    %380 = arith.addf %379, %378 : vector<8x192xf32>
    %381 = arith.divf %379, %380 : vector<8x192xf32>
    %382 = vector.extract_strided_slice %381 {offsets = [0, 0], sizes = [8, 64], strides = [1, 1]} : vector<8x192xf32> to vector<8x64xf32>
    %383 = vector.extract_strided_slice %381 {offsets = [0, 64], sizes = [8, 64], strides = [1, 1]} : vector<8x192xf32> to vector<8x64xf32>
    %384 = vector.extract_strided_slice %381 {offsets = [0, 128], sizes = [8, 64], strides = [1, 1]} : vector<8x192xf32> to vector<8x64xf32>
    %385 = vector.extract_strided_slice %375 {offsets = [0, 192], sizes = [8, 64], strides = [1, 1]} : vector<8x256xf32> to vector<8x64xf32>
    %386 = math.tanh %385 : vector<8x64xf32>
    %387 = arith.mulf %383, %324 : vector<8x64xf32>
    %388 = arith.mulf %382, %386 : vector<8x64xf32>
    %389 = arith.addf %387, %388 : vector<8x64xf32>
    %390 = math.tanh %389 : vector<8x64xf32>
    %391 = arith.mulf %384, %390 : vector<8x64xf32>
    %cst_65 = arith.constant dense<0.000000e+00> : vector<8x256xf32>
    %392 = tpu.matmul %372, %9, %cst_65 {dimension_numbers = #tpu.dot_dimension_numbers<[1], [0], [0], [1], [0, 0, 1, 1], [], []>} : vector<8x64xf32>, vector<64x256xf32>, vector<8x256xf32> -> vector<8x256xf32>
    %393 = vector.broadcast %12 : vector<1x256xf32> to vector<8x256xf32>
    %394 = arith.addf %392, %393 : vector<8x256xf32>
    %cst_66 = arith.constant dense<0.000000e+00> : vector<8x256xf32>
    %395 = tpu.matmul %347, %10, %cst_66 {dimension_numbers = #tpu.dot_dimension_numbers<[1], [0], [0], [1], [0, 0, 1, 1], [], []>} : vector<8x64xf32>, vector<64x256xf32>, vector<8x256xf32> -> vector<8x256xf32>
    %396 = arith.addf %394, %395 : vector<8x256xf32>
    %397 = vector.extract_strided_slice %396 {offsets = [0, 0], sizes = [8, 192], strides = [1, 1]} : vector<8x256xf32> to vector<8x192xf32>
    %398 = arith.negf %397 : vector<8x192xf32>
    %399 = math.exp %398 : vector<8x192xf32>
    %cst_67 = arith.constant 1.000000e+00 : f32
    %400 = vector.broadcast %cst_67 : f32 to vector<8x192xf32>
    %401 = arith.addf %400, %399 : vector<8x192xf32>
    %402 = arith.divf %400, %401 : vector<8x192xf32>
    %403 = vector.extract_strided_slice %402 {offsets = [0, 0], sizes = [8, 64], strides = [1, 1]} : vector<8x192xf32> to vector<8x64xf32>
    %404 = vector.extract_strided_slice %402 {offsets = [0, 64], sizes = [8, 64], strides = [1, 1]} : vector<8x192xf32> to vector<8x64xf32>
    %405 = vector.extract_strided_slice %402 {offsets = [0, 128], sizes = [8, 64], strides = [1, 1]} : vector<8x192xf32> to vector<8x64xf32>
    %406 = vector.extract_strided_slice %396 {offsets = [0, 192], sizes = [8, 64], strides = [1, 1]} : vector<8x256xf32> to vector<8x64xf32>
    %407 = math.tanh %406 : vector<8x64xf32>
    %408 = arith.mulf %404, %345 : vector<8x64xf32>
    %409 = arith.mulf %403, %407 : vector<8x64xf32>
    %410 = arith.addf %408, %409 : vector<8x64xf32>
    %411 = math.tanh %410 : vector<8x64xf32>
    %412 = arith.mulf %405, %411 : vector<8x64xf32>
    %c5 = arith.constant 5 : index
    %413 = memref.load %arg11[%c5] : memref<8xf32, #tpu.memory_space<smem>>
    %414 = vector.broadcast %413 : f32 to vector<8x64xf32>
    %415 = arith.mulf %414, %412 : vector<8x64xf32>
    %416 = arith.addf %351, %415 : vector<8x64xf32>
    %cst_68 = arith.constant dense<0.000000e+00> : vector<8x256xf32>
    %417 = tpu.matmul %391, %7, %cst_68 {dimension_numbers = #tpu.dot_dimension_numbers<[1], [0], [0], [1], [0, 0, 1, 1], [], []>} : vector<8x64xf32>, vector<64x256xf32>, vector<8x256xf32> -> vector<8x256xf32>
    %418 = vector.broadcast %11 : vector<1x256xf32> to vector<8x256xf32>
    %419 = arith.addf %417, %418 : vector<8x256xf32>
    %cst_69 = arith.constant dense<0.000000e+00> : vector<8x256xf32>
    %420 = tpu.matmul %372, %8, %cst_69 {dimension_numbers = #tpu.dot_dimension_numbers<[1], [0], [0], [1], [0, 0, 1, 1], [], []>} : vector<8x64xf32>, vector<64x256xf32>, vector<8x256xf32> -> vector<8x256xf32>
    %421 = arith.addf %419, %420 : vector<8x256xf32>
    %422 = vector.extract_strided_slice %421 {offsets = [0, 0], sizes = [8, 192], strides = [1, 1]} : vector<8x256xf32> to vector<8x192xf32>
    %423 = arith.negf %422 : vector<8x192xf32>
    %424 = math.exp %423 : vector<8x192xf32>
    %cst_70 = arith.constant 1.000000e+00 : f32
    %425 = vector.broadcast %cst_70 : f32 to vector<8x192xf32>
    %426 = arith.addf %425, %424 : vector<8x192xf32>
    %427 = arith.divf %425, %426 : vector<8x192xf32>
    %428 = vector.extract_strided_slice %427 {offsets = [0, 0], sizes = [8, 64], strides = [1, 1]} : vector<8x192xf32> to vector<8x64xf32>
    %429 = vector.extract_strided_slice %427 {offsets = [0, 64], sizes = [8, 64], strides = [1, 1]} : vector<8x192xf32> to vector<8x64xf32>
    %430 = vector.extract_strided_slice %427 {offsets = [0, 128], sizes = [8, 64], strides = [1, 1]} : vector<8x192xf32> to vector<8x64xf32>
    %431 = vector.extract_strided_slice %421 {offsets = [0, 192], sizes = [8, 64], strides = [1, 1]} : vector<8x256xf32> to vector<8x64xf32>
    %432 = math.tanh %431 : vector<8x64xf32>
    %433 = arith.mulf %429, %370 : vector<8x64xf32>
    %434 = arith.mulf %428, %432 : vector<8x64xf32>
    %435 = arith.addf %433, %434 : vector<8x64xf32>
    %436 = math.tanh %435 : vector<8x64xf32>
    %437 = arith.mulf %430, %436 : vector<8x64xf32>
    %438 = vector.extract_strided_slice %5 {offsets = [56, 0], sizes = [8, 256], strides = [1, 1]} : vector<64x256xf32> to vector<8x256xf32>
    %cst_71 = arith.constant dense<0.000000e+00> : vector<8x256xf32>
    %439 = tpu.matmul %391, %6, %cst_71 {dimension_numbers = #tpu.dot_dimension_numbers<[1], [0], [0], [1], [0, 0, 1, 1], [], []>} : vector<8x64xf32>, vector<64x256xf32>, vector<8x256xf32> -> vector<8x256xf32>
    %440 = arith.addf %438, %439 : vector<8x256xf32>
    %441 = vector.extract_strided_slice %440 {offsets = [0, 0], sizes = [8, 192], strides = [1, 1]} : vector<8x256xf32> to vector<8x192xf32>
    %442 = arith.negf %441 : vector<8x192xf32>
    %443 = math.exp %442 : vector<8x192xf32>
    %cst_72 = arith.constant 1.000000e+00 : f32
    %444 = vector.broadcast %cst_72 : f32 to vector<8x192xf32>
    %445 = arith.addf %444, %443 : vector<8x192xf32>
    %446 = arith.divf %444, %445 : vector<8x192xf32>
    %447 = vector.extract_strided_slice %446 {offsets = [0, 0], sizes = [8, 64], strides = [1, 1]} : vector<8x192xf32> to vector<8x64xf32>
    %448 = vector.extract_strided_slice %446 {offsets = [0, 64], sizes = [8, 64], strides = [1, 1]} : vector<8x192xf32> to vector<8x64xf32>
    %449 = vector.extract_strided_slice %446 {offsets = [0, 128], sizes = [8, 64], strides = [1, 1]} : vector<8x192xf32> to vector<8x64xf32>
    %450 = vector.extract_strided_slice %440 {offsets = [0, 192], sizes = [8, 64], strides = [1, 1]} : vector<8x256xf32> to vector<8x64xf32>
    %451 = math.tanh %450 : vector<8x64xf32>
    %452 = arith.mulf %448, %389 : vector<8x64xf32>
    %453 = arith.mulf %447, %451 : vector<8x64xf32>
    %454 = arith.addf %452, %453 : vector<8x64xf32>
    %455 = math.tanh %454 : vector<8x64xf32>
    %456 = arith.mulf %449, %455 : vector<8x64xf32>
    %cst_73 = arith.constant dense<0.000000e+00> : vector<8x256xf32>
    %457 = tpu.matmul %437, %9, %cst_73 {dimension_numbers = #tpu.dot_dimension_numbers<[1], [0], [0], [1], [0, 0, 1, 1], [], []>} : vector<8x64xf32>, vector<64x256xf32>, vector<8x256xf32> -> vector<8x256xf32>
    %458 = vector.broadcast %12 : vector<1x256xf32> to vector<8x256xf32>
    %459 = arith.addf %457, %458 : vector<8x256xf32>
    %cst_74 = arith.constant dense<0.000000e+00> : vector<8x256xf32>
    %460 = tpu.matmul %412, %10, %cst_74 {dimension_numbers = #tpu.dot_dimension_numbers<[1], [0], [0], [1], [0, 0, 1, 1], [], []>} : vector<8x64xf32>, vector<64x256xf32>, vector<8x256xf32> -> vector<8x256xf32>
    %461 = arith.addf %459, %460 : vector<8x256xf32>
    %462 = vector.extract_strided_slice %461 {offsets = [0, 0], sizes = [8, 192], strides = [1, 1]} : vector<8x256xf32> to vector<8x192xf32>
    %463 = arith.negf %462 : vector<8x192xf32>
    %464 = math.exp %463 : vector<8x192xf32>
    %cst_75 = arith.constant 1.000000e+00 : f32
    %465 = vector.broadcast %cst_75 : f32 to vector<8x192xf32>
    %466 = arith.addf %465, %464 : vector<8x192xf32>
    %467 = arith.divf %465, %466 : vector<8x192xf32>
    %468 = vector.extract_strided_slice %467 {offsets = [0, 0], sizes = [8, 64], strides = [1, 1]} : vector<8x192xf32> to vector<8x64xf32>
    %469 = vector.extract_strided_slice %467 {offsets = [0, 64], sizes = [8, 64], strides = [1, 1]} : vector<8x192xf32> to vector<8x64xf32>
    %470 = vector.extract_strided_slice %467 {offsets = [0, 128], sizes = [8, 64], strides = [1, 1]} : vector<8x192xf32> to vector<8x64xf32>
    %471 = vector.extract_strided_slice %461 {offsets = [0, 192], sizes = [8, 64], strides = [1, 1]} : vector<8x256xf32> to vector<8x64xf32>
    %472 = math.tanh %471 : vector<8x64xf32>
    %473 = arith.mulf %469, %410 : vector<8x64xf32>
    %474 = arith.mulf %468, %472 : vector<8x64xf32>
    %475 = arith.addf %473, %474 : vector<8x64xf32>
    %476 = math.tanh %475 : vector<8x64xf32>
    %477 = arith.mulf %470, %476 : vector<8x64xf32>
    %c6 = arith.constant 6 : index
    %478 = memref.load %arg11[%c6] : memref<8xf32, #tpu.memory_space<smem>>
    %479 = vector.broadcast %478 : f32 to vector<8x64xf32>
    %480 = arith.mulf %479, %477 : vector<8x64xf32>
    %481 = arith.addf %416, %480 : vector<8x64xf32>
    %cst_76 = arith.constant dense<0.000000e+00> : vector<8x256xf32>
    %482 = tpu.matmul %456, %7, %cst_76 {dimension_numbers = #tpu.dot_dimension_numbers<[1], [0], [0], [1], [0, 0, 1, 1], [], []>} : vector<8x64xf32>, vector<64x256xf32>, vector<8x256xf32> -> vector<8x256xf32>
    %483 = vector.broadcast %11 : vector<1x256xf32> to vector<8x256xf32>
    %484 = arith.addf %482, %483 : vector<8x256xf32>
    %cst_77 = arith.constant dense<0.000000e+00> : vector<8x256xf32>
    %485 = tpu.matmul %437, %8, %cst_77 {dimension_numbers = #tpu.dot_dimension_numbers<[1], [0], [0], [1], [0, 0, 1, 1], [], []>} : vector<8x64xf32>, vector<64x256xf32>, vector<8x256xf32> -> vector<8x256xf32>
    %486 = arith.addf %484, %485 : vector<8x256xf32>
    %487 = vector.extract_strided_slice %486 {offsets = [0, 0], sizes = [8, 192], strides = [1, 1]} : vector<8x256xf32> to vector<8x192xf32>
    %488 = arith.negf %487 : vector<8x192xf32>
    %489 = math.exp %488 : vector<8x192xf32>
    %cst_78 = arith.constant 1.000000e+00 : f32
    %490 = vector.broadcast %cst_78 : f32 to vector<8x192xf32>
    %491 = arith.addf %490, %489 : vector<8x192xf32>
    %492 = arith.divf %490, %491 : vector<8x192xf32>
    %493 = vector.extract_strided_slice %492 {offsets = [0, 0], sizes = [8, 64], strides = [1, 1]} : vector<8x192xf32> to vector<8x64xf32>
    %494 = vector.extract_strided_slice %492 {offsets = [0, 64], sizes = [8, 64], strides = [1, 1]} : vector<8x192xf32> to vector<8x64xf32>
    %495 = vector.extract_strided_slice %492 {offsets = [0, 128], sizes = [8, 64], strides = [1, 1]} : vector<8x192xf32> to vector<8x64xf32>
    %496 = vector.extract_strided_slice %486 {offsets = [0, 192], sizes = [8, 64], strides = [1, 1]} : vector<8x256xf32> to vector<8x64xf32>
    %497 = math.tanh %496 : vector<8x64xf32>
    %498 = arith.mulf %494, %435 : vector<8x64xf32>
    %499 = arith.mulf %493, %497 : vector<8x64xf32>
    %500 = arith.addf %498, %499 : vector<8x64xf32>
    %501 = math.tanh %500 : vector<8x64xf32>
    %502 = arith.mulf %495, %501 : vector<8x64xf32>
    %cst_79 = arith.constant dense<0.000000e+00> : vector<8x256xf32>
    %503 = tpu.matmul %502, %9, %cst_79 {dimension_numbers = #tpu.dot_dimension_numbers<[1], [0], [0], [1], [0, 0, 1, 1], [], []>} : vector<8x64xf32>, vector<64x256xf32>, vector<8x256xf32> -> vector<8x256xf32>
    %504 = vector.broadcast %12 : vector<1x256xf32> to vector<8x256xf32>
    %505 = arith.addf %503, %504 : vector<8x256xf32>
    %cst_80 = arith.constant dense<0.000000e+00> : vector<8x256xf32>
    %506 = tpu.matmul %477, %10, %cst_80 {dimension_numbers = #tpu.dot_dimension_numbers<[1], [0], [0], [1], [0, 0, 1, 1], [], []>} : vector<8x64xf32>, vector<64x256xf32>, vector<8x256xf32> -> vector<8x256xf32>
    %507 = arith.addf %505, %506 : vector<8x256xf32>
    %508 = vector.extract_strided_slice %507 {offsets = [0, 0], sizes = [8, 192], strides = [1, 1]} : vector<8x256xf32> to vector<8x192xf32>
    %509 = arith.negf %508 : vector<8x192xf32>
    %510 = math.exp %509 : vector<8x192xf32>
    %cst_81 = arith.constant 1.000000e+00 : f32
    %511 = vector.broadcast %cst_81 : f32 to vector<8x192xf32>
    %512 = arith.addf %511, %510 : vector<8x192xf32>
    %513 = arith.divf %511, %512 : vector<8x192xf32>
    %514 = vector.extract_strided_slice %513 {offsets = [0, 0], sizes = [8, 64], strides = [1, 1]} : vector<8x192xf32> to vector<8x64xf32>
    %515 = vector.extract_strided_slice %513 {offsets = [0, 64], sizes = [8, 64], strides = [1, 1]} : vector<8x192xf32> to vector<8x64xf32>
    %516 = vector.extract_strided_slice %513 {offsets = [0, 128], sizes = [8, 64], strides = [1, 1]} : vector<8x192xf32> to vector<8x64xf32>
    %517 = vector.extract_strided_slice %507 {offsets = [0, 192], sizes = [8, 64], strides = [1, 1]} : vector<8x256xf32> to vector<8x64xf32>
    %518 = math.tanh %517 : vector<8x64xf32>
    %519 = arith.mulf %515, %475 : vector<8x64xf32>
    %520 = arith.mulf %514, %518 : vector<8x64xf32>
    %521 = arith.addf %519, %520 : vector<8x64xf32>
    %522 = math.tanh %521 : vector<8x64xf32>
    %523 = arith.mulf %516, %522 : vector<8x64xf32>
    %c7 = arith.constant 7 : index
    %524 = memref.load %arg11[%c7] : memref<8xf32, #tpu.memory_space<smem>>
    %525 = vector.broadcast %524 : f32 to vector<8x64xf32>
    %526 = arith.mulf %525, %523 : vector<8x64xf32>
    %527 = arith.addf %481, %526 : vector<8x64xf32>
    %c0_82 = arith.constant 0 : index
    %c0_83 = arith.constant 0 : index
    %528 = vector.load %arg10[%c0_82, %c0_83] : memref<1x64xf32, #tpu.memory_space<vmem>>, vector<1x64xf32>
    %529 = vector.broadcast %528 : vector<1x64xf32> to vector<8x64xf32>
    %530 = arith.mulf %527, %529 : vector<8x64xf32>
    %cst_84 = arith.constant dense<0.000000e+00> : vector<8xf32>
    %531 = vector.multi_reduction <add>, %530, %cst_84 [1] : vector<8x64xf32> to vector<8xf32>
    %532 = vector.shape_cast %531 : vector<8xf32> to vector<8x1xf32>
    %c0_85 = arith.constant 0 : index
    %533 = memref.load %arg12[%c0_85] : memref<1xf32, #tpu.memory_space<smem>>
    %534 = vector.broadcast %533 : f32 to vector<8x1xf32>
    %535 = arith.addf %532, %534 : vector<8x1xf32>
    %536 = arith.negf %535 : vector<8x1xf32>
    %537 = math.exp %536 : vector<8x1xf32>
    %cst_86 = arith.constant 1.000000e+00 : f32
    %538 = vector.broadcast %cst_86 : f32 to vector<8x1xf32>
    %539 = arith.addf %538, %537 : vector<8x1xf32>
    %540 = arith.divf %538, %539 : vector<8x1xf32>
    %c0_87 = arith.constant 0 : index
    %c0_88 = arith.constant 0 : index
    %541 = vector.load %arg13[%c0_87, %c0_88] : memref<8x1xf32, #tpu.memory_space<vmem>>, vector<8x1xf32>
    tpu.vector_store %arg13[%c0_87, %c0_88], %540 {strides = array<i32>} : memref<8x1xf32, #tpu.memory_space<vmem>>, vector<8x1xf32>,
    return
  }
}

</mosaic_0001>

<bundles_post_ra>
// kernel: weight_lstm_forward.1
= control target key start
LH: loop header
LB: loop body
LE: loop exit
PB: predicated region body
PF: predicated region fallthrough
CT: control target
= control target key end

     0   :  { %19 = vsyncpa [#allocation4], 0  ;;  %s6093_s0 = inlined_call_operand.vmem [shape: f32[64,16], index: 0, kind: input, shape index: {}]   ;;  %s6094_s1 = inlined_call_operand.vmem [shape: f32[16,256], index: 1, kind: input, shape index: {}]   ;;  %s6095_s2 = inlined_call_operand.vmem [shape: f32[64,256], index: 2, kind: input, shape index: {}]   ;;  %s6096_s3 = inlined_call_operand.vmem [shape: f32[1,256], index: 3, kind: input, shape index: {}]   ;;  %s6097_s4 = inlined_call_operand.hbm [shape: f32[64,256], index: 4, kind: input, shape index: {}]   ;;  %s6098_s5 = inlined_call_operand.hbm [shape: f32[64,256], index: 5, kind: input, shape index: {}]   ;;  %s6099_s6 = inlined_call_operand.vmem [shape: f32[1,256], index: 6, kind: input, shape index: {}]   ;;  %s6100_s7 = inlined_call_operand.hbm [shape: f32[64,256], index: 7, kind: input, shape index: {}]   ;;  %s6101_s8 = inlined_call_operand.hbm [shape: f32[64,256], index: 8, kind: input, shape index: {}]   ;;  %s6102_s9 = inlined_call_operand.vmem [shape: f32[1,256], index: 9, kind: input, shape index: {}]   ;;  %s6103_s10 = inlined_call_operand.vmem [shape: f32[1,64], index: 10, kind: input, shape index: {}]   ;;  %s6104_s11 = inlined_call_operand.vmem [shape: f32[8], index: 11, kind: input, shape index: {}]   ;;  %s6105_s12 = inlined_call_operand.<no memory space> [shape: f32[1], index: 12, kind: input, shape index: {}]   ;;  %s6106_s13 = inlined_call_operand.vmem [shape: f32[8,1], index: 13, kind: output, shape index: {}]  }
   0x1   :  { %20 = vsyncpa [#allocation7], 0 }
   0x2   :  { %21 = vsyncpa [#allocation10], 0 }
   0x3   :  { %22 = vsyncpa [#allocation5], 0  ;;  %s5091_s25 = smov [#allocation6]   ;;  %s5092_s27 = smov [#allocation3]  }
   0x4   :  { %s48_s26 = sshll.u32 %s5091_s25, 4  ;;  %s36_s28 = sshll.u32 %s5092_s27, 4  ;;  %s49_s26 = int_to_ptr.vmem [resolvable:$true] %s48_s26  ;;  %s5170_s28 = int_to_ptr.vmem [resolvable:$true] %s36_s28 }
   0x5   :  { %s4983_s14 = scalar_lea.hbm %s6098_s5, 2048 }
   0x6   :  { %p4984_p0 = scmp.ne.s32.totalorder %s6098_s5, %s4983_s14  ;;  %p4987_p1 = scmp.lt.u32.totalorder %s4983_s14, %s6098_s5 }
   0x8   :  { %p4989_p2 = pnand %p4987_p1, %p4984_p0 }
   0xa   :  { %4992 = shalt.err (!%p4989_p2)
}
   0xb   :  { %s4993_s19 = scalar_lea.vmem %s49_s26, 2048  ;;  %p4998_p4 = scmp.lt.s32.totalorder %s49_s26, %s49_s26 }
   0xc   :  { %p4994_p3 = scmp.ne.s32.totalorder %s49_s26, %s4993_s19  ;;  %p4999_p5 = scmp.lt.s32.totalorder %s4993_s19, %s4993_s19 }
   0xe   :  { %p5000_p6 = por %p4999_p5, %p4998_p4 }
  0x10   :  { %p5001_p7 = pnand %p5000_p6, %p4994_p3 }
  0x12   :  { %5004 = shalt.err (!%p5001_p7)
}
  0x13   :  { %s5093_s20 = smov 256   ;;  %s5094_s21 = smov 16  }
  0x14   :  { %54 = dma.hbm_to_vmem [thread:$0]  %s6098_s5, 2048, %s49_s26, [#allocation7], %s5093_s20, %s5093_s20, %s5094_s21  }
  0x15   :  { %s5005_s27 = scalar_lea.hbm %s6097_s4, 2048 }
  0x16   :  { %p5006_p8 = scmp.ne.s32.totalorder %s6097_s4, %s5005_s27  ;;  %p5009_p9 = scmp.lt.u32.totalorder %s5005_s27, %s6097_s4 }
  0x18   :  { %p5011_p10 = pnand %p5009_p9, %p5006_p8 }
  0x1a   :  { %5014 = shalt.err (!%p5011_p10)
}
  0x1b   :  { %s5015_s16 = scalar_lea.vmem %s5170_s28, 2048  ;;  %p5020_p12 = scmp.lt.s32.totalorder %s5170_s28, %s5170_s28 }
  0x1c   :  { %p5016_p11 = scmp.ne.s32.totalorder %s5170_s28, %s5015_s16  ;;  %p5021_p13 = scmp.lt.s32.totalorder %s5015_s16, %s5015_s16 }
  0x1e   :  { %p5022_p0 = por %p5021_p13, %p5020_p12 }
  0x20   :  { %p5023_p1 = pnand %p5022_p0, %p5016_p11 }
  0x22   :  { %5026 = shalt.err (!%p5023_p1)
}
  0x23   :  { %42 = dma.hbm_to_vmem [thread:$0]  %s6097_s4, 2048, %s5170_s28, [#allocation4], %s5093_s20, %s5093_s20, %s5094_s21  }
  0x24   :  { %s5095_s17 = smov [#allocation8]   ;;  %s5096_s19 = smov [#allocation9]  }
  0x25   :  { %s62_s18 = sshll.u32 %s5095_s17, 4  ;;  %s74_s22 = sshll.u32 %s5096_s19, 4  ;;  %s63_s18 = int_to_ptr.vmem [resolvable:$true] %s62_s18  ;;  %s5207_s22 = int_to_ptr.vmem [resolvable:$true] %s74_s22 }
  0x26   :  { %s5027_s25 = scalar_lea.hbm %s6100_s7, 2048 }
  0x27   :  { %p5028_p2 = scmp.ne.s32.totalorder %s6100_s7, %s5027_s25  ;;  %p5031_p3 = scmp.lt.u32.totalorder %s5027_s25, %s6100_s7 }
  0x29   :  { %p5033_p4 = pnand %p5031_p3, %p5028_p2 }
  0x2b   :  { %5036 = shalt.err (!%p5033_p4)
}
  0x2c   :  { %s5037_s4 = scalar_lea.vmem %s63_s18, 2048  ;;  %p5042_p6 = scmp.lt.s32.totalorder %s63_s18, %s63_s18 }
  0x2d   :  { %p5038_p5 = scmp.ne.s32.totalorder %s63_s18, %s5037_s4  ;;  %p5043_p7 = scmp.lt.s32.totalorder %s5037_s4, %s5037_s4 }
  0x2f   :  { %p5044_p8 = por %p5043_p7, %p5042_p6 }
  0x31   :  { %p5045_p9 = pnand %p5044_p8, %p5038_p5 }
  0x33   :  { %5048 = shalt.err (!%p5045_p9)
}
  0x34   :  { %68 = dma.hbm_to_vmem [thread:$0]  %s6100_s7, 2048, %s63_s18, [#allocation7], %s5093_s20, %s5093_s20, %s5094_s21  }
  0x35   :  { %s5049_s26 = scalar_lea.hbm %s6101_s8, 2048 }
  0x36   :  { %p5050_p10 = scmp.ne.s32.totalorder %s6101_s8, %s5049_s26  ;;  %p5053_p11 = scmp.lt.u32.totalorder %s5049_s26, %s6101_s8 }
  0x38   :  { %p5055_p12 = pnand %p5053_p11, %p5050_p10 }
  0x3a   :  { %5058 = shalt.err (!%p5055_p12)
}
  0x3b   :  { %s5059_s25 = scalar_lea.vmem %s5207_s22, 2048  ;;  %p5064_p0 = scmp.lt.s32.totalorder %s5207_s22, %s5207_s22 }
  0x3c   :  { %p5060_p13 = scmp.ne.s32.totalorder %s5207_s22, %s5059_s25  ;;  %p5065_p1 = scmp.lt.s32.totalorder %s5059_s25, %s5059_s25 }
  0x3e   :  { %p5066_p2 = por %p5065_p1, %p5064_p0 }
  0x40   :  { %p5067_p3 = pnand %p5066_p2, %p5060_p13 }
  0x42   :  { %5070 = shalt.err (!%p5067_p3)
}
  0x43   :  { %80 = dma.hbm_to_vmem [thread:$0]  %s6101_s8, 2048, %s5207_s22, [#allocation10], %s5093_s20, %s5093_s20, %s5094_s21  }
  0x44   :  { %s91_s30 = sshll.u32 %s6104_s11, 4  ;;  %s92_s30 = int_to_ptr.vmem [resolvable:$true] %s91_s30 }
  0x45   :  { %s5071_s14 = scalar_lea.vmem %s92_s30, 16  ;;  %p5076_p5 = scmp.lt.s32.totalorder %s92_s30, %s92_s30 }
  0x46   :  { %p5072_p4 = scmp.ne.s32.totalorder %s92_s30, %s5071_s14  ;;  %p5077_p6 = scmp.lt.s32.totalorder %s5071_s14, %s5071_s14 }
  0x48   :  { %p5078_p7 = por %p5077_p6, %p5076_p5 }
  0x4a   :  { %p5079_p8 = pnand %p5078_p7, %p5072_p4 }
  0x4c   :  { %5082 = shalt.err (!%p5079_p8)
}
  0x4d   :  { %s5097_s4 = smov [#allocation11]  }
  0x4e   :  { %94 = dma.vmem_to_smem %s92_s30, 16, %s5097_s4, [#allocation5]  }
  0x4f   :  { %5083 = dma.done.wait [#allocation4], 2048  }
  0x50   :  { %5084 = vsyncadd [#allocation4], 4294965248 }
  0x51   :  { %5085 = dma.done.wait [#allocation7], 4096  }
  0x52   :  { %5086 = vsyncadd [#allocation7], 4294963200 }
  0x53   :  { %5087 = dma.done.wait [#allocation10], 2048  }
  0x54   :  { %5088 = vsyncadd [#allocation10], 4294965248 }
  0x55   :  { %5089 = dma.done.wait [#allocation5], 16  }
  0x56   :  { %5090 = vsyncadd [#allocation5], 4294967280 }
  0x57   :  { %112 = sfence }
  0x58   :  { %v122_v0 = vld [vmem:[%s6094_s1 + $0x8] sm:$0xff]  ;;  %v124_v1 = vld [vmem:[%s6094_s1 + $0x18] sm:$0xff]  ;;  %v121_v2 = vld [vmem:[%s6094_s1] sm:$0xff]  ;;  %v6107_v5 = vmov 0.0   ;;  %vm137_vm0 = vcmask 130048   ;;  %v127_v8 = vlaneseq  ;;  %s5099_s19 = smov 64  }
  0x59   :  { %v4002_v3 = vpack.c.bf16 %v124_v1, %v122_v0  ;;  %v123_v4 = vld [vmem:[%s6094_s1 + $0x10] sm:$0xff]  ;;  %226 = vmatprep.mubr.f32.mxu0 %v6107_v5  ;;  %684 = vmatprep.mubr.f32.mxu1 %v6107_v5  ;;  %v113_v7 = vld [vmem:[%s6093_s0] sm:$0xff]  ;;  %v292_v26 = vld [vmem:[#allocation3 + $0x8] sm:$0xff]  ;;  %vm398_vm1 = vcmask 523264   ;;  %s3942_s23 = sld [smem:[#allocation11 + $0x2]]  ;;  %s3954_s24 = sld [smem:[#allocation11 + $0x3]] }
  0x5a   :  { %v4004_v6 = vpack.c.bf16 %v123_v4, %v121_v2  ;;  %v128_v9 = vshrl.u32 %v127_v8, 7  ;;  %v125_v11 = vld [vmem:[%s6096_s3] sm:$0x3]  ;;  %v294_v27 = vld [vmem:[#allocation3 + $0x18] sm:$0xff]  ;;  %v293_v30 = vld [vmem:[#allocation3 + $0x10] sm:$0xff]  ;;  %s3930_s3 = sld [smem:[#allocation11 + $0x1]] }
  0x5b   :  { %4003 = vmatprep.subr.bf16.mxu0 %v4002_v3  ;;  %v291_v28 = vld [vmem:[#allocation3] sm:$0xff]  ;;  %v5286_v29 = vpack.c.bf16 %v294_v27, %v292_v26  ;;  %v114_v31 = vld [vmem:[%s6093_s0 + $0x8] sm:$0xff]  ;;  %v298_v34 = vld [vmem:[#allocation3 + $0x38] sm:$0xff]  ;;  %s3966_s25 = sld [smem:[#allocation11 + $0x4]]  ;;  %s3978_s7 = sld [smem:[#allocation11 + $0x5]]  ;;  %vm3890_vm2 = vcmask 7168  }
  0x5c   :  { %4005 = vmatpush1.bf16.msra.mxu0 %v4004_v6  ;;  %v5266_v10 = vsub.s32 1, %v128_v9  ;;  %v5279_v17 = vsub.s32 0, %v128_v9  ;;  %v296_v32 = vld [vmem:[#allocation3 + $0x28] sm:$0xff]  ;;  %v5291_v33 = vpack.c.bf16 %v293_v30, %v291_v28  ;;  %v295_v35 = vld [vmem:[#allocation3 + $0x20] sm:$0xff]  ;;  %v115_v37 = vld [vmem:[%s6093_s0 + $0x10] sm:$0xff]  ;;  %s3990_s18 = sld [smem:[#allocation11 + $0x6]] }
  0x5d   :  { %4007 = vmatprep.subr.bf16.mxu0 %v5286_v29  ;;  %v5296_v36 = vpack.c.bf16 %v298_v34, %v296_v32  ;;  %v297_v38 = vld [vmem:[#allocation3 + $0x30] sm:$0xff]  ;;  %v300_v39 = vld [vmem:[#allocation3 + $0x48] sm:$0xff]  ;;  %v302_v41 = vld [vmem:[#allocation3 + $0x58] sm:$0xff]  ;;  %s3999_s27 = sld [smem:[#allocation11 + $0x7]] }
  0x5e   :  { %v5272_v12 = vrot.slane %v125_v11, %v5266_v10  ;;  %v5282_v18 = vrot.slane %v125_v11, %v5279_v17  ;;  %v5302_v40 = vpack.c.bf16 %v297_v38, %v295_v35  ;;  %v5305_v42 = vpack.c.bf16 %v302_v41, %v300_v39  ;;  %v299_v43 = vld [vmem:[#allocation3 + $0x40] sm:$0xff]  ;;  %v301_v44 = vld [vmem:[#allocation3 + $0x50] sm:$0xff]  ;;  %v304_v45 = vld [vmem:[#allocation3 + $0x68] sm:$0xff] }
  0x5f   :  { %3900 = vmatmul.mubr.msk.f32.vlgmr.msra.gmra.mrb[0].mxu0 %vm137_vm0, %v113_v7  ;;  %6137 = vst [vmem:[#allocation17_spill] sm:$0xff] %v5296_v36  ;;  %v306_v46 = vld [vmem:[#allocation3 + $0x78] sm:$0xff]  ;;  %v5313_v48 = vpack.c.bf16 %v301_v44, %v299_v43  ;;  %v303_v50 = vld [vmem:[#allocation3 + $0x60] sm:$0xff]  ;;  %v305_v51 = vld [vmem:[#allocation3 + $0x70] sm:$0xff] }
  0x60   :  { %232 = vmatprep.mubr.f32.mxu0 %v6107_v5  ;;  %6136 = vst [vmem:[#allocation16_spill] sm:$0xff] %v5272_v12  ;;  %4009 = vmatpush1.bf16.msra.mxu0 %v5291_v33  ;;  %6138 = vst [vmem:[#allocation18_spill] sm:$0xff] %v5302_v40  ;;  %v116_v47 = vld [vmem:[%s6093_s0 + $0x18] sm:$0xff]  ;;  %v5316_v49 = vpack.c.bf16 %v306_v46, %v304_v45  ;;  %v117_v52 = vld [vmem:[%s6093_s0 + $0x20] sm:$0xff]  ;;  %v5324_v53 = vpack.c.bf16 %v305_v51, %v303_v50 }
  0x61   :  { %4011 = vmatprep.subr.bf16.mxu0 %v5296_v36  ;;  %6139 = vst [vmem:[#allocation19_spill] sm:$0xff] %v5305_v42  ;;  %6140 = vst [vmem:[#allocation20_spill] sm:$0xff] %v5313_v48  ;;  %v118_v54 = vld [vmem:[%s6093_s0 + $0x28] sm:$0xff]  ;;  %v119_v55 = vld [vmem:[%s6093_s0 + $0x30] sm:$0xff] }
  0x62   :  { %6141 = vst [vmem:[#allocation21_spill] sm:$0xff] %v5316_v49  ;;  %6142 = vst [vmem:[#allocation22_spill] sm:$0xff] %v5324_v53  ;;  %v120_v56 = vld [vmem:[%s6093_s0 + $0x38] sm:$0xff]  ;;  %v276_v58 = vld [vmem:[%s6095_s2 + $0x8] sm:$0xff] }
  0x63   :  { %3901 = vmatmul.mubr.msk.f32.gmra.mrb[2].mxu0 %vm137_vm0, %v114_v31  ;;  %v278_v59 = vld [vmem:[%s6095_s2 + $0x18] sm:$0xff]  ;;  %v275_v3 = vld [vmem:[%s6095_s2] sm:$0xff]  ;;  %v277_v4 = vld [vmem:[%s6095_s2 + $0x10] sm:$0xff] }
  0x64   :  { %238 = vmatprep.mubr.f32.mxu0 %v6107_v5  ;;  %4013 = vmatpush1.bf16.msra.mxu0 %v5302_v40  ;;  %v5351_v61 = vpack.c.bf16 %v278_v59, %v276_v58  ;;  %v280_v6 = vld [vmem:[%s6095_s2 + $0x28] sm:$0xff]  ;;  %v282_v7 = vld [vmem:[%s6095_s2 + $0x38] sm:$0xff]  ;;  %v5371_v11 = vpack.c.bf16 %v277_v4, %v275_v3  ;;  %v287_v30 = vld [vmem:[%s6095_s2 + $0x60] sm:$0xff] }
  0x65   :  { %4015 = vmatprep.subr.bf16.mxu0 %v5305_v42  ;;  %v290_v26 = vld [vmem:[%s6095_s2 + $0x78] sm:$0xff]  ;;  %v289_v31 = vld [vmem:[%s6095_s2 + $0x70] sm:$0xff]  ;;  %v355_v34 = vld [vmem:[%s6099_s6] sm:$0x3] }
  0x66   :  { %v5420_v32 = vpack.c.bf16 %v289_v31, %v287_v30  ;;  %v5438_v35 = vrot.slane %v355_v34, %v5266_v10  ;;  %v324_v3 = vld [vmem:[#allocation8 + $0x8] sm:$0xff]  ;;  %v326_v4 = vld [vmem:[#allocation8 + $0x18] sm:$0xff]  ;;  %v331_v30 = vld [vmem:[#allocation8 + $0x40] sm:$0xff] }
  0x67   :  { %3902 = vmatmul.mubr.msk.f32.gmra.mrb[4].mxu0 %vm137_vm0, %v115_v37  ;;  %v333_v31 = vld [vmem:[#allocation8 + $0x50] sm:$0xff] }
  0x68   :  { %244 = vmatprep.mubr.f32.mxu0 %v6107_v5  ;;  %4017 = vmatpush1.bf16.msra.mxu0 %v5313_v48  ;;  %6143 = vst [vmem:[#allocation23_spill] sm:$0xff] %v5438_v35 }
  0x69   :  { %4019 = vmatprep.subr.bf16.mxu0 %v5316_v49 }
  0x6b   :  { %3903 = vmatmul.mubr.msk.f32.gmra.mrb[6].mxu0 %vm137_vm0, %v116_v47  ;;  %v5451_v47 = vrot.slane %v355_v34, %v5279_v17  ;;  %v336_v34 = vld [vmem:[#allocation8 + $0x68] sm:$0xff] }
  0x6c   :  { %250 = vmatprep.mubr.f32.mxu0 %v6107_v5  ;;  %4021 = vmatpush1.bf16.msra.mxu0 %v5324_v53 }
  0x6d   :  { %4023 = vmatprep.subr.bf16.mxu0 %v5351_v61 }
  0x6f   :  { %3904 = vmatmul.mubr.msk.f32.gmra.mrb[8].mxu0 %vm137_vm0, %v117_v52 }
  0x70   :  { %256 = vmatprep.mubr.f32.mxu0 %v6107_v5 }
  0x73   :  { %3905 = vmatmul.mubr.msk.f32.gmra.mrb[10].mxu0 %vm137_vm0, %v118_v54 }
  0x74   :  { %262 = vmatprep.mubr.f32.mxu0 %v6107_v5 }
  0x77   :  { %3906 = vmatmul.mubr.msk.f32.gmra.mrb[12].mxu0 %vm137_vm0, %v119_v55 }
  0x78   :  { %268 = vmatprep.mubr.f32.mxu0 %v6107_v5 }
  0x7b   :  { %3907 = vmatmul.mubr.msk.f32.gmra.mrb[14].mxu0 %vm137_vm0, %v120_v56 }
  0x7c   :  { %466 = vmatprep.mubr.f32.mxu0 %v6107_v5 }
 0x132   :  { %v228_v13 = vpop.f32.mrb[0].mxu0 }
 0x133   :  { %v230_v14 = vpop.f32.mrb[1].mxu0  ;;  %v229_v19 = vadd.f32 %v228_v13, %v5282_v18 }
 0x134   :  { %v5275_v15 = vadd.f32 %v230_v14, %v5272_v12  ;;  %v5373_v14 = vpack.c.bf16 %v282_v7, %v280_v6  ;;  %v323_v6 = vld [vmem:[#allocation8] sm:$0xff]  ;;  %v5457_v7 = vpack.c.bf16 %v326_v4, %v324_v3 }
 0x135   :  { %v3908_v20 = vmul.f32 -1.442695, %v229_v19  ;;  %v284_v19 = vld [vmem:[%s6095_s2 + $0x48] sm:$0xff] }
 0x136   :  { %4691 = vtanh.f32 %v5275_v15  ;;  %v3909_v0 = vmul.f32 -1.442695, %v5275_v15  ;;  %v279_v15 = vld [vmem:[%s6095_s2 + $0x20] sm:$0xff]  ;;  %4039 = vmatprep.subr.bf16.mxu1 %v5457_v7 }
 0x137   :  { %4693 = vpow2.f32 %v3908_v20  ;;  %v286_v20 = vld [vmem:[%s6095_s2 + $0x58] sm:$0xff] }
 0x140   :  { %v4692_v16 = vpop.eup %4691 }
 0x141   :  { %372 = vrot.lane.b32.xlu0 %v4692_v16, %s5099_s19  ;;  %v4694_v21 = vpop.eup %4693  ;;  %v281_v16 = vld [vmem:[%s6095_s2 + $0x30] sm:$0xff] }
 0x142   :  { %v363_v22 = vadd.f32 1.0, %v4694_v21  ;;  %v5389_v21 = vpack.c.bf16 %v281_v16, %v279_v15 }
 0x144   :  { %4695 = vrcp.f32 %v363_v22  ;;  %v5393_v22 = vpack.c.bf16 %v286_v20, %v284_v19  ;;  %v327_v19 = vld [vmem:[#allocation8 + $0x20] sm:$0xff]  ;;  %v329_v20 = vld [vmem:[#allocation8 + $0x30] sm:$0xff] }
 0x14e   :  { %v4696_v23 = vpop.eup %4695 }
 0x14f   :  { %v370_v57 = vmul.f32 0.0, %v4696_v23 }
 0x1b3   :  { %v373_v24 = vpop.permute.xlu0 %372 }
 0x1b4   :  { %v375_v25 = vmul.f32 %v4696_v23, %v373_v24  ;;  %v283_v23 = vld [vmem:[%s6095_s2 + $0x40] sm:$0xff]  ;;  %v285_v24 = vld [vmem:[%s6095_s2 + $0x50] sm:$0xff] }
 0x1b5   :  { %v5408_v27 = vpack.c.bf16 %v285_v24, %v283_v23  ;;  %v332_v23 = vld [vmem:[#allocation8 + $0x48] sm:$0xff]  ;;  %v334_v24 = vld [vmem:[#allocation8 + $0x58] sm:$0xff] }
 0x1b6   :  { %377 = vrot.lane.b32.xlu0 %v375_v25, %s5099_s19  ;;  %v288_v25 = vld [vmem:[%s6095_s2 + $0x68] sm:$0xff] }
 0x1b7   :  { %v5411_v28 = vpack.c.bf16 %v290_v26, %v288_v25  ;;  %v5466_v25 = vpack.c.bf16 %v329_v20, %v327_v19  ;;  %v5469_v26 = vpack.c.bf16 %v334_v24, %v332_v23  ;;  %v314_v19 = vld [vmem:[#allocation6 + $0x38] sm:$0xff] }
 0x228   :  { %v378_v60 = vpop.permute.xlu0 %377 }
 0x229   :  { %v5353_v62 = vadd.f32 %v378_v60, %v370_v57 }
 0x22b   :  { %4697 = vtanh.f32 %v5353_v62 }
 0x22c   :  { %4699 = vpow2.f32 %v3909_v0 }
 0x235   :  { %v4698_v63 = vpop.eup %4697 }
 0x236   :  { %383 = vrot.lane.b32.xlu1 %v4698_v63, %s5099_s19  ;;  %v4700_v1 = vpop.eup %4699 }
 0x237   :  { %v364_v2 = vadd.f32 1.0, %v4700_v1 }
 0x239   :  { %4701 = vrcp.f32 %v364_v2 }
 0x243   :  { %v4702_v8 = vpop.eup %4701 }
 0x2a8   :  { %v384_v9 = vpop.permute.xlu1 %383 }
 0x2a9   :  { %v386_v13 = vmul.f32 %v4702_v8, %v384_v9  ;;  %v325_v8 = vld [vmem:[#allocation8 + $0x10] sm:$0xff]  ;;  %v328_v9 = vld [vmem:[#allocation8 + $0x28] sm:$0xff] }
 0x2aa   :  { %v5459_v15 = vpack.c.bf16 %v325_v8, %v323_v6  ;;  %v307_v8 = vld [vmem:[#allocation6] sm:$0xff] }
 0x2ab   :  { %3910 = vmatmul.mubr.msk.f32.vlgmr.msra.gmra.mrb[16].mxu0 %vm398_vm1, %v386_v13 }
 0x2ac   :  { %4025 = vmatpush1.bf16.msra.mxu0 %v5371_v11  ;;  %567 = vmatprep.mubr.f32.mxu0 %v6107_v5 }
 0x2ad   :  { %4027 = vmatprep.subr.bf16.mxu0 %v5373_v14  ;;  %4041 = vmatpush1.bf16.msra.mxu1 %v5459_v15 }
 0x2b0   :  { %4029 = vmatpush1.bf16.msra.mxu0 %v5389_v21 }
 0x2b1   :  { %4031 = vmatprep.subr.bf16.mxu0 %v5393_v22 }
 0x2b4   :  { %4033 = vmatpush1.bf16.msra.mxu0 %v5408_v27 }
 0x2b5   :  { %4035 = vmatprep.subr.bf16.mxu0 %v5411_v28 }
 0x2b8   :  { %4037 = vmatpush1.bf16.msra.mxu0 %v5420_v32 }
 0x2b9   :  { %4087 = vmatprep.subr.bf16.mxu0 %v5351_v61 }
 0x2bb   :  { %3913 = vmatmul.mubr.msk.f32.vlgmr.msra.gmra.mrb[2].mxu0 %vm398_vm1, %v386_v13  ;;  %v330_v13 = vld [vmem:[#allocation8 + $0x38] sm:$0xff] }
 0x2bc   :  { %4089 = vmatpush1.bf16.msra.mxu0 %v5371_v11  ;;  %966 = vmatprep.mubr.f32.mxu0 %v6107_v5  ;;  %v5461_v16 = vpack.c.bf16 %v330_v13, %v328_v9  ;;  %v309_v9 = vld [vmem:[#allocation6 + $0x10] sm:$0xff]  ;;  %v312_v13 = vld [vmem:[#allocation6 + $0x28] sm:$0xff] }
 0x2bd   :  { %4091 = vmatprep.subr.bf16.mxu0 %v5373_v14  ;;  %v5505_v24 = vpack.c.bf16 %v309_v9, %v307_v8 }
 0x2be   :  { %4043 = vmatprep.subr.bf16.mxu1 %v5461_v16 }
 0x2bf   :  { %4045 = vmatpush1.bf16.msra.mxu1 %v5466_v25 }
 0x2c0   :  { %4093 = vmatpush1.bf16.msra.mxu0 %v5389_v21  ;;  %4047 = vmatprep.subr.bf16.mxu1 %v5469_v26 }
 0x2c1   :  { %4095 = vmatprep.subr.bf16.mxu0 %v5393_v22 }
 0x2c4   :  { %4097 = vmatpush1.bf16.msra.mxu0 %v5408_v27 }
 0x2c5   :  { %4099 = vmatprep.subr.bf16.mxu0 %v5411_v28 }
 0x2c8   :  { %4101 = vmatpush1.bf16.msra.mxu0 %v5420_v32 }
 0x2c9   :  { %4103 = vmatprep.subr.bf16.mxu0 %v5457_v7 }
 0x37e   :  { %v468_v37 = vpop.f32.mrb[16].mxu0 }
 0x37f   :  { %v470_v38 = vpop.f32.mrb[17].mxu0  ;;  %v469_v50 = vadd.f32 %v468_v37, %v5451_v47  ;;  %v338_v37 = vld [vmem:[#allocation8 + $0x78] sm:$0xff] }
 0x380   :  { %v5441_v39 = vadd.f32 %v470_v38, %v5438_v35  ;;  %v5472_v38 = vpack.c.bf16 %v333_v31, %v331_v30  ;;  %v5508_v31 = vpack.c.bf16 %v314_v19, %v312_v13 }
 0x381   :  { %v3911_v51 = vmul.f32 -1.442695, %v469_v50 }
 0x382   :  { %4703 = vtanh.f32 %v5441_v39  ;;  %4049 = vmatpush1.bf16.msra.mxu1 %v5472_v38 }
 0x38c   :  { %v4704_v41 = vpop.eup %4703 }
 0x38d   :  { %488 = vrot.lane.b32.xlu1 %v4704_v41, %s5099_s19  ;;  %v5475_v41 = vpack.c.bf16 %v338_v37, %v336_v34  ;;  %v311_v34 = vld [vmem:[#allocation6 + $0x20] sm:$0xff]  ;;  %v313_v37 = vld [vmem:[#allocation6 + $0x30] sm:$0xff] }
 0x38e   :  { %v569_v43 = vpop.f32.mrb[2].mxu0 }
 0x38f   :  { %v571_v44 = vpop.f32.mrb[3].mxu0  ;;  %v4598_v52 = vadd.f32 %v569_v43, %v5282_v18  ;;  %v335_v43 = vld [vmem:[#allocation8 + $0x60] sm:$0xff]  ;;  %4051 = vmatprep.subr.bf16.mxu1 %v5475_v41 }
 0x390   :  { %v5446_v45 = vadd.f32 %v571_v44, %v5272_v12  ;;  %v337_v44 = vld [vmem:[#allocation8 + $0x70] sm:$0xff] }
 0x391   :  { %v3914_v55 = vmul.f32 -1.442695, %v4598_v52 }
 0x392   :  { %4705 = vtanh.f32 %v5446_v45 }
 0x393   :  { %4707 = vpow2.f32 %v3911_v51 }
 0x394   :  { %4709 = vpow2.f32 %v3914_v55 }
 0x39c   :  { %v4706_v46 = vpop.eup %4705 }
 0x39d   :  { %591 = vrot.lane.b32.xlu0 %v4706_v46, %s5099_s19  ;;  %v4708_v54 = vpop.eup %4707  ;;  %v5478_v46 = vpack.c.bf16 %v337_v44, %v335_v43  ;;  %v316_v43 = vld [vmem:[#allocation6 + $0x48] sm:$0xff]  ;;  %v318_v44 = vld [vmem:[#allocation6 + $0x58] sm:$0xff] }
 0x39e   :  { %v479_v56 = vadd.f32 1.0, %v4708_v54  ;;  %v4710_v57 = vpop.eup %4709 }
 0x39f   :  { %v582_v63 = vadd.f32 1.0, %v4710_v57  ;;  %4053 = vmatpush1.bf16.msra.mxu1 %v5478_v46 }
 0x3a0   :  { %4711 = vrcp.f32 %v479_v56  ;;  %4055 = vmatprep.subr.bf16.mxu1 %v5286_v29 }
 0x3a1   :  { %4713 = vrcp.f32 %v582_v63  ;;  %v3915_v63 = vmul.f32 -1.442695, %v5446_v45  ;;  %v310_v45 = vld [vmem:[#allocation6 + $0x18] sm:$0xff] }
 0x3aa   :  { %v4712_v58 = vpop.eup %4711 }
 0x3ab   :  { %v4714_v0 = vpop.eup %4713  ;;  %v486_v50 = vmul.f32 0.0, %v4712_v58 }
 0x3ac   :  { %v589_v55 = vmul.f32 %v4714_v0, %v5353_v62 }
 0x3ff   :  { %v489_v59 = vpop.permute.xlu1 %488 }
 0x400   :  { %v491_v60 = vmul.f32 %v4712_v58, %v489_v59  ;;  %v3912_v58 = vmul.f32 -1.442695, %v5441_v39  ;;  %v308_v39 = vld [vmem:[#allocation6 + $0x8] sm:$0xff] }
 0x401   :  { %v5502_v6 = vpack.c.bf16 %v310_v45, %v308_v39 }
 0x402   :  { %493 = vrot.lane.b32.xlu1 %v491_v60, %s5099_s19 }
 0x403   :  { %6144 = vst [vmem:[#allocation24_spill] sm:$0xff] %v5502_v6 }
 0x40f   :  { %v592_v1 = vpop.permute.xlu0 %591 }
 0x410   :  { %v594_v2 = vmul.f32 %v4714_v0, %v592_v1 }
 0x412   :  { %596 = vrot.lane.b32.xlu0 %v594_v2, %s5099_s19 }
 0x474   :  { %v494_v51 = vpop.permute.xlu1 %493 }
 0x475   :  { %v5483_v52 = vadd.f32 %v494_v51, %v486_v50  ;;  %v5513_v50 = vpack.c.bf16 %v313_v37, %v311_v34  ;;  %v5517_v51 = vpack.c.bf16 %v318_v44, %v316_v43 }
 0x477   :  { %4715 = vtanh.f32 %v5483_v52 }
 0x481   :  { %v4716_v54 = vpop.eup %4715 }
 0x482   :  { %499 = vrot.lane.b32.xlu1 %v4716_v54, %s5099_s19  ;;  %v315_v54 = vld [vmem:[#allocation6 + $0x40] sm:$0xff] }
 0x484   :  { %v597_v56 = vpop.permute.xlu0 %596 }
 0x485   :  { %v5488_v57 = vadd.f32 %v597_v56, %v589_v55  ;;  %v317_v55 = vld [vmem:[#allocation6 + $0x50] sm:$0xff]  ;;  %v320_v56 = vld [vmem:[#allocation6 + $0x68] sm:$0xff] }
 0x487   :  { %4717 = vtanh.f32 %v5488_v57 }
 0x488   :  { %4719 = vpow2.f32 %v3912_v58  ;;  %v5523_v58 = vpack.c.bf16 %v317_v55, %v315_v54 }
 0x489   :  { %4721 = vpow2.f32 %v3915_v63  ;;  %v319_v63 = vld [vmem:[#allocation6 + $0x60] sm:$0xff] }
 0x491   :  { %v4718_v59 = vpop.eup %4717 }
 0x492   :  { %602 = vrot.lane.b32.xlu0 %v4718_v59, %s5099_s19  ;;  %v4720_v60 = vpop.eup %4719  ;;  %v322_v59 = vld [vmem:[#allocation6 + $0x78] sm:$0xff] }
 0x493   :  { %v480_v1 = vadd.f32 1.0, %v4720_v60  ;;  %v4722_v2 = vpop.eup %4721  ;;  %v5526_v60 = vpack.c.bf16 %v322_v59, %v320_v56 }
 0x494   :  { %v583_v4 = vadd.f32 1.0, %v4722_v2 }
 0x495   :  { %4723 = vrcp.f32 %v480_v1  ;;  %v321_v1 = vld [vmem:[#allocation6 + $0x70] sm:$0xff] }
 0x496   :  { %4725 = vrcp.f32 %v583_v4  ;;  %v5531_v2 = vpack.c.bf16 %v321_v1, %v319_v63 }
 0x49f   :  { %v4724_v3 = vpop.eup %4723 }
 0x4a0   :  { %v4726_v20 = vpop.eup %4725 }
 0x4f4   :  { %v500_v62 = vpop.permute.xlu1 %499 }
 0x4f5   :  { %v502_v0 = vmul.f32 %v4724_v3, %v500_v62  ;;  %v356_v3 = vld [vmem:[%s6102_s9] sm:$0x3]  ;;  %s721_s9 = sld [smem:[#allocation11]] }
 0x4f6   :  { %v5553_v62 = vrot.slane %v356_v3, %v5266_v10  ;;  %v5565_v34 = vrot.slane %v356_v3, %v5279_v17 }
 0x4f7   :  { %3916 = vmatmul.mubr.msk.f32.vlgmr.msra.gmra.mrb[0].mxu1 %vm398_vm1, %v502_v0 }
 0x4f8   :  { %4057 = vmatpush1.bf16.msra.mxu1 %v5291_v33  ;;  %792 = vmatprep.mubr.f32.mxu1 %v6107_v5  ;;  %6145 = vst [vmem:[#allocation25_spill] sm:$0xff] %v5553_v62  ;;  %6146 = vst [vmem:[#allocation26_spill] sm:$0xff] %v5565_v34 }
 0x4f9   :  { %4059 = vmatprep.subr.bf16.mxu1 %v5296_v36 }
 0x4fc   :  { %4061 = vmatpush1.bf16.msra.mxu1 %v5302_v40 }
 0x4fd   :  { %4063 = vmatprep.subr.bf16.mxu1 %v5305_v42 }
 0x500   :  { %4065 = vmatpush1.bf16.msra.mxu1 %v5313_v48 }
 0x501   :  { %4067 = vmatprep.subr.bf16.mxu1 %v5316_v49 }
 0x504   :  { %v603_v23 = vpop.permute.xlu0 %602  ;;  %4069 = vmatpush1.bf16.msra.mxu1 %v5324_v53 }
 0x505   :  { %v605_v30 = vmul.f32 %v4726_v20, %v603_v23  ;;  %4071 = vmatprep.subr.bf16.mxu1 %v5502_v6 }
 0x507   :  { %3919 = vmatmul.mubr.msk.f32.vlgmr.msra.gmra.mrb[2].mxu1 %vm398_vm1, %v605_v30  ;;  %3923 = vmatmul.mubr.msk.f32.vlgmr.msra.gmra.mrb[4].mxu0 %vm398_vm1, %v605_v30 }
 0x508   :  { %4073 = vmatpush1.bf16.msra.mxu1 %v5505_v24  ;;  %863 = vmatprep.mubr.f32.mxu1 %v6107_v5 }
 0x509   :  { %4075 = vmatprep.subr.bf16.mxu1 %v5508_v31  ;;  %4105 = vmatpush1.bf16.msra.mxu0 %v5459_v15 }
 0x50a   :  { %4107 = vmatprep.subr.bf16.mxu0 %v5461_v16  ;;  %1072 = vmatprep.mubr.f32.mxu0 %v6107_v5 }
 0x50c   :  { %4077 = vmatpush1.bf16.msra.mxu1 %v5513_v50 }
 0x50d   :  { %4079 = vmatprep.subr.bf16.mxu1 %v5517_v51  ;;  %4109 = vmatpush1.bf16.msra.mxu0 %v5466_v25 }
 0x50e   :  { %4111 = vmatprep.subr.bf16.mxu0 %v5469_v26 }
 0x510   :  { %4081 = vmatpush1.bf16.msra.mxu1 %v5523_v58 }
 0x511   :  { %4083 = vmatprep.subr.bf16.mxu1 %v5526_v60  ;;  %4113 = vmatpush1.bf16.msra.mxu0 %v5472_v38 }
 0x512   :  { %4115 = vmatprep.subr.bf16.mxu0 %v5475_v41 }
 0x514   :  { %4085 = vmatpush1.bf16.msra.mxu1 %v5531_v2 }
 0x515   :  { %4135 = vmatprep.subr.bf16.mxu1 %v5286_v29  ;;  %4117 = vmatpush1.bf16.msra.mxu0 %v5478_v46 }
 0x517   :  { %3920 = vmatmul.mubr.msk.f32.vlgmr.msra.gmra.mrb[2].mxu1 %vm398_vm1, %v502_v0 }
 0x518   :  { %4137 = vmatpush1.bf16.msra.mxu1 %v5291_v33  ;;  %1256 = vmatprep.mubr.f32.mxu1 %v6107_v5 }
 0x519   :  { %4139 = vmatprep.subr.bf16.mxu1 %v5296_v36 }
 0x51c   :  { %4141 = vmatpush1.bf16.msra.mxu1 %v5302_v40 }
 0x51d   :  { %4143 = vmatprep.subr.bf16.mxu1 %v5305_v42 }
 0x520   :  { %4145 = vmatpush1.bf16.msra.mxu1 %v5313_v48 }
 0x521   :  { %4147 = vmatprep.subr.bf16.mxu1 %v5316_v49 }
 0x524   :  { %4149 = vmatpush1.bf16.msra.mxu1 %v5324_v53 }
 0x525   :  { %4151 = vmatprep.subr.bf16.mxu1 %v5502_v6 }
 0x5ca   :  { %v686_v0 = vpop.f32.mrb[0].mxu1 }
 0x5cb   :  { %v688_v4 = vpop.f32.mrb[1].mxu1  ;;  %v687_v37 = vadd.f32 %v686_v0, %v5565_v34 }
 0x5cc   :  { %v5556_v39 = vadd.f32 %v688_v4, %v5553_v62 }
 0x5cd   :  { %v3917_v43 = vmul.f32 -1.442695, %v687_v37 }
 0x5ce   :  { %4727 = vtanh.f32 %v5556_v39 }
 0x5d8   :  { %v4728_v45 = vpop.eup %4727 }
 0x5d9   :  { %706 = vrot.lane.b32.xlu0 %v4728_v45, %s5099_s19 }
 0x5da   :  { %v968_v8 = vpop.f32.mrb[4].mxu0 }
 0x5db   :  { %v970_v9 = vpop.f32.mrb[5].mxu0  ;;  %v4600_v63 = vadd.f32 %v968_v8, %v5282_v18 }
 0x5dc   :  { %v4601_v23 = vadd.f32 %v970_v9, %v5272_v12 }
 0x5dd   :  { %v3924_v45 = vmul.f32 -1.442695, %v4600_v63  ;;  %v340_v63 = vld [vmem:[#allocation9 + $0x8] sm:$0xff] }
 0x5ea   :  { %v865_v13 = vpop.f32.mrb[2].mxu1 }
 0x5eb   :  { %v867_v19 = vpop.f32.mrb[3].mxu1  ;;  %v4612_v55 = vadd.f32 %v865_v13, %v5451_v47 }
 0x5ec   :  { %v4613_v20 = vadd.f32 %v867_v19, %v5438_v35 }
 0x5ed   :  { %v3921_v1 = vmul.f32 -1.442695, %v4612_v55 }
 0x5ee   :  { %4729 = vtanh.f32 %v4613_v20 }
 0x5ef   :  { %4731 = vtanh.f32 %v4601_v23 }
 0x5f0   :  { %4733 = vpow2.f32 %v3917_v43 }
 0x5f8   :  { %v4730_v10 = vpop.eup %4729 }
 0x5f9   :  { %887 = vrot.lane.b32.xlu1 %v4730_v10, %s5099_s19  ;;  %v4732_v30 = vpop.eup %4731 }
 0x5fa   :  { %v4734_v44 = vpop.eup %4733 }
 0x5fb   :  { %v697_v54 = vadd.f32 1.0, %v4734_v44 }
 0x5fd   :  { %990 = vrot.lane.b32.xlu1 %v4732_v30, %s5099_s19  ;;  %4735 = vrcp.f32 %v697_v54 }
 0x5fe   :  { %4737 = vpow2.f32 %v3921_v1  ;;  %v342_v1 = vld [vmem:[#allocation9 + $0x18] sm:$0xff] }
 0x5ff   :  { %4739 = vpow2.f32 %v3924_v45  ;;  %v5578_v45 = vpack.c.bf16 %v342_v1, %v340_v63 }
 0x601   :  { %4119 = vmatprep.subr.bf16.mxu0 %v5578_v45 }
 0x607   :  { %v4736_v56 = vpop.eup %4735 }
 0x608   :  { %v4738_v17 = vpop.eup %4737  ;;  %v704_v43 = vmul.f32 0.0, %v4736_v56 }
 0x609   :  { %v878_v3 = vadd.f32 1.0, %v4738_v17  ;;  %v4740_v0 = vpop.eup %4739 }
 0x60a   :  { %v981_v9 = vadd.f32 1.0, %v4740_v0 }
 0x60b   :  { %4741 = vrcp.f32 %v878_v3 }
 0x60c   :  { %4743 = vrcp.f32 %v981_v9 }
 0x615   :  { %v4742_v19 = vpop.eup %4741 }
 0x616   :  { %v4744_v30 = vpop.eup %4743 }
 0x64b   :  { %v707_v59 = vpop.permute.xlu0 %706 }
 0x64c   :  { %v709_v4 = vmul.f32 %v4736_v56, %v707_v59  ;;  %v885_v59 = vmul.f32 %v4742_v19, %v5483_v52  ;;  %v988_v56 = vmul.f32 %v4744_v30, %v5488_v57 }
 0x64e   :  { %711 = vrot.lane.b32.xlu1 %v709_v4, %s5099_s19 }
 0x66b   :  { %v888_v10 = vpop.permute.xlu1 %887 }
 0x66c   :  { %v890_v13 = vmul.f32 %v4742_v19, %v888_v10  ;;  %v3922_v19 = vmul.f32 -1.442695, %v4613_v20  ;;  %v3925_v10 = vmul.f32 -1.442695, %v4601_v23 }
 0x66e   :  { %892 = vrot.lane.b32.xlu0 %v890_v13, %s5099_s19 }
 0x66f   :  { %v991_v8 = vpop.permute.xlu1 %990 }
 0x670   :  { %v993_v37 = vmul.f32 %v4744_v30, %v991_v8  ;;  %v3918_v8 = vmul.f32 -1.442695, %v5556_v39  ;;  %v345_v39 = vld [vmem:[#allocation9 + $0x30] sm:$0xff] }
 0x672   :  { %995 = vrot.lane.b32.xlu0 %v993_v37, %s5099_s19 }
 0x6c0   :  { %v712_v44 = vpop.permute.xlu1 %711 }
 0x6c1   :  { %v5573_v54 = vadd.f32 %v712_v44, %v704_v43  ;;  %v339_v43 = vld [vmem:[#allocation9] sm:$0xff]  ;;  %v341_v44 = vld [vmem:[#allocation9 + $0x10] sm:$0xff] }
 0x6c2   :  { %v5591_v20 = vpack.c.bf16 %v341_v44, %v339_v43  ;;  %v349_v43 = vld [vmem:[#allocation9 + $0x50] sm:$0xff]  ;;  %v352_v44 = vld [vmem:[#allocation9 + $0x68] sm:$0xff] }
 0x6c3   :  { %4745 = vtanh.f32 %v5573_v54 }
 0x6cd   :  { %v4746_v55 = vpop.eup %4745 }
 0x6ce   :  { %717 = vrot.lane.b32.xlu0 %v4746_v55, %s5099_s19  ;;  %v344_v55 = vld [vmem:[#allocation9 + $0x28] sm:$0xff] }
 0x6e0   :  { %v893_v4 = vpop.permute.xlu0 %892 }
 0x6e1   :  { %v5580_v17 = vadd.f32 %v893_v4, %v885_v59  ;;  %v346_v59 = vld [vmem:[#allocation9 + $0x38] sm:$0xff] }
 0x6e3   :  { %4747 = vtanh.f32 %v5580_v17 }
 0x6e4   :  { %v996_v3 = vpop.permute.xlu0 %995 }
 0x6e5   :  { %v5585_v0 = vadd.f32 %v996_v3, %v988_v56  ;;  %v5593_v56 = vpack.c.bf16 %v346_v59, %v344_v55  ;;  %v343_v3 = vld [vmem:[#allocation9 + $0x20] sm:$0xff]  ;;  %v354_v55 = vld [vmem:[#allocation9 + $0x78] sm:$0xff] }
 0x6e7   :  { %4749 = vtanh.f32 %v5585_v0 }
 0x6e8   :  { %4751 = vpow2.f32 %v3922_v19  ;;  %v350_v19 = vld [vmem:[#allocation9 + $0x58] sm:$0xff] }
 0x6e9   :  { %4753 = vpow2.f32 %v3925_v10 }
 0x6ea   :  { %4755 = vpow2.f32 %v3918_v8  ;;  %v5597_v8 = vpack.c.bf16 %v345_v39, %v343_v3 }
 0x6ed   :  { %v4748_v9 = vpop.eup %4747 }
 0x6ee   :  { %898 = vrot.lane.b32.xlu1 %v4748_v9, %s5099_s19 }
 0x6f1   :  { %v4750_v52 = vpop.eup %4749 }
 0x6f2   :  { %1001 = vrot.lane.b32.xlu1 %v4750_v52, %s5099_s19  ;;  %v4752_v13 = vpop.eup %4751  ;;  %v348_v52 = vld [vmem:[#allocation9 + $0x48] sm:$0xff] }
 0x6f3   :  { %v879_v37 = vadd.f32 1.0, %v4752_v13  ;;  %v4754_v57 = vpop.eup %4753 }
 0x6f4   :  { %v982_v30 = vadd.f32 1.0, %v4754_v57  ;;  %v4756_v63 = vpop.eup %4755  ;;  %v5601_v57 = vpack.c.bf16 %v350_v19, %v348_v52 }
 0x6f5   :  { %4757 = vrcp.f32 %v879_v37  ;;  %v698_v9 = vadd.f32 1.0, %v4756_v63  ;;  %v5610_v63 = vpack.c.bf16 %v354_v55, %v352_v44 }
 0x6f6   :  { %4759 = vrcp.f32 %v982_v30  ;;  %v347_v30 = vld [vmem:[#allocation9 + $0x40] sm:$0xff] }
 0x6f7   :  { %4761 = vrcp.f32 %v698_v9  ;;  %v5606_v59 = vpack.c.bf16 %v349_v43, %v347_v30 }
 0x6ff   :  { %v4758_v1 = vpop.eup %4757 }
 0x700   :  { %v4760_v10 = vpop.eup %4759 }
 0x701   :  { %v4762_v9 = vpop.eup %4761 }
 0x740   :  { %v718_v39 = vpop.permute.xlu0 %717 }
 0x741   :  { %v5621_v52 = vmul.f32 %v4762_v9, %v718_v39 }
 0x760   :  { %v899_v4 = vpop.permute.xlu1 %898 }
 0x761   :  { %v901_v23 = vmul.f32 %v4758_v1, %v899_v4  ;;  %v351_v1 = vld [vmem:[#allocation9 + $0x60] sm:$0xff]  ;;  %v353_v4 = vld [vmem:[#allocation9 + $0x70] sm:$0xff] }
 0x762   :  { %v5615_v3 = vpack.c.bf16 %v353_v4, %v351_v1 }
 0x763   :  { %3926 = vmatmul.mubr.msk.f32.vlgmr.msra.gmra.mrb[18].mxu0 %vm398_vm1, %v901_v23 }
 0x764   :  { %4121 = vmatpush1.bf16.msra.mxu0 %v5591_v20  ;;  %v1002_v13 = vpop.permute.xlu1 %1001  ;;  %1146 = vmatprep.mubr.f32.mxu0 %v6107_v5 }
 0x765   :  { %v1004_v37 = vmul.f32 %v4760_v10, %v1002_v13  ;;  %4123 = vmatprep.subr.bf16.mxu0 %v5593_v56 }
 0x767   :  { %3931 = vmatmul.mubr.msk.f32.vlgmr.msra.gmra.mrb[4].mxu1 %vm398_vm1, %v1004_v37 }
 0x768   :  { %4125 = vmatpush1.bf16.msra.mxu0 %v5597_v8  ;;  %4153 = vmatpush1.bf16.msra.mxu1 %v5505_v24 }
 0x769   :  { %4127 = vmatprep.subr.bf16.mxu0 %v5601_v57  ;;  %4155 = vmatprep.subr.bf16.mxu1 %v5508_v31 }
 0x76a   :  { %1327 = vmatprep.mubr.f32.mxu1 %v6107_v5 }
 0x76c   :  { %4129 = vmatpush1.bf16.msra.mxu0 %v5606_v59  ;;  %4157 = vmatpush1.bf16.msra.mxu1 %v5513_v50 }
 0x76d   :  { %4131 = vmatprep.subr.bf16.mxu0 %v5610_v63  ;;  %4159 = vmatprep.subr.bf16.mxu1 %v5517_v51 }
 0x770   :  { %4133 = vmatpush1.bf16.msra.mxu0 %v5615_v3  ;;  %4161 = vmatpush1.bf16.msra.mxu1 %v5523_v58 }
 0x771   :  { %4163 = vmatprep.subr.bf16.mxu1 %v5526_v60  ;;  %4167 = vmatprep.subr.bf16.mxu0 %v5351_v61 }
 0x773   :  { %3927 = vmatmul.mubr.msk.f32.vlgmr.msra.gmra.mrb[18].mxu0 %vm398_vm1, %v5621_v52 }
 0x774   :  { %4165 = vmatpush1.bf16.msra.mxu1 %v5531_v2  ;;  %4169 = vmatpush1.bf16.msra.mxu0 %v5371_v11 }
 0x775   :  { %4171 = vmatprep.subr.bf16.mxu0 %v5373_v14  ;;  %1430 = vmatprep.mubr.f32.mxu0 %v6107_v5 }
 0x776   :  { %4183 = vmatprep.subr.bf16.mxu1 %v5457_v7 }
 0x777   :  { %3932 = vmatmul.mubr.msk.f32.vlgmr.msra.gmra.mrb[4].mxu1 %vm398_vm1, %v901_v23 }
 0x778   :  { %4173 = vmatpush1.bf16.msra.mxu0 %v5389_v21  ;;  %4185 = vmatpush1.bf16.msra.mxu1 %v5459_v15 }
 0x779   :  { %4175 = vmatprep.subr.bf16.mxu0 %v5393_v22  ;;  %4187 = vmatprep.subr.bf16.mxu1 %v5461_v16 }
 0x77a   :  { %1536 = vmatprep.mubr.f32.mxu1 %v6107_v5 }
 0x77c   :  { %4177 = vmatpush1.bf16.msra.mxu0 %v5408_v27  ;;  %4189 = vmatpush1.bf16.msra.mxu1 %v5466_v25 }
 0x77d   :  { %4179 = vmatprep.subr.bf16.mxu0 %v5411_v28  ;;  %4191 = vmatprep.subr.bf16.mxu1 %v5469_v26 }
 0x780   :  { %4181 = vmatpush1.bf16.msra.mxu0 %v5420_v32  ;;  %4193 = vmatpush1.bf16.msra.mxu1 %v5472_v38 }
 0x781   :  { %4215 = vmatprep.subr.bf16.mxu0 %v5286_v29  ;;  %4195 = vmatprep.subr.bf16.mxu1 %v5475_v41 }
 0x783   :  { %3935 = vmatmul.mubr.msk.f32.vlgmr.msra.gmra.mrb[6].mxu0 %vm398_vm1, %v1004_v37 }
 0x784   :  { %4217 = vmatpush1.bf16.msra.mxu0 %v5291_v33  ;;  %1720 = vmatprep.mubr.f32.mxu0 %v6107_v5 }
 0x785   :  { %4219 = vmatprep.subr.bf16.mxu0 %v5296_v36  ;;  %4197 = vmatpush1.bf16.msra.mxu1 %v5478_v46 }
 0x786   :  { %4199 = vmatprep.subr.bf16.mxu1 %v5578_v45 }
 0x788   :  { %4221 = vmatpush1.bf16.msra.mxu0 %v5302_v40 }
 0x789   :  { %4223 = vmatprep.subr.bf16.mxu0 %v5305_v42 }
 0x78c   :  { %4225 = vmatpush1.bf16.msra.mxu0 %v5313_v48 }
 0x78d   :  { %4227 = vmatprep.subr.bf16.mxu0 %v5316_v49 }
 0x790   :  { %4229 = vmatpush1.bf16.msra.mxu0 %v5324_v53 }
 0x791   :  { %4231 = vmatprep.subr.bf16.mxu0 %v5502_v6 }
 0x846   :  { %v1148_v23 = vpop.f32.mrb[18].mxu0 }
 0x847   :  { %v1150_v19 = vpop.f32.mrb[19].mxu0  ;;  %v4614_v9 = vadd.f32 %v1148_v23, %v5565_v34 }
 0x848   :  { %v4615_v30 = vadd.f32 %v1150_v19, %v5553_v62 }
 0x849   :  { %v3928_v19 = vmul.f32 -1.442695, %v4614_v9 }
 0x84a   :  { %v1329_v10 = vpop.f32.mrb[4].mxu1 }
 0x84b   :  { %v1331_v13 = vpop.f32.mrb[5].mxu1  ;;  %v4616_v5 = vadd.f32 %v1329_v10, %v5451_v47 }
 0x84c   :  { %v5659_v37 = vadd.f32 %v1331_v13, %v5438_v35 }
 0x84d   :  { %v3933_v35 = vmul.f32 -1.442695, %v4616_v5 }
 0x84e   :  { %4763 = vtanh.f32 %v5659_v37 }
 0x84f   :  { %4765 = vtanh.f32 %v4615_v30 }
 0x856   :  { %v1432_v43 = vpop.f32.mrb[6].mxu0 }
 0x857   :  { %v1434_v44 = vpop.f32.mrb[7].mxu0  ;;  %v4602_v13 = vadd.f32 %v1432_v43, %v5282_v18 }
 0x858   :  { %v4764_v55 = vpop.eup %4763  ;;  %v4603_v1 = vadd.f32 %v1434_v44, %v5272_v12 }
 0x859   :  { %1351 = vrot.lane.b32.xlu1 %v4764_v55, %s5099_s19  ;;  %v4766_v4 = vpop.eup %4765  ;;  %v3936_v62 = vmul.f32 -1.442695, %v4602_v13 }
 0x85a   :  { %4767 = vtanh.f32 %v4603_v1 }
 0x85b   :  { %4769 = vpow2.f32 %v3928_v19 }
 0x85c   :  { %4771 = vpow2.f32 %v3936_v62 }
 0x85d   :  { %1170 = vrot.lane.b32.xlu1 %v4766_v4, %s5099_s19  ;;  %4773 = vpow2.f32 %v3933_v35 }
 0x864   :  { %v4768_v39 = vpop.eup %4767 }
 0x865   :  { %1454 = vrot.lane.b32.xlu0 %v4768_v39, %s5099_s19  ;;  %v4770_v44 = vpop.eup %4769 }
 0x866   :  { %v1161_v55 = vadd.f32 1.0, %v4770_v44  ;;  %v4772_v12 = vpop.eup %4771 }
 0x867   :  { %v1445_v4 = vadd.f32 1.0, %v4772_v12  ;;  %v4774_v6 = vpop.eup %4773 }
 0x868   :  { %4775 = vrcp.f32 %v1161_v55  ;;  %v1342_v39 = vadd.f32 1.0, %v4774_v6 }
 0x869   :  { %4777 = vrcp.f32 %v1445_v4 }
 0x86a   :  { %4779 = vrcp.f32 %v1342_v39 }
 0x872   :  { %v4776_v23 = vpop.eup %4775 }
 0x873   :  { %v4778_v10 = vpop.eup %4777  ;;  %v1168_v6 = vmul.f32 %v4776_v23, %v5573_v54 }
 0x874   :  { %v4780_v35 = vpop.eup %4779  ;;  %v1452_v13 = vmul.f32 %v4778_v10, %v5585_v0 }
 0x875   :  { %v1349_v39 = vmul.f32 %v4780_v35, %v5580_v17  ;;  %v3934_v17 = vmul.f32 -1.442695, %v5659_v37 }
 0x8cb   :  { %v1352_v53 = vpop.permute.xlu1 %1351 }
 0x8cc   :  { %v1354_v62 = vmul.f32 %v4780_v35, %v1352_v53 }
 0x8cf   :  { %v1171_v9 = vpop.permute.xlu1 %1170 }
 0x8d0   :  { %v1173_v19 = vmul.f32 %v4776_v23, %v1171_v9  ;;  %v3937_v23 = vmul.f32 -1.442695, %v4603_v1 }
 0x8d2   :  { %1175 = vrot.lane.b32.xlu1 %v1173_v19, %s5099_s19 }
 0x8d7   :  { %v1455_v43 = vpop.permute.xlu0 %1454 }
 0x8d8   :  { %v1457_v5 = vmul.f32 %v4778_v10, %v1455_v43  ;;  %v3929_v10 = vmul.f32 -1.442695, %v4615_v30 }
 0x8da   :  { %1459 = vrot.lane.b32.xlu0 %v1457_v5, %s5099_s19 }
 0x8de   :  { %1356 = vrot.lane.b32.xlu0 %v1354_v62, %s5099_s19 }
 0x944   :  { %v1176_v12 = vpop.permute.xlu1 %1175 }
 0x945   :  { %v5677_v4 = vadd.f32 %v1176_v12, %v1168_v6 }
 0x94c   :  { %v1460_v44 = vpop.permute.xlu0 %1459 }
 0x94d   :  { %v5675_v55 = vadd.f32 %v1460_v44, %v1452_v13 }
 0x94f   :  { %4781 = vtanh.f32 %v5675_v55 }
 0x950   :  { %v1357_v9 = vpop.permute.xlu0 %1356  ;;  %4783 = vtanh.f32 %v5677_v4 }
 0x951   :  { %v5681_v19 = vadd.f32 %v1357_v9, %v1349_v39  ;;  %v722_v39 = vstv %s721_s9  ;;  %v1186_v9 = vstv %s3930_s3 }
 0x953   :  { %4785 = vtanh.f32 %v5681_v19 }
 0x954   :  { %4787 = vpow2.f32 %v3937_v23 }
 0x955   :  { %4789 = vpow2.f32 %v3929_v10 }
 0x956   :  { %4791 = vpow2.f32 %v3934_v17  ;;  %v723_v17 = vmul.f32 %v722_v39, %v5621_v52  ;;  %v6148_v52 = vld [vmem:[#allocation22_spill] sm:$0xff] }
 0x959   :  { %v4782_v53 = vpop.eup %4781 }
 0x95a   :  { %1465 = vrot.lane.b32.xlu0 %v4782_v53, %s5099_s19  ;;  %v4784_v54 = vpop.eup %4783 }
 0x95d   :  { %v4786_v0 = vpop.eup %4785 }
 0x95e   :  { %1362 = vrot.lane.b32.xlu1 %v4786_v0, %s5099_s19  ;;  %1181 = vrot.lane.b32.xlu0 %v4784_v54, %s5099_s19  ;;  %v4788_v43 = vpop.eup %4787  ;;  %v6147_v0 = vmov 0.0  }
 0x95f   :  { %v4790_v5 = vpop.eup %4789  ;;  %v1446_v35 = vadd.f32 1.0, %v4788_v43 }
 0x960   :  { %v4792_v62 = vpop.eup %4791  ;;  %v1162_v12 = vadd.f32 1.0, %v4790_v5 }
 0x961   :  { %v1343_v13 = vadd.f32 1.0, %v4792_v62  ;;  %4793 = vrcp.f32 %v1446_v35  ;;  %v6149_v35 = vld [vmem:[#allocation24_spill] sm:$0xff] }
 0x962   :  { %4795 = vrcp.f32 %v1162_v12 }
 0x963   :  { %4797 = vrcp.f32 %v1343_v13  ;;  %v6150_v13 = vld [vmem:[#allocation23_spill] sm:$0xff] }
 0x96b   :  { %v4794_v6 = vpop.eup %4793 }
 0x96c   :  { %v4796_v30 = vpop.eup %4795 }
 0x96d   :  { %v4798_v37 = vpop.eup %4797 }
 0x9cc   :  { %v1466_v44 = vpop.permute.xlu0 %1465 }
 0x9cd   :  { %v1468_v1 = vmul.f32 %v4794_v6, %v1466_v44 }
 0x9cf   :  { %3943 = vmatmul.mubr.msk.f32.vlgmr.msra.gmra.mrb[20].mxu0 %vm398_vm1, %v1468_v1 }
 0x9d0   :  { %4233 = vmatpush1.bf16.msra.mxu0 %v5505_v24  ;;  %v1182_v53 = vpop.permute.xlu0 %1181  ;;  %v1363_v54 = vpop.permute.xlu1 %1362  ;;  %1791 = vmatprep.mubr.f32.mxu0 %v6147_v0 }
 0x9d1   :  { %v1184_v23 = vmul.f32 %v4796_v30, %v1182_v53  ;;  %v1365_v10 = vmul.f32 %v4798_v37, %v1363_v54  ;;  %4235 = vmatprep.subr.bf16.mxu0 %v5508_v31  ;;  %v6152_v54 = vld [vmem:[#allocation25_spill] sm:$0xff] }
 0x9d3   :  { %v1187_v43 = vmul.f32 %v1186_v9, %v1184_v23  ;;  %3938 = vmatmul.mubr.msk.f32.vlgmr.msra.gmra.mrb[6].mxu1 %vm398_vm1, %v1365_v10  ;;  %v6151_v9 = vld [vmem:[#allocation16_spill] sm:$0xff] }
 0x9d4   :  { %4201 = vmatpush1.bf16.msra.mxu1 %v5591_v20  ;;  %4237 = vmatpush1.bf16.msra.mxu0 %v5513_v50 }
 0x9d5   :  { %v5697_v5 = vadd.f32 %v1187_v43, %v723_v17  ;;  %4203 = vmatprep.subr.bf16.mxu1 %v5593_v56  ;;  %4239 = vmatprep.subr.bf16.mxu0 %v5517_v51 }
 0x9d6   :  { %1610 = vmatprep.mubr.f32.mxu1 %v6147_v0 }
 0x9d8   :  { %4205 = vmatpush1.bf16.msra.mxu1 %v5597_v8  ;;  %4241 = vmatpush1.bf16.msra.mxu0 %v5523_v58 }
 0x9d9   :  { %4207 = vmatprep.subr.bf16.mxu1 %v5601_v57  ;;  %4243 = vmatprep.subr.bf16.mxu0 %v5526_v60 }
 0x9dc   :  { %4209 = vmatpush1.bf16.msra.mxu1 %v5606_v59  ;;  %4245 = vmatpush1.bf16.msra.mxu0 %v5531_v2 }
 0x9dd   :  { %4211 = vmatprep.subr.bf16.mxu1 %v5610_v63  ;;  %4247 = vmatprep.subr.bf16.mxu0 %v5351_v61 }
 0x9df   :  { %3944 = vmatmul.mubr.msk.f32.vlgmr.msra.gmra.mrb[20].mxu0 %vm398_vm1, %v1365_v10 }
 0x9e0   :  { %4213 = vmatpush1.bf16.msra.mxu1 %v5615_v3  ;;  %4249 = vmatpush1.bf16.msra.mxu0 %v5371_v11 }
 0x9e1   :  { %4251 = vmatprep.subr.bf16.mxu0 %v5373_v14  ;;  %1894 = vmatprep.mubr.f32.mxu0 %v6147_v0 }
 0x9e2   :  { %4263 = vmatprep.subr.bf16.mxu1 %v5457_v7 }
 0x9e3   :  { %3939 = vmatmul.mubr.msk.f32.vlgmr.msra.gmra.mrb[6].mxu1 %vm398_vm1, %v1184_v23 }
 0x9e4   :  { %4253 = vmatpush1.bf16.msra.mxu0 %v5389_v21  ;;  %4265 = vmatpush1.bf16.msra.mxu1 %v5459_v15 }
 0x9e5   :  { %4255 = vmatprep.subr.bf16.mxu0 %v5393_v22  ;;  %4267 = vmatprep.subr.bf16.mxu1 %v5461_v16 }
 0x9e6   :  { %2000 = vmatprep.mubr.f32.mxu1 %v6147_v0 }
 0x9e8   :  { %4257 = vmatpush1.bf16.msra.mxu0 %v5408_v27  ;;  %4269 = vmatpush1.bf16.msra.mxu1 %v5466_v25 }
 0x9e9   :  { %4259 = vmatprep.subr.bf16.mxu0 %v5411_v28  ;;  %4271 = vmatprep.subr.bf16.mxu1 %v5469_v26 }
 0x9ec   :  { %4261 = vmatpush1.bf16.msra.mxu0 %v5420_v32  ;;  %4273 = vmatpush1.bf16.msra.mxu1 %v5472_v38 }
 0x9ed   :  { %4275 = vmatprep.subr.bf16.mxu1 %v5475_v41  ;;  %4295 = vmatprep.subr.bf16.mxu0 %v5286_v29 }
 0x9ef   :  { %3947 = vmatmul.mubr.msk.f32.vlgmr.msra.gmra.mrb[8].mxu0 %vm398_vm1, %v1468_v1 }
 0x9f0   :  { %4277 = vmatpush1.bf16.msra.mxu1 %v5478_v46  ;;  %4297 = vmatpush1.bf16.msra.mxu0 %v5291_v33 }
 0x9f1   :  { %4299 = vmatprep.subr.bf16.mxu0 %v5296_v36  ;;  %4279 = vmatprep.subr.bf16.mxu1 %v5578_v45 }
 0x9f2   :  { %2184 = vmatprep.mubr.f32.mxu0 %v6147_v0 }
 0x9f4   :  { %4301 = vmatpush1.bf16.msra.mxu0 %v5302_v40 }
 0x9f5   :  { %4303 = vmatprep.subr.bf16.mxu0 %v5305_v42 }
 0x9f8   :  { %4305 = vmatpush1.bf16.msra.mxu0 %v5313_v48 }
 0x9f9   :  { %4307 = vmatprep.subr.bf16.mxu0 %v5316_v49 }
 0x9fc   :  { %4309 = vmatpush1.bf16.msra.mxu0 %v6148_v52 }
 0x9fd   :  { %4311 = vmatprep.subr.bf16.mxu0 %v6149_v35 }
 0xab2   :  { %v1793_v62 = vpop.f32.mrb[20].mxu0 }
 0xab3   :  { %v1795_v12 = vpop.f32.mrb[21].mxu0  ;;  %v4620_v43 = vadd.f32 %v1793_v62, %v5451_v47 }
 0xab4   :  { %v5743_v6 = vadd.f32 %v1795_v12, %v6150_v13 }
 0xab5   :  { %v3945_v12 = vmul.f32 -1.442695, %v4620_v43 }
 0xab6   :  { %4799 = vtanh.f32 %v5743_v6  ;;  %v1612_v44 = vpop.f32.mrb[6].mxu1 }
 0xab7   :  { %v1614_v1 = vpop.f32.mrb[7].mxu1  ;;  %v4618_v52 = vadd.f32 %v1612_v44, %v5565_v34 }
 0xab8   :  { %v4619_v23 = vadd.f32 %v1614_v1, %v6152_v54 }
 0xab9   :  { %v3940_v1 = vmul.f32 -1.442695, %v4618_v52 }
 0xac0   :  { %v4800_v30 = vpop.eup %4799 }
 0xac1   :  { %1815 = vrot.lane.b32.xlu0 %v4800_v30, %s5099_s19 }
 0xac2   :  { %v1896_v37 = vpop.f32.mrb[8].mxu0 }
 0xac3   :  { %v1898_v39 = vpop.f32.mrb[9].mxu0  ;;  %v4604_v30 = vadd.f32 %v1896_v37, %v5282_v18 }
 0xac4   :  { %v4605_v53 = vadd.f32 %v1898_v39, %v6151_v9 }
 0xac5   :  { %v3948_v39 = vmul.f32 -1.442695, %v4604_v30 }
 0xac6   :  { %4801 = vtanh.f32 %v4605_v53 }
 0xac7   :  { %4803 = vtanh.f32 %v4619_v23 }
 0xac8   :  { %4805 = vpow2.f32 %v3945_v12 }
 0xac9   :  { %4807 = vpow2.f32 %v3948_v39 }
 0xad0   :  { %v4802_v10 = vpop.eup %4801 }
 0xad1   :  { %1918 = vrot.lane.b32.xlu1 %v4802_v10, %s5099_s19  ;;  %v4804_v17 = vpop.eup %4803 }
 0xad2   :  { %v4806_v35 = vpop.eup %4805 }
 0xad3   :  { %v1806_v49 = vadd.f32 1.0, %v4806_v35  ;;  %v4808_v48 = vpop.eup %4807 }
 0xad5   :  { %1634 = vrot.lane.b32.xlu1 %v4804_v17, %s5099_s19  ;;  %4809 = vrcp.f32 %v1806_v49  ;;  %v1909_v17 = vadd.f32 1.0, %v4808_v48 }
 0xad6   :  { %4811 = vpow2.f32 %v3940_v1 }
 0xad7   :  { %4813 = vrcp.f32 %v1909_v17 }
 0xadf   :  { %v4810_v10 = vpop.eup %4809 }
 0xae0   :  { %v4812_v36 = vpop.eup %4811  ;;  %v1813_v12 = vmul.f32 %v4810_v10, %v5681_v19 }
 0xae1   :  { %v1625_v62 = vadd.f32 1.0, %v4812_v36  ;;  %v4814_v37 = vpop.eup %4813 }
 0xae3   :  { %4815 = vrcp.f32 %v1625_v62 }
 0xaed   :  { %v4816_v52 = vpop.eup %4815 }
 0xaee   :  { %v1632_v1 = vmul.f32 %v4816_v52, %v5677_v4 }
 0xb33   :  { %v1816_v42 = vpop.permute.xlu0 %1815 }
 0xb34   :  { %v1818_v40 = vmul.f32 %v4810_v10, %v1816_v42 }
 0xb36   :  { %1820 = vrot.lane.b32.xlu1 %v1818_v40, %s5099_s19  ;;  %v1916_v40 = vmul.f32 %v4814_v37, %v5675_v55  ;;  %v3946_v55 = vmul.f32 -1.442695, %v5743_v6 }
 0xb43   :  { %v1919_v43 = vpop.permute.xlu1 %1918 }
 0xb44   :  { %v1921_v44 = vmul.f32 %v4814_v37, %v1919_v43  ;;  %v3949_v43 = vmul.f32 -1.442695, %v4605_v53 }
 0xb46   :  { %1923 = vrot.lane.b32.xlu0 %v1921_v44, %s5099_s19 }
 0xb47   :  { %v1635_v35 = vpop.permute.xlu1 %1634 }
 0xb48   :  { %v1637_v49 = vmul.f32 %v4816_v52, %v1635_v35  ;;  %v3941_v35 = vmul.f32 -1.442695, %v4619_v23 }
 0xb4a   :  { %1639 = vrot.lane.b32.xlu0 %v1637_v49, %s5099_s19 }
 0xba8   :  { %v1821_v42 = vpop.permute.xlu1 %1820 }
 0xba9   :  { %v5758_v48 = vadd.f32 %v1821_v42, %v1813_v12 }
 0xbab   :  { %4817 = vtanh.f32 %v5758_v48 }
 0xbb5   :  { %v4818_v36 = vpop.eup %4817 }
 0xbb6   :  { %1826 = vrot.lane.b32.xlu0 %v4818_v36, %s5099_s19 }
 0xbb8   :  { %v1924_v30 = vpop.permute.xlu0 %1923 }
 0xbb9   :  { %v5763_v39 = vadd.f32 %v1924_v30, %v1916_v40 }
 0xbbb   :  { %4819 = vtanh.f32 %v5763_v39 }
 0xbbc   :  { %v1640_v17 = vpop.permute.xlu0 %1639 }
 0xbbd   :  { %v5767_v62 = vadd.f32 %v1640_v17, %v1632_v1  ;;  %v1650_v1 = vstv %s3942_s23 }
 0xbbf   :  { %4821 = vtanh.f32 %v5767_v62 }
 0xbc0   :  { %4823 = vpow2.f32 %v3946_v55 }
 0xbc1   :  { %4825 = vpow2.f32 %v3949_v43 }
 0xbc5   :  { %v4820_v19 = vpop.eup %4819 }
 0xbc6   :  { %1929 = vrot.lane.b32.xlu1 %v4820_v19, %s5099_s19 }
 0xbc9   :  { %v4822_v10 = vpop.eup %4821 }
 0xbca   :  { %1645 = vrot.lane.b32.xlu1 %v4822_v10, %s5099_s19  ;;  %v4824_v37 = vpop.eup %4823 }
 0xbcb   :  { %v1807_v44 = vadd.f32 1.0, %v4824_v37  ;;  %v4826_v4 = vpop.eup %4825 }
 0xbcc   :  { %v1910_v42 = vadd.f32 1.0, %v4826_v4 }
 0xbcd   :  { %4827 = vrcp.f32 %v1807_v44 }
 0xbce   :  { %4829 = vpow2.f32 %v3941_v35 }
 0xbcf   :  { %4831 = vrcp.f32 %v1910_v42 }
 0xbd7   :  { %v4828_v52 = vpop.eup %4827 }
 0xbd8   :  { %v4830_v36 = vpop.eup %4829 }
 0xbd9   :  { %v1626_v6 = vadd.f32 1.0, %v4830_v36  ;;  %v4832_v53 = vpop.eup %4831 }
 0xbdb   :  { %4833 = vrcp.f32 %v1626_v6 }
 0xbe5   :  { %v4834_v30 = vpop.eup %4833 }
 0xc28   :  { %v1827_v49 = vpop.permute.xlu0 %1826 }
 0xc29   :  { %v1829_v12 = vmul.f32 %v4828_v52, %v1827_v49 }
 0xc2b   :  { %3950 = vmatmul.mubr.msk.f32.vlgmr.msra.gmra.mrb[8].mxu1 %vm398_vm1, %v1829_v12 }
 0xc2c   :  { %4281 = vmatpush1.bf16.msra.mxu1 %v5591_v20  ;;  %2074 = vmatprep.mubr.f32.mxu1 %v6147_v0 }
 0xc2d   :  { %4283 = vmatprep.subr.bf16.mxu1 %v5593_v56 }
 0xc30   :  { %4285 = vmatpush1.bf16.msra.mxu1 %v5597_v8 }
 0xc31   :  { %4287 = vmatprep.subr.bf16.mxu1 %v5601_v57 }
 0xc34   :  { %4289 = vmatpush1.bf16.msra.mxu1 %v5606_v59 }
 0xc35   :  { %4291 = vmatprep.subr.bf16.mxu1 %v5610_v63 }
 0xc38   :  { %v1930_v23 = vpop.permute.xlu1 %1929  ;;  %4293 = vmatpush1.bf16.msra.mxu1 %v5615_v3 }
 0xc39   :  { %v1932_v40 = vmul.f32 %v4832_v53, %v1930_v23  ;;  %4343 = vmatprep.subr.bf16.mxu1 %v5457_v7 }
 0xc3b   :  { %3955 = vmatmul.mubr.msk.f32.vlgmr.msra.gmra.mrb[22].mxu0 %vm398_vm1, %v1932_v40 }
 0xc3c   :  { %4313 = vmatpush1.bf16.msra.mxu0 %v5505_v24  ;;  %v1646_v17 = vpop.permute.xlu1 %1645  ;;  %2255 = vmatprep.mubr.f32.mxu0 %v6147_v0 }
 0xc3d   :  { %v1648_v19 = vmul.f32 %v4834_v30, %v1646_v17  ;;  %4315 = vmatprep.subr.bf16.mxu0 %v5508_v31 }
 0xc3f   :  { %v1651_v10 = vmul.f32 %v1650_v1, %v1648_v19  ;;  %3951 = vmatmul.mubr.msk.f32.vlgmr.msra.gmra.mrb[8].mxu1 %vm398_vm1, %v1648_v19 }
 0xc40   :  { %4317 = vmatpush1.bf16.msra.mxu0 %v5513_v50  ;;  %4345 = vmatpush1.bf16.msra.mxu1 %v5459_v15 }
 0xc41   :  { %v5791_v55 = vadd.f32 %v1651_v10, %v5697_v5  ;;  %4319 = vmatprep.subr.bf16.mxu0 %v5517_v51  ;;  %4347 = vmatprep.subr.bf16.mxu1 %v5461_v16 }
 0xc42   :  { %2464 = vmatprep.mubr.f32.mxu1 %v6147_v0 }
 0xc44   :  { %4321 = vmatpush1.bf16.msra.mxu0 %v5523_v58  ;;  %4349 = vmatpush1.bf16.msra.mxu1 %v5466_v25 }
 0xc45   :  { %4323 = vmatprep.subr.bf16.mxu0 %v5526_v60  ;;  %4351 = vmatprep.subr.bf16.mxu1 %v5469_v26 }
 0xc48   :  { %4325 = vmatpush1.bf16.msra.mxu0 %v5531_v2  ;;  %4353 = vmatpush1.bf16.msra.mxu1 %v5472_v38 }
 0xc49   :  { %4327 = vmatprep.subr.bf16.mxu0 %v5351_v61  ;;  %4355 = vmatprep.subr.bf16.mxu1 %v5475_v41 }
 0xc4b   :  { %3956 = vmatmul.mubr.msk.f32.vlgmr.msra.gmra.mrb[22].mxu0 %vm398_vm1, %v1829_v12 }
 0xc4c   :  { %4329 = vmatpush1.bf16.msra.mxu0 %v5371_v11  ;;  %2358 = vmatprep.mubr.f32.mxu0 %v6147_v0 }
 0xc4d   :  { %4331 = vmatprep.subr.bf16.mxu0 %v5373_v14  ;;  %4357 = vmatpush1.bf16.msra.mxu1 %v5478_v46 }
 0xc4e   :  { %4359 = vmatprep.subr.bf16.mxu1 %v5578_v45 }
 0xc50   :  { %4333 = vmatpush1.bf16.msra.mxu0 %v5389_v21 }
 0xc51   :  { %4335 = vmatprep.subr.bf16.mxu0 %v5393_v22 }
 0xc54   :  { %4337 = vmatpush1.bf16.msra.mxu0 %v5408_v27 }
 0xc55   :  { %4339 = vmatprep.subr.bf16.mxu0 %v5411_v28 }
 0xc58   :  { %4341 = vmatpush1.bf16.msra.mxu0 %v5420_v32 }
 0xc59   :  { %4407 = vmatprep.subr.bf16.mxu0 %v5351_v61 }
 0xc5b   :  { %3959 = vmatmul.mubr.msk.f32.vlgmr.msra.gmra.mrb[10].mxu0 %vm398_vm1, %v1932_v40 }
 0xc5c   :  { %4409 = vmatpush1.bf16.msra.mxu0 %v5371_v11  ;;  %2822 = vmatprep.mubr.f32.mxu0 %v6147_v0 }
 0xc5d   :  { %4411 = vmatprep.subr.bf16.mxu0 %v5373_v14 }
 0xc60   :  { %4413 = vmatpush1.bf16.msra.mxu0 %v5389_v21 }
 0xc61   :  { %4415 = vmatprep.subr.bf16.mxu0 %v5393_v22 }
 0xc64   :  { %4417 = vmatpush1.bf16.msra.mxu0 %v5408_v27 }
 0xc65   :  { %4419 = vmatprep.subr.bf16.mxu0 %v5411_v28 }
 0xc68   :  { %4421 = vmatpush1.bf16.msra.mxu0 %v5420_v32 }
 0xc69   :  { %4423 = vmatprep.subr.bf16.mxu0 %v5457_v7 }
 0xd12   :  { %v2076_v5 = vpop.f32.mrb[8].mxu1 }
 0xd13   :  { %v2078_v37 = vpop.f32.mrb[9].mxu1  ;;  %v4622_v53 = vadd.f32 %v2076_v5, %v5565_v34 }
 0xd14   :  { %v5827_v43 = vadd.f32 %v2078_v37, %v6152_v54 }
 0xd15   :  { %v3952_v23 = vmul.f32 -1.442695, %v4622_v53 }
 0xd16   :  { %4835 = vtanh.f32 %v5827_v43 }
 0xd1e   :  { %v2257_v44 = vpop.f32.mrb[22].mxu0 }
 0xd1f   :  { %v2259_v35 = vpop.f32.mrb[23].mxu0  ;;  %v4624_v40 = vadd.f32 %v2257_v44, %v5451_v47 }
 0xd20   :  { %v4836_v4 = vpop.eup %4835  ;;  %v4625_v52 = vadd.f32 %v2259_v35, %v6150_v13 }
 0xd21   :  { %2098 = vrot.lane.b32.xlu1 %v4836_v4, %s5099_s19  ;;  %v3957_v30 = vmul.f32 -1.442695, %v4624_v40 }
 0xd22   :  { %4837 = vtanh.f32 %v4625_v52 }
 0xd2c   :  { %v4838_v49 = vpop.eup %4837 }
 0xd2d   :  { %2279 = vrot.lane.b32.xlu0 %v4838_v49, %s5099_s19 }
 0xd2e   :  { %v2360_v12 = vpop.f32.mrb[10].mxu0 }
 0xd2f   :  { %v2362_v42 = vpop.f32.mrb[11].mxu0  ;;  %v4606_v19 = vadd.f32 %v2360_v12, %v5282_v18 }
 0xd30   :  { %v4607_v36 = vadd.f32 %v2362_v42, %v6151_v9 }
 0xd31   :  { %v3960_v37 = vmul.f32 -1.442695, %v4606_v19 }
 0xd32   :  { %4839 = vtanh.f32 %v4607_v36 }
 0xd33   :  { %4841 = vpow2.f32 %v3952_v23 }
 0xd34   :  { %4843 = vpow2.f32 %v3957_v30 }
 0xd3c   :  { %v4840_v6 = vpop.eup %4839 }
 0xd3d   :  { %2382 = vrot.lane.b32.xlu0 %v4840_v6, %s5099_s19  ;;  %v4842_v1 = vpop.eup %4841 }
 0xd3e   :  { %v2089_v17 = vadd.f32 1.0, %v4842_v1  ;;  %v4844_v10 = vpop.eup %4843 }
 0xd3f   :  { %v2270_v35 = vadd.f32 1.0, %v4844_v10 }
 0xd40   :  { %4845 = vrcp.f32 %v2089_v17 }
 0xd41   :  { %4847 = vpow2.f32 %v3960_v37 }
 0xd42   :  { %4849 = vrcp.f32 %v2270_v35 }
 0xd4a   :  { %v4846_v4 = vpop.eup %4845 }
 0xd4b   :  { %v4848_v5 = vpop.eup %4847  ;;  %v2096_v1 = vmul.f32 %v4846_v4, %v5767_v62 }
 0xd4c   :  { %v4850_v6 = vpop.eup %4849  ;;  %v2373_v23 = vadd.f32 1.0, %v4848_v5 }
 0xd4d   :  { %v2277_v10 = vmul.f32 %v4850_v6, %v5758_v48  ;;  %v3953_v48 = vmul.f32 -1.442695, %v5827_v43 }
 0xd4e   :  { %4851 = vrcp.f32 %v2373_v23 }
 0xd58   :  { %v4852_v40 = vpop.eup %4851 }
 0xd59   :  { %v2380_v62 = vmul.f32 %v4852_v40, %v5763_v39 }
 0xd93   :  { %v2099_v49 = vpop.permute.xlu1 %2098 }
 0xd94   :  { %v2101_v42 = vmul.f32 %v4846_v4, %v2099_v49 }
 0xd96   :  { %2103 = vrot.lane.b32.xlu0 %v2101_v42, %s5099_s19 }
 0xd9f   :  { %v2280_v44 = vpop.permute.xlu0 %2279 }
 0xda0   :  { %v2282_v53 = vmul.f32 %v4850_v6, %v2280_v44  ;;  %v3958_v6 = vmul.f32 -1.442695, %v4625_v52 }
 0xda2   :  { %2284 = vrot.lane.b32.xlu1 %v2282_v53, %s5099_s19 }
 0xdaf   :  { %v2383_v12 = vpop.permute.xlu0 %2382 }
 0xdb0   :  { %v2385_v30 = vmul.f32 %v4852_v40, %v2383_v12 }
 0xdb2   :  { %2387 = vrot.lane.b32.xlu1 %v2385_v30, %s5099_s19  ;;  %v3961_v30 = vmul.f32 -1.442695, %v4607_v36 }
 0xe08   :  { %v2104_v17 = vpop.permute.xlu0 %2103 }
 0xe09   :  { %v5842_v19 = vadd.f32 %v2104_v17, %v2096_v1  ;;  %v2114_v1 = vstv %s3954_s24 }
 0xe0b   :  { %4853 = vtanh.f32 %v5842_v19 }
 0xe14   :  { %v2285_v37 = vpop.permute.xlu1 %2284 }
 0xe15   :  { %v4854_v35 = vpop.eup %4853  ;;  %v5846_v49 = vadd.f32 %v2285_v37, %v2277_v10 }
 0xe16   :  { %2109 = vrot.lane.b32.xlu1 %v4854_v35, %s5099_s19 }
 0xe17   :  { %4855 = vtanh.f32 %v5846_v49 }
 0xe21   :  { %v4856_v42 = vpop.eup %4855 }
 0xe22   :  { %2290 = vrot.lane.b32.xlu0 %v4856_v42, %s5099_s19 }
 0xe24   :  { %v2388_v4 = vpop.permute.xlu1 %2387 }
 0xe25   :  { %v5852_v5 = vadd.f32 %v2388_v4, %v2380_v62 }
 0xe27   :  { %4857 = vtanh.f32 %v5852_v5 }
 0xe28   :  { %4859 = vpow2.f32 %v3953_v48  ;;  %v6153_v48 = vld [vmem:[#allocation17_spill] sm:$0xff] }
 0xe29   :  { %4861 = vpow2.f32 %v3958_v6  ;;  %v6154_v6 = vld [vmem:[#allocation18_spill] sm:$0xff] }
 0xe31   :  { %v4858_v44 = vpop.eup %4857 }
 0xe32   :  { %2393 = vrot.lane.b32.xlu0 %v4858_v44, %s5099_s19  ;;  %v4860_v53 = vpop.eup %4859 }
 0xe33   :  { %v2090_v23 = vadd.f32 1.0, %v4860_v53  ;;  %v4862_v12 = vpop.eup %4861  ;;  %v6155_v53 = vld [vmem:[#allocation19_spill] sm:$0xff] }
 0xe34   :  { %v2271_v39 = vadd.f32 1.0, %v4862_v12  ;;  %v6157_v12 = vld [vmem:[#allocation21_spill] sm:$0xff] }
 0xe35   :  { %4863 = vrcp.f32 %v2090_v23  ;;  %v6156_v23 = vld [vmem:[#allocation20_spill] sm:$0xff] }
 0xe36   :  { %4865 = vpow2.f32 %v3961_v30  ;;  %v6158_v30 = vld [vmem:[#allocation22_spill] sm:$0xff] }
 0xe37   :  { %4867 = vrcp.f32 %v2271_v39  ;;  %v6159_v39 = vld [vmem:[#allocation24_spill] sm:$0xff] }
 0xe3f   :  { %v4864_v40 = vpop.eup %4863 }
 0xe40   :  { %v4866_v43 = vpop.eup %4865 }
 0xe41   :  { %v4868_v52 = vpop.eup %4867  ;;  %v2374_v4 = vadd.f32 1.0, %v4866_v43 }
 0xe43   :  { %4869 = vrcp.f32 %v2374_v4 }
 0xe88   :  { %v2110_v17 = vpop.permute.xlu1 %2109 }
 0xe89   :  { %v2112_v10 = vmul.f32 %v4864_v40, %v2110_v17 }
 0xe8b   :  { %v2115_v37 = vmul.f32 %v2114_v1, %v2112_v10 }
 0xe8d   :  { %v5858_v35 = vadd.f32 %v2115_v37, %v5791_v55  ;;  %v4870_v55 = vpop.eup %4869 }
 0xe94   :  { %v2291_v42 = vpop.permute.xlu0 %2290 }
 0xe95   :  { %v2293_v62 = vmul.f32 %v4868_v52, %v2291_v42 }
 0xe97   :  { %3962 = vmatmul.mubr.msk.f32.vlgmr.msra.gmra.mrb[10].mxu1 %vm398_vm1, %v2293_v62 }
 0xe98   :  { %4361 = vmatpush1.bf16.msra.mxu1 %v5591_v20  ;;  %2538 = vmatprep.mubr.f32.mxu1 %v6147_v0 }
 0xe99   :  { %4363 = vmatprep.subr.bf16.mxu1 %v5593_v56 }
 0xe9c   :  { %4365 = vmatpush1.bf16.msra.mxu1 %v5597_v8 }
 0xe9d   :  { %4367 = vmatprep.subr.bf16.mxu1 %v5601_v57 }
 0xea0   :  { %4369 = vmatpush1.bf16.msra.mxu1 %v5606_v59 }
 0xea1   :  { %4371 = vmatprep.subr.bf16.mxu1 %v5610_v63 }
 0xea4   :  { %4373 = vmatpush1.bf16.msra.mxu1 %v5615_v3  ;;  %v2394_v36 = vpop.permute.xlu0 %2393 }
 0xea5   :  { %v2396_v44 = vmul.f32 %v4870_v55, %v2394_v36  ;;  %4375 = vmatprep.subr.bf16.mxu1 %v5286_v29 }
 0xea7   :  { %3963 = vmatmul.mubr.msk.f32.vlgmr.msra.gmra.mrb[10].mxu1 %vm398_vm1, %v2112_v10  ;;  %3971 = vmatmul.mubr.msk.f32.vlgmr.msra.gmra.mrb[12].mxu0 %vm398_vm1, %v2396_v44 }
 0xea8   :  { %4377 = vmatpush1.bf16.msra.mxu1 %v5291_v33  ;;  %2648 = vmatprep.mubr.f32.mxu1 %v6147_v0 }
 0xea9   :  { %4379 = vmatprep.subr.bf16.mxu1 %v6153_v48  ;;  %4425 = vmatpush1.bf16.msra.mxu0 %v5459_v15 }
 0xeaa   :  { %4427 = vmatprep.subr.bf16.mxu0 %v5461_v16  ;;  %2928 = vmatprep.mubr.f32.mxu0 %v6147_v0 }
 0xeac   :  { %4381 = vmatpush1.bf16.msra.mxu1 %v6154_v6 }
 0xead   :  { %4383 = vmatprep.subr.bf16.mxu1 %v6155_v53  ;;  %4429 = vmatpush1.bf16.msra.mxu0 %v5466_v25 }
 0xeae   :  { %4431 = vmatprep.subr.bf16.mxu0 %v5469_v26 }
 0xeb0   :  { %4385 = vmatpush1.bf16.msra.mxu1 %v6156_v23 }
 0xeb1   :  { %4387 = vmatprep.subr.bf16.mxu1 %v6157_v12  ;;  %4433 = vmatpush1.bf16.msra.mxu0 %v5472_v38 }
 0xeb2   :  { %4435 = vmatprep.subr.bf16.mxu0 %v5475_v41 }
 0xeb4   :  { %4389 = vmatpush1.bf16.msra.mxu1 %v6158_v30 }
 0xeb5   :  { %4391 = vmatprep.subr.bf16.mxu1 %v6159_v39  ;;  %4437 = vmatpush1.bf16.msra.mxu0 %v5478_v46 }
 0xeb6   :  { %4439 = vmatprep.subr.bf16.mxu0 %v5578_v45 }
 0xeb7   :  { %3967 = vmatmul.mubr.msk.f32.vlgmr.msra.gmra.mrb[12].mxu1 %vm398_vm1, %v2396_v44 }
 0xeb8   :  { %4393 = vmatpush1.bf16.msra.mxu1 %v5505_v24  ;;  %2719 = vmatprep.mubr.f32.mxu1 %v6147_v0 }
 0xeb9   :  { %4395 = vmatprep.subr.bf16.mxu1 %v5508_v31 }
 0xebc   :  { %4397 = vmatpush1.bf16.msra.mxu1 %v5513_v50 }
 0xebd   :  { %4399 = vmatprep.subr.bf16.mxu1 %v5517_v51 }
 0xec0   :  { %4401 = vmatpush1.bf16.msra.mxu1 %v5523_v58 }
 0xec1   :  { %4403 = vmatprep.subr.bf16.mxu1 %v5526_v60 }
 0xec4   :  { %4405 = vmatpush1.bf16.msra.mxu1 %v5531_v2 }
 0xec5   :  { %4455 = vmatprep.subr.bf16.mxu1 %v5286_v29 }
 0xec7   :  { %3968 = vmatmul.mubr.msk.f32.vlgmr.msra.gmra.mrb[12].mxu1 %vm398_vm1, %v2293_v62 }
 0xec8   :  { %4457 = vmatpush1.bf16.msra.mxu1 %v5291_v33  ;;  %3112 = vmatprep.mubr.f32.mxu1 %v6147_v0 }
 0xec9   :  { %4459 = vmatprep.subr.bf16.mxu1 %v6153_v48 }
 0xecc   :  { %4461 = vmatpush1.bf16.msra.mxu1 %v6154_v6 }
 0xecd   :  { %4463 = vmatprep.subr.bf16.mxu1 %v6155_v53 }
 0xed0   :  { %4465 = vmatpush1.bf16.msra.mxu1 %v6156_v23 }
 0xed1   :  { %4467 = vmatprep.subr.bf16.mxu1 %v6157_v12 }
 0xed4   :  { %4469 = vmatpush1.bf16.msra.mxu1 %v6158_v30 }
 0xed5   :  { %4471 = vmatprep.subr.bf16.mxu1 %v6159_v39 }
 0xf7a   :  { %v2540_v40 = vpop.f32.mrb[10].mxu1  ;;  %v2824_v1 = vpop.f32.mrb[12].mxu0 }
 0xf7b   :  { %v2542_v17 = vpop.f32.mrb[11].mxu1  ;;  %v2826_v10 = vpop.f32.mrb[13].mxu0  ;;  %v4626_v44 = vadd.f32 %v2540_v40, %v5565_v34 }
 0xf7c   :  { %v4627_v37 = vadd.f32 %v2542_v17, %v6152_v54  ;;  %v5916_v4 = vadd.f32 %v2826_v10, %v6151_v9 }
 0xf7d   :  { %v3964_v17 = vmul.f32 -1.442695, %v4626_v44 }
 0xf7e   :  { %4871 = vtanh.f32 %v4627_v37 }
 0xf88   :  { %v4872_v43 = vpop.eup %4871 }
 0xf89   :  { %2562 = vrot.lane.b32.xlu0 %v4872_v43, %s5099_s19 }
 0xf9a   :  { %v2721_v52 = vpop.f32.mrb[12].mxu1 }
 0xf9b   :  { %v2723_v42 = vpop.f32.mrb[13].mxu1  ;;  %v4628_v10 = vadd.f32 %v2721_v52, %v5451_v47 }
 0xf9c   :  { %v5913_v62 = vadd.f32 %v2723_v42, %v6150_v13  ;;  %v4608_v13 = vadd.f32 %v2824_v1, %v5282_v18 }
 0xf9d   :  { %v3969_v39 = vmul.f32 -1.442695, %v4628_v10 }
 0xf9e   :  { %4873 = vtanh.f32 %v5913_v62 }
 0xf9f   :  { %4875 = vtanh.f32 %v5916_v4 }
 0xfa0   :  { %4877 = vpow2.f32 %v3964_v17 }
 0xfa8   :  { %v4874_v55 = vpop.eup %4873 }
 0xfa9   :  { %2743 = vrot.lane.b32.xlu1 %v4874_v55, %s5099_s19  ;;  %v4876_v36 = vpop.eup %4875  ;;  %v3972_v55 = vmul.f32 -1.442695, %v4608_v13 }
 0xfaa   :  { %v4878_v43 = vpop.eup %4877 }
 0xfab   :  { %v2553_v42 = vadd.f32 1.0, %v4878_v43 }
 0xfad   :  { %2846 = vrot.lane.b32.xlu1 %v4876_v36, %s5099_s19  ;;  %4879 = vrcp.f32 %v2553_v42 }
 0xfae   :  { %4881 = vpow2.f32 %v3969_v39 }
 0xfaf   :  { %4883 = vpow2.f32 %v3972_v55 }
 0xfb7   :  { %v4880_v54 = vpop.eup %4879 }
 0xfb8   :  { %v4882_v36 = vpop.eup %4881  ;;  %v2560_v13 = vmul.f32 %v4880_v54, %v5842_v19 }
 0xfb9   :  { %v2734_v40 = vadd.f32 1.0, %v4882_v36  ;;  %v4884_v44 = vpop.eup %4883 }
 0xfba   :  { %v2837_v17 = vadd.f32 1.0, %v4884_v44 }
 0xfbb   :  { %4885 = vrcp.f32 %v2734_v40 }
 0xfbc   :  { %4887 = vrcp.f32 %v2837_v17 }
 0xfc5   :  { %v4886_v43 = vpop.eup %4885 }
 0xfc6   :  { %v4888_v34 = vpop.eup %4887  ;;  %v2741_v55 = vmul.f32 %v4886_v43, %v5846_v49 }
 0xfc7   :  { %v2844_v44 = vmul.f32 %v4888_v34, %v5852_v5  ;;  %v3970_v5 = vmul.f32 -1.442695, %v5913_v62 }
 0xffb   :  { %v2563_v9 = vpop.permute.xlu0 %2562 }
 0xffc   :  { %v2565_v30 = vmul.f32 %v4880_v54, %v2563_v9 }
 0xffe   :  { %2567 = vrot.lane.b32.xlu1 %v2565_v30, %s5099_s19 }
0x101b   :  { %v2744_v42 = vpop.permute.xlu1 %2743 }
0x101c   :  { %v2746_v52 = vmul.f32 %v4886_v43, %v2744_v42 }
0x101e   :  { %2748 = vrot.lane.b32.xlu0 %v2746_v52, %s5099_s19  ;;  %v3965_v52 = vmul.f32 -1.442695, %v4627_v37 }
0x101f   :  { %v2847_v1 = vpop.permute.xlu1 %2846 }
0x1020   :  { %v2849_v10 = vmul.f32 %v4888_v34, %v2847_v1 }
0x1022   :  { %2851 = vrot.lane.b32.xlu0 %v2849_v10, %s5099_s19  ;;  %v2578_v10 = vstv %s3966_s25 }
0x1070   :  { %v2568_v9 = vpop.permute.xlu1 %2567 }
0x1071   :  { %v5929_v30 = vadd.f32 %v2568_v9, %v2560_v13 }
0x1073   :  { %4889 = vtanh.f32 %v5929_v30 }
0x107d   :  { %v4890_v39 = vpop.eup %4889 }
0x107e   :  { %2573 = vrot.lane.b32.xlu0 %v4890_v39, %s5099_s19  ;;  %v3973_v39 = vmul.f32 -1.442695, %v5916_v4 }
0x1090   :  { %v2749_v36 = vpop.permute.xlu0 %2748 }
0x1091   :  { %v5934_v40 = vadd.f32 %v2749_v36, %v2741_v55 }
0x1093   :  { %4891 = vtanh.f32 %v5934_v40 }
0x1094   :  { %v2852_v17 = vpop.permute.xlu0 %2851 }
0x1095   :  { %v5938_v42 = vadd.f32 %v2852_v17, %v2844_v44 }
0x1097   :  { %4893 = vtanh.f32 %v5938_v42 }
0x1098   :  { %4895 = vpow2.f32 %v3965_v52 }
0x109d   :  { %v4892_v54 = vpop.eup %4891 }
0x109e   :  { %2754 = vrot.lane.b32.xlu1 %v4892_v54, %s5099_s19 }
0x10a1   :  { %v4894_v19 = vpop.eup %4893 }
0x10a2   :  { %2857 = vrot.lane.b32.xlu1 %v4894_v19, %s5099_s19  ;;  %v4896_v49 = vpop.eup %4895 }
0x10a3   :  { %v2554_v43 = vadd.f32 1.0, %v4896_v49 }
0x10a5   :  { %4897 = vrcp.f32 %v2554_v43 }
0x10a6   :  { %4899 = vpow2.f32 %v3970_v5  ;;  %v6165_v5 = vld [vmem:[#allocation26_spill] sm:$0xff] }
0x10a7   :  { %4901 = vpow2.f32 %v3973_v39 }
0x10af   :  { %v4898_v1 = vpop.eup %4897 }
0x10b0   :  { %v4900_v37 = vpop.eup %4899 }
0x10b1   :  { %v2735_v36 = vadd.f32 1.0, %v4900_v37  ;;  %v4902_v44 = vpop.eup %4901 }
0x10b2   :  { %v2838_v17 = vadd.f32 1.0, %v4902_v44 }
0x10b3   :  { %4903 = vrcp.f32 %v2735_v36 }
0x10b4   :  { %4905 = vrcp.f32 %v2838_v17 }
0x10bd   :  { %v4904_v54 = vpop.eup %4903 }
0x10be   :  { %v4906_v62 = vpop.eup %4905 }
0x10f0   :  { %v2574_v34 = vpop.permute.xlu0 %2573 }
0x10f1   :  { %v2576_v13 = vmul.f32 %v4898_v1, %v2574_v34 }
0x10f3   :  { %v2579_v9 = vmul.f32 %v2578_v10, %v2576_v13 }
0x10f5   :  { %v5946_v55 = vadd.f32 %v2579_v9, %v5858_v35 }
0x1110   :  { %v2755_v19 = vpop.permute.xlu1 %2754 }
0x1111   :  { %v2757_v52 = vmul.f32 %v4904_v54, %v2755_v19 }
0x1113   :  { %3974 = vmatmul.mubr.msk.f32.vlgmr.msra.gmra.mrb[24].mxu0 %vm398_vm1, %v2757_v52 }
0x1114   :  { %4441 = vmatpush1.bf16.msra.mxu0 %v5591_v20  ;;  %v2858_v4 = vpop.permute.xlu1 %2857  ;;  %3002 = vmatprep.mubr.f32.mxu0 %v6147_v0 }
0x1115   :  { %v2860_v35 = vmul.f32 %v4906_v62, %v2858_v4  ;;  %4443 = vmatprep.subr.bf16.mxu0 %v5593_v56 }
0x1117   :  { %3979 = vmatmul.mubr.msk.f32.vlgmr.msra.gmra.mrb[14].mxu1 %vm398_vm1, %v2860_v35 }
0x1118   :  { %4445 = vmatpush1.bf16.msra.mxu0 %v5597_v8  ;;  %4473 = vmatpush1.bf16.msra.mxu1 %v5505_v24 }
0x1119   :  { %4447 = vmatprep.subr.bf16.mxu0 %v5601_v57  ;;  %4475 = vmatprep.subr.bf16.mxu1 %v5508_v31 }
0x111a   :  { %3183 = vmatprep.mubr.f32.mxu1 %v6147_v0 }
0x111c   :  { %4449 = vmatpush1.bf16.msra.mxu0 %v5606_v59  ;;  %4477 = vmatpush1.bf16.msra.mxu1 %v5513_v50 }
0x111d   :  { %4451 = vmatprep.subr.bf16.mxu0 %v5610_v63  ;;  %4479 = vmatprep.subr.bf16.mxu1 %v5517_v51 }
0x1120   :  { %4453 = vmatpush1.bf16.msra.mxu0 %v5615_v3  ;;  %4481 = vmatpush1.bf16.msra.mxu1 %v5523_v58 }
0x1121   :  { %4483 = vmatprep.subr.bf16.mxu1 %v5526_v60  ;;  %4487 = vmatprep.subr.bf16.mxu0 %v5351_v61  ;;  %v6161_v61 = vld [vmem:[#allocation24_spill] sm:$0xff] }
0x1123   :  { %3975 = vmatmul.mubr.msk.f32.vlgmr.msra.gmra.mrb[24].mxu0 %vm398_vm1, %v2576_v13 }
0x1124   :  { %4485 = vmatpush1.bf16.msra.mxu1 %v5531_v2  ;;  %4489 = vmatpush1.bf16.msra.mxu0 %v5371_v11 }
0x1125   :  { %4491 = vmatprep.subr.bf16.mxu0 %v5373_v14  ;;  %3286 = vmatprep.mubr.f32.mxu0 %v6147_v0 }
0x1126   :  { %4503 = vmatprep.subr.bf16.mxu1 %v5457_v7 }
0x1127   :  { %3980 = vmatmul.mubr.msk.f32.vlgmr.msra.gmra.mrb[14].mxu1 %vm398_vm1, %v2757_v52 }
0x1128   :  { %4493 = vmatpush1.bf16.msra.mxu0 %v5389_v21  ;;  %4505 = vmatpush1.bf16.msra.mxu1 %v5459_v15 }
0x1129   :  { %4495 = vmatprep.subr.bf16.mxu0 %v5393_v22  ;;  %4507 = vmatprep.subr.bf16.mxu1 %v5461_v16  ;;  %v6162_v22 = vld [vmem:[#allocation23_spill] sm:$0xff] }
0x112a   :  { %3392 = vmatprep.mubr.f32.mxu1 %v6147_v0 }
0x112c   :  { %4497 = vmatpush1.bf16.msra.mxu0 %v5408_v27  ;;  %4509 = vmatpush1.bf16.msra.mxu1 %v5466_v25 }
0x112d   :  { %4499 = vmatprep.subr.bf16.mxu0 %v5411_v28  ;;  %4511 = vmatprep.subr.bf16.mxu1 %v5469_v26 }
0x1130   :  { %4501 = vmatpush1.bf16.msra.mxu0 %v5420_v32  ;;  %4513 = vmatpush1.bf16.msra.mxu1 %v5472_v38 }
0x1131   :  { %4535 = vmatprep.subr.bf16.mxu0 %v5286_v29  ;;  %4515 = vmatprep.subr.bf16.mxu1 %v5475_v41  ;;  %v6160_v29 = vld [vmem:[#allocation22_spill] sm:$0xff] }
0x1133   :  { %3983 = vmatmul.mubr.msk.f32.vlgmr.msra.gmra.mrb[14].mxu0 %vm398_vm1, %v2860_v35 }
0x1134   :  { %4537 = vmatpush1.bf16.msra.mxu0 %v5291_v33  ;;  %4517 = vmatpush1.bf16.msra.mxu1 %v5478_v46 }
0x1135   :  { %4539 = vmatprep.subr.bf16.mxu0 %v6153_v48  ;;  %4519 = vmatprep.subr.bf16.mxu1 %v5578_v45 }
0x1136   :  { %3576 = vmatprep.mubr.f32.mxu0 %v6147_v0 }
0x1138   :  { %4541 = vmatpush1.bf16.msra.mxu0 %v6154_v6  ;;  %v6163_v6 = vld [vmem:[#allocation16_spill] sm:$0xff] }
0x1139   :  { %4543 = vmatprep.subr.bf16.mxu0 %v6155_v53 }
0x113c   :  { %4545 = vmatpush1.bf16.msra.mxu0 %v6156_v23  ;;  %v6164_v23 = vld [vmem:[#allocation25_spill] sm:$0xff] }
0x113d   :  { %4547 = vmatprep.subr.bf16.mxu0 %v6157_v12 }
0x1140   :  { %4549 = vmatpush1.bf16.msra.mxu0 %v6160_v29 }
0x1141   :  { %4551 = vmatprep.subr.bf16.mxu0 %v6161_v61 }
0x11f6   :  { %v3004_v33 = vpop.f32.mrb[24].mxu0 }
0x11f7   :  { %v3006_v11 = vpop.f32.mrb[25].mxu0  ;;  %v4630_v13 = vadd.f32 %v3004_v33, %v6165_v5 }
0x11f8   :  { %v4631_v12 = vadd.f32 %v3006_v11, %v6164_v23 }
0x11f9   :  { %v3976_v37 = vmul.f32 -1.442695, %v4630_v13 }
0x11fa   :  { %v3185_v14 = vpop.f32.mrb[14].mxu1 }
0x11fb   :  { %v3187_v21 = vpop.f32.mrb[15].mxu1  ;;  %v4632_v1 = vadd.f32 %v3185_v14, %v5451_v47 }
0x11fc   :  { %v4633_v27 = vadd.f32 %v3187_v21, %v6162_v22 }
0x11fd   :  { %v3981_v10 = vmul.f32 -1.442695, %v4632_v1 }
0x11fe   :  { %4907 = vtanh.f32 %v4633_v27 }
0x1206   :  { %v3288_v28 = vpop.f32.mrb[14].mxu0 }
0x1207   :  { %v3290_v32 = vpop.f32.mrb[15].mxu0  ;;  %v4610_v34 = vadd.f32 %v3288_v28, %v5282_v18 }
0x1208   :  { %v4908_v48 = vpop.eup %4907  ;;  %v4611_v53 = vadd.f32 %v3290_v32, %v6163_v6 }
0x1209   :  { %3207 = vrot.lane.b32.xlu1 %v4908_v48, %s5099_s19  ;;  %v3984_v9 = vmul.f32 -1.442695, %v4610_v34 }
0x120a   :  { %4909 = vtanh.f32 %v4611_v53  ;;  %v3985_v13 = vmul.f32 -1.442695, %v4611_v53 }
0x120b   :  { %4911 = vtanh.f32 %v4631_v12 }
0x120c   :  { %4913 = vpow2.f32 %v3981_v10 }
0x120d   :  { %4915 = vpow2.f32 %v3984_v9 }
0x120e   :  { %4917 = vpow2.f32 %v3976_v37 }
0x1214   :  { %v4910_v49 = vpop.eup %4909 }
0x1215   :  { %3310 = vrot.lane.b32.xlu0 %v4910_v49, %s5099_s19  ;;  %v4912_v43 = vpop.eup %4911 }
0x1216   :  { %v4914_v39 = vpop.eup %4913 }
0x1217   :  { %v3198_v36 = vadd.f32 1.0, %v4914_v39  ;;  %v4916_v44 = vpop.eup %4915  ;;  %v3977_v39 = vmul.f32 -1.442695, %v4631_v12 }
0x1218   :  { %v3301_v17 = vadd.f32 1.0, %v4916_v44  ;;  %v4918_v54 = vpop.eup %4917 }
0x1219   :  { %3026 = vrot.lane.b32.xlu0 %v4912_v43, %s5099_s19  ;;  %4919 = vrcp.f32 %v3198_v36  ;;  %v3017_v4 = vadd.f32 1.0, %v4918_v54 }
0x121a   :  { %4921 = vrcp.f32 %v3301_v17 }
0x121b   :  { %4923 = vrcp.f32 %v3017_v4  ;;  %v3042_v4 = vstv %s3978_s7 }
0x1223   :  { %v4920_v19 = vpop.eup %4919 }
0x1224   :  { %v4922_v18 = vpop.eup %4921  ;;  %v3205_v14 = vmul.f32 %v4920_v19, %v5934_v40 }
0x1225   :  { %v4924_v61 = vpop.eup %4923  ;;  %v3308_v32 = vmul.f32 %v4922_v18, %v5938_v42  ;;  %v3982_v42 = vmul.f32 -1.442695, %v4633_v27 }
0x1226   :  { %v3024_v43 = vmul.f32 %v4924_v61, %v5929_v30 }
0x127b   :  { %v3208_v52 = vpop.permute.xlu1 %3207 }
0x127c   :  { %v3210_v62 = vmul.f32 %v4920_v19, %v3208_v52 }
0x127e   :  { %3212 = vrot.lane.b32.xlu0 %v3210_v62, %s5099_s19 }
0x1287   :  { %v3311_v35 = vpop.permute.xlu0 %3310 }
0x1288   :  { %v3313_v29 = vmul.f32 %v4922_v18, %v3311_v35 }
0x128a   :  { %3315 = vrot.lane.b32.xlu1 %v3313_v29, %s5099_s19 }
0x128b   :  { %v3027_v33 = vpop.permute.xlu0 %3026 }
0x128c   :  { %v3029_v11 = vmul.f32 %v4924_v61, %v3027_v33 }
0x128e   :  { %3031 = vrot.lane.b32.xlu1 %v3029_v11, %s5099_s19 }
0x12f0   :  { %v3213_v21 = vpop.permute.xlu0 %3212 }
0x12f1   :  { %v6011_v28 = vadd.f32 %v3213_v21, %v3205_v14 }
0x12f3   :  { %4925 = vtanh.f32 %v6011_v28 }
0x12fc   :  { %v3316_v48 = vpop.permute.xlu1 %3315 }
0x12fd   :  { %v4926_v6 = vpop.eup %4925  ;;  %v3318_v49 = vadd.f32 %v3316_v48, %v3308_v32 }
0x12fe   :  { %3218 = vrot.lane.b32.xlu1 %v4926_v6, %s5099_s19 }
0x12ff   :  { %4927 = vtanh.f32 %v3318_v49 }
0x1300   :  { %v3032_v1 = vpop.permute.xlu1 %3031 }
0x1301   :  { %v6017_v10 = vadd.f32 %v3032_v1, %v3024_v43 }
0x1303   :  { %4929 = vtanh.f32 %v6017_v10 }
0x1304   :  { %4931 = vpow2.f32 %v3982_v42 }
0x1305   :  { %4933 = vpow2.f32 %v3985_v13 }
0x1306   :  { %4935 = vpow2.f32 %v3977_v39 }
0x1309   :  { %v4928_v40 = vpop.eup %4927 }
0x130a   :  { %3321 = vrot.lane.b32.xlu0 %v4928_v40, %s5099_s19 }
0x130d   :  { %v4930_v34 = vpop.eup %4929 }
0x130e   :  { %3037 = vrot.lane.b32.xlu0 %v4930_v34, %s5099_s19  ;;  %v4932_v9 = vpop.eup %4931 }
0x130f   :  { %v3199_v37 = vadd.f32 1.0, %v4932_v9  ;;  %v4934_v30 = vpop.eup %4933 }
0x1310   :  { %v3302_v36 = vadd.f32 1.0, %v4934_v30  ;;  %v4936_v44 = vpop.eup %4935 }
0x1311   :  { %4937 = vrcp.f32 %v3199_v37  ;;  %v3018_v52 = vadd.f32 1.0, %v4936_v44  ;;  %v3506_v37 = vstv %s3990_s18 }
0x1312   :  { %4939 = vrcp.f32 %v3302_v36 }
0x1313   :  { %4941 = vrcp.f32 %v3018_v52 }
0x131b   :  { %v4938_v17 = vpop.eup %4937 }
0x131c   :  { %v4940_v27 = vpop.eup %4939 }
0x131d   :  { %v4942_v62 = vpop.eup %4941 }
0x1370   :  { %v3219_v54 = vpop.permute.xlu1 %3218 }
0x1371   :  { %v3221_v19 = vmul.f32 %v4938_v17, %v3219_v54 }
0x1373   :  { %3986 = vmatmul.mubr.msk.f32.vlgmr.msra.gmra.mrb[16].mxu1 %vm398_vm1, %v3221_v19 }
0x1374   :  { %4521 = vmatpush1.bf16.msra.mxu1 %v5591_v20  ;;  %3466 = vmatprep.mubr.f32.mxu1 %v6147_v0 }
0x1375   :  { %4523 = vmatprep.subr.bf16.mxu1 %v5593_v56 }
0x1378   :  { %4525 = vmatpush1.bf16.msra.mxu1 %v5597_v8 }
0x1379   :  { %4527 = vmatprep.subr.bf16.mxu1 %v5601_v57 }
0x137c   :  { %4529 = vmatpush1.bf16.msra.mxu1 %v5606_v59  ;;  %v3322_v53 = vpop.permute.xlu0 %3321 }
0x137d   :  { %v3324_v12 = vmul.f32 %v4940_v27, %v3322_v53  ;;  %4531 = vmatprep.subr.bf16.mxu1 %v5610_v63 }
0x137f   :  { %3991 = vmatmul.mubr.msk.f32.vlgmr.msra.gmra.mrb[26].mxu0 %vm398_vm1, %v3324_v12 }
0x1380   :  { %4553 = vmatpush1.bf16.msra.mxu0 %v5505_v24  ;;  %4533 = vmatpush1.bf16.msra.mxu1 %v5615_v3  ;;  %v3038_v18 = vpop.permute.xlu0 %3037 }
0x1381   :  { %v3040_v35 = vmul.f32 %v4942_v62, %v3038_v18  ;;  %4555 = vmatprep.subr.bf16.mxu0 %v5508_v31  ;;  %3647 = vmatprep.mubr.f32.mxu0 %v6147_v0 }
0x1382   :  { %4567 = vmatprep.subr.bf16.mxu1 %v5457_v7 }
0x1383   :  { %v3043_v29 = vmul.f32 %v3042_v4, %v3040_v35  ;;  %3987 = vmatmul.mubr.msk.f32.vlgmr.msra.gmra.mrb[16].mxu1 %vm398_vm1, %v3040_v35 }
0x1384   :  { %4557 = vmatpush1.bf16.msra.mxu0 %v5513_v50  ;;  %4569 = vmatpush1.bf16.msra.mxu1 %v5459_v15 }
0x1385   :  { %v6040_v24 = vadd.f32 %v3043_v29, %v5946_v55  ;;  %4559 = vmatprep.subr.bf16.mxu0 %v5517_v51  ;;  %4571 = vmatprep.subr.bf16.mxu1 %v5461_v16 }
0x1386   :  { %3753 = vmatprep.mubr.f32.mxu1 %v6147_v0 }
0x1388   :  { %4561 = vmatpush1.bf16.msra.mxu0 %v5523_v58  ;;  %4573 = vmatpush1.bf16.msra.mxu1 %v5466_v25 }
0x1389   :  { %4563 = vmatprep.subr.bf16.mxu0 %v5526_v60  ;;  %4575 = vmatprep.subr.bf16.mxu1 %v5469_v26 }
0x138c   :  { %4565 = vmatpush1.bf16.msra.mxu0 %v5531_v2  ;;  %4577 = vmatpush1.bf16.msra.mxu1 %v5472_v38 }
0x138d   :  { %4579 = vmatprep.subr.bf16.mxu1 %v5475_v41 }
0x138f   :  { %3992 = vmatmul.mubr.msk.f32.vlgmr.msra.gmra.mrb[26].mxu0 %vm398_vm1, %v3221_v19 }
0x1390   :  { %4581 = vmatpush1.bf16.msra.mxu1 %v5478_v46 }
0x1391   :  { %4583 = vmatprep.subr.bf16.mxu1 %v5578_v45 }
0x1456   :  { %v3468_v7 = vpop.f32.mrb[16].mxu1 }
0x1457   :  { %v3470_v15 = vpop.f32.mrb[17].mxu1  ;;  %v4634_v41 = vadd.f32 %v3468_v7, %v6165_v5  ;;  %v3867_v7 = vstv %s3999_s27 }
0x1458   :  { %v4635_v16 = vadd.f32 %v3470_v15, %v6164_v23 }
0x1459   :  { %v3988_v46 = vmul.f32 -1.442695, %v4634_v41  ;;  %v3882_v41 = vstv %s6105_s12 }
0x145a   :  { %4943 = vtanh.f32 %v4635_v16  ;;  %v3989_v34 = vmul.f32 -1.442695, %v4635_v16 }
0x1462   :  { %v3649_v25 = vpop.f32.mrb[26].mxu0 }
0x1463   :  { %v3651_v31 = vpop.f32.mrb[27].mxu0  ;;  %v4636_v51 = vadd.f32 %v3649_v25, %v5451_v47 }
0x1464   :  { %v4944_v26 = vpop.eup %4943  ;;  %v4637_v50 = vadd.f32 %v3651_v31, %v6162_v22  ;;  %v4000_v31 = vld [vmem:[%s6103_s10] ss:$0 sm:$0xff] }
0x1465   :  { %3490 = vrot.lane.b32.xlu0 %v4944_v26, %s5099_s19  ;;  %v3993_v58 = vmul.f32 -1.442695, %v4636_v51 }
0x1466   :  { %4945 = vtanh.f32 %v4637_v50  ;;  %v3994_v42 = vmul.f32 -1.442695, %v4637_v50 }
0x1467   :  { %4947 = vpow2.f32 %v3988_v46 }
0x1468   :  { %4949 = vpow2.f32 %v3993_v58 }
0x1470   :  { %v4946_v38 = vpop.eup %4945 }
0x1471   :  { %3671 = vrot.lane.b32.xlu1 %v4946_v38, %s5099_s19  ;;  %v4948_v60 = vpop.eup %4947 }
0x1472   :  { %v3481_v2 = vadd.f32 1.0, %v4948_v60  ;;  %v4950_v45 = vpop.eup %4949 }
0x1473   :  { %v3662_v55 = vadd.f32 1.0, %v4950_v45 }
0x1474   :  { %4951 = vrcp.f32 %v3481_v2 }
0x1475   :  { %4953 = vrcp.f32 %v3662_v55 }
0x147e   :  { %v4952_v22 = vpop.eup %4951 }
0x147f   :  { %v4954_v11 = vpop.eup %4953  ;;  %v3488_v47 = vmul.f32 %v4952_v22, %v6017_v10 }
0x1480   :  { %v3669_v6 = vmul.f32 %v4954_v11, %v6011_v28 }
0x14d7   :  { %v3491_v61 = vpop.permute.xlu0 %3490 }
0x14d8   :  { %v3493_v33 = vmul.f32 %v4952_v22, %v3491_v61 }
0x14da   :  { %3495 = vrot.lane.b32.xlu0 %v3493_v33, %s5099_s19 }
0x14e3   :  { %v3672_v14 = vpop.permute.xlu1 %3671 }
0x14e4   :  { %v3674_v21 = vmul.f32 %v4954_v11, %v3672_v14 }
0x14e6   :  { %3676 = vrot.lane.b32.xlu1 %v3674_v21, %s5099_s19 }
0x154c   :  { %v3496_v32 = vpop.permute.xlu0 %3495 }
0x154d   :  { %v3498_v48 = vadd.f32 %v3496_v32, %v3488_v47 }
0x154f   :  { %4955 = vtanh.f32 %v3498_v48 }
0x1558   :  { %v3677_v49 = vpop.permute.xlu1 %3676 }
0x1559   :  { %v4956_v43 = vpop.eup %4955  ;;  %v3679_v1 = vadd.f32 %v3677_v49, %v3669_v6 }
0x155a   :  { %3501 = vrot.lane.b32.xlu0 %v4956_v43, %s5099_s19 }
0x155b   :  { %4957 = vtanh.f32 %v3679_v1 }
0x155c   :  { %4959 = vpow2.f32 %v3989_v34 }
0x155d   :  { %4961 = vpow2.f32 %v3994_v42 }
0x1565   :  { %v4958_v40 = vpop.eup %4957 }
0x1566   :  { %3682 = vrot.lane.b32.xlu1 %v4958_v40, %s5099_s19  ;;  %v4960_v13 = vpop.eup %4959 }
0x1567   :  { %v3482_v10 = vadd.f32 1.0, %v4960_v13  ;;  %v4962_v9 = vpop.eup %4961 }
0x1568   :  { %v3663_v39 = vadd.f32 1.0, %v4962_v9 }
0x1569   :  { %4963 = vrcp.f32 %v3482_v10 }
0x156a   :  { %4965 = vrcp.f32 %v3663_v39 }
0x1573   :  { %v4964_v28 = vpop.eup %4963 }
0x1574   :  { %v4966_v54 = vpop.eup %4965 }
0x15cc   :  { %v3502_v30 = vpop.permute.xlu0 %3501 }
0x15cd   :  { %v3504_v36 = vmul.f32 %v4964_v28, %v3502_v30 }
0x15cf   :  { %v3507_v44 = vmul.f32 %v3506_v37, %v3504_v36 }
0x15d1   :  { %v3508_v17 = vadd.f32 %v3507_v44, %v6040_v24 }
0x15d8   :  { %v3683_v19 = vpop.permute.xlu1 %3682 }
0x15d9   :  { %v3685_v52 = vmul.f32 %v4966_v54, %v3683_v19 }
0x15db   :  { %3995 = vmatmul.mubr.msk.f32.vlgmr.msra.gmra.mrb[18].mxu1 %vm398_vm1, %v3685_v52 }
0x15dc   :  { %4585 = vmatpush1.bf16.msra.mxu1 %v5591_v20  ;;  %3827 = vmatprep.mubr.f32.mxu1 %v6147_v0 }
0x15dd   :  { %4587 = vmatprep.subr.bf16.mxu1 %v5593_v56 }
0x15e0   :  { %4589 = vmatpush1.bf16.msra.mxu1 %v5597_v8 }
0x15e1   :  { %4591 = vmatprep.subr.bf16.mxu1 %v5601_v57 }
0x15e4   :  { %4593 = vmatpush1.bf16.msra.mxu1 %v5606_v59 }
0x15e5   :  { %4595 = vmatprep.subr.bf16.mxu1 %v5610_v63 }
0x15e8   :  { %4597 = vmatpush1.bf16.msra.mxu1 %v5615_v3 }
0x15eb   :  { %3996 = vmatmul.mubr.msk.f32.vlgmr.msra.gmra.mrb[18].mxu1 %vm398_vm1, %v3504_v36 }
0x16be   :  { %v3829_v27 = vpop.f32.mrb[18].mxu1 }
0x16bf   :  { %v3831_v53 = vpop.f32.mrb[19].mxu1  ;;  %v4638_v56 = vadd.f32 %v3829_v27, %v6165_v5 }
0x16c0   :  { %v4639_v20 = vadd.f32 %v3831_v53, %v6164_v23 }
0x16c1   :  { %v3997_v8 = vmul.f32 -1.442695, %v4638_v56 }
0x16c2   :  { %4967 = vtanh.f32 %v4639_v20  ;;  %v3998_v35 = vmul.f32 -1.442695, %v4639_v20 }
0x16c3   :  { %4969 = vpow2.f32 %v3997_v8 }
0x16cc   :  { %v4968_v0 = vpop.eup %4967 }
0x16cd   :  { %3851 = vrot.lane.b32.xlu1 %v4968_v0, %s5099_s19  ;;  %v4970_v57 = vpop.eup %4969 }
0x16ce   :  { %v3842_v59 = vadd.f32 1.0, %v4970_v57 }
0x16d0   :  { %4971 = vrcp.f32 %v3842_v59 }
0x16da   :  { %v4972_v63 = vpop.eup %4971 }
0x16db   :  { %v3849_v62 = vmul.f32 %v4972_v63, %v3498_v48 }
0x173f   :  { %v3852_v12 = vpop.permute.xlu1 %3851 }
0x1740   :  { %v3854_v3 = vmul.f32 %v4972_v63, %v3852_v12 }
0x1742   :  { %3856 = vrot.lane.b32.xlu0 %v3854_v3, %s5099_s19 }
0x17b4   :  { %v3857_v4 = vpop.permute.xlu0 %3856 }
0x17b5   :  { %v3859_v18 = vadd.f32 %v3857_v4, %v3849_v62 }
0x17b7   :  { %4973 = vtanh.f32 %v3859_v18 }
0x17b8   :  { %4975 = vpow2.f32 %v3998_v35 }
0x17c1   :  { %v4974_v23 = vpop.eup %4973 }
0x17c2   :  { %3862 = vrot.lane.b32.xlu1 %v4974_v23, %s5099_s19  ;;  %v4976_v5 = vpop.eup %4975 }
0x17c3   :  { %v3843_v29 = vadd.f32 1.0, %v4976_v5 }
0x17c5   :  { %4977 = vrcp.f32 %v3843_v29 }
0x17cf   :  { %v4978_v24 = vpop.eup %4977 }
0x1834   :  { %v3863_v15 = vpop.permute.xlu1 %3862 }
0x1835   :  { %v3865_v16 = vmul.f32 %v4978_v24, %v3863_v15 }
0x1837   :  { %v3868_v25 = vmul.f32 %v3867_v7, %v3865_v16 }
0x1839   :  { %v3869_v26 = vadd.f32 %v3868_v25, %v3508_v17 }
0x183b   :  { %v3877_v50 = vmul.f32 %v4000_v31, %v3869_v26 }
0x183d   :  { %v3878_v38 = vsel %vm398_vm1, %v3877_v50, 0.0 }
0x183e   :  { %3879 = vadd.xlane.f32.xlu0 %v3878_v38 }
0x18cb   :  { %v3880_v46 = vpop.xlane.xlu0 %3879 }
0x18cc   :  { %v3883_v51 = vadd.f32 %v3882_v41, %v3880_v46 }
0x18ce   :  { %v4001_v58 = vmul.f32 -1.442695, %v3883_v51 }
0x18d0   :  { %4979 = vpow2.f32 %v4001_v58 }
0x18da   :  { %v4980_v60 = vpop.eup %4979 }
0x18db   :  { %v3887_v2 = vadd.f32 1.0, %v4980_v60 }
0x18dd   :  { %4981 = vrcp.f32 %v3887_v2 }
0x18e7   :  { %v4982_v45 = vpop.eup %4981 }
0x18e8   :  { %3891 = vst.msk [vmem:[%s6106_s13] sm:$0xff] %vm3890_vm2, %v4982_v45 }
0x18e9   :  { %3896 = vsyncpa [#allocation4], 1 }
0x18ea   :  { %3897 = vsyncpa [#allocation7], 1 }
0x18eb   :  { %3898 = vsyncpa [#allocation10], 1 }
0x18ec   :  { %3899 = vsyncpa [#allocation5], 1 }

</bundles_post_ra>
